<compile_context>
chip_gen: v6e
topology: v6e:2x2x1
jax: 0.10.0
libtpu: 0.0.40
codegen_flags: <defaults>
</compile_context>

<pallas_src>
import functools

import numpy as np

import jax
import jax.numpy as jnp
from jax.experimental import pallas as pl
from jax.experimental.pallas import tpu as pltpu


_FC_PAD = 128  # fc hidden widths (120, 84) and the logits are padded to 128 lanes


# --------------------------------------------------------------------------
# Fused kernel: the whole Net forward for one batch tile
# --------------------------------------------------------------------------

def _net_fused_kernel(x_ref, w1e_ref, w1o_ref, b1_ref, w2_ref, b2_ref,
                      fw1_ref, fb1_ref, fw2_ref, fb2_ref, fw3_ref, fb3_ref,
                      o_ref, *, dims):
    """conv1+ReLU+pool+conv2+ReLU+fc1+fc2+fc3, all intermediates in VMEM.

    x_ref  : (TB, H, W*Cin)  bf16   NHWC with (W, Cin) folded into lanes
    w1e_ref: (KH, W*Cin, Wp*C1) bf16  conv1 bands, even output columns
    w1o_ref: (KH, W*Cin, Wp*C1) bf16  conv1 bands, odd output columns
    b1_ref : (1, Wp*C1) f32
    w2_ref : (KH, Wp*C1, Wo2*C2) bf16 conv2 bands on the pooled layout
    b2_ref : (1, Wo2*C2) f32
    fw1_ref: (Ho2, Wo2*C2, 128) bf16  fc1 (flatten folded), fb1_ref: (1,128) f32
    fw2_ref: (128, 128) bf16          fb2_ref: (1,128) f32
    fw3_ref: (128, NCP) bf16          fb3_ref: (1,NCP) f32
    o_ref  : (TB, NCP) f32            NCP = 128-padded num_classes
    """
    KH, Ho1, Hp, Ho2 = dims
    TB = x_ref.shape[0]
    WC_in = x_ref.shape[2]            # W * Cin
    WP = w1e_ref.shape[2]             # Wp * C1  (pooled-width lane layout)
    N2 = w2_ref.shape[2]              # Wo2 * C2

    x = x_ref[...]                    # (TB, H, W*Cin) bf16

    # ---- conv1 (valid, stride 1) as KH banded row-matmuls ------------------
    # Even and odd output columns come from separate weight banks, so the
    # W direction of MaxPool2d(2) is a plain VPU max (no lane relayout) and
    # the stride-2 decimation rides for free inside the MXU.
    acc_e = None
    acc_o = None
    for kh in range(KH):
        band = x[:, kh:kh + Ho1, :].reshape(TB * Ho1, WC_in)
        pe = jnp.dot(band, w1e_ref[kh], preferred_element_type=jnp.float32)
        po = jnp.dot(band, w1o_ref[kh], preferred_element_type=jnp.float32)
        acc_e = pe if acc_e is None else acc_e + pe
        acc_o = po if acc_o is None else acc_o + po

    # W-pool + bias + ReLU.  relu(. + b) is monotone, so it commutes with max.
    wpool = jnp.maximum(jnp.maximum(acc_e, acc_o) + b1_ref[...], 0.0)

    # H-pool: pair adjacent rows (sublane-only split, full 84-lane rows).
    t = wpool.reshape(TB, Hp, 2, WP)
    p1 = jnp.maximum(t[:, :, 0, :], t[:, :, 1, :]).astype(jnp.bfloat16)

    # ---- conv2 (valid, stride 1) banded matmuls + bias + ReLU --------------
    acc2 = None
    for kh in range(KH):
        band = p1[:, kh:kh + Ho2, :].reshape(TB * Ho2, WP)
        part = jnp.dot(band, w2_ref[kh], preferred_element_type=jnp.float32)
        acc2 = part if acc2 is None else acc2 + part
    h2 = jnp.maximum(acc2 + b2_ref[...], 0.0)             # (TB*Ho2, Wo2*C2) f32
    h2 = h2.astype(jnp.bfloat16).reshape(TB, Ho2, N2)

    # ---- fc1 with the NHWC flatten folded into per-row weight blocks -------
    f1 = fb1_ref[...]
    for h in range(Ho2):
        f1 = f1 + jnp.dot(h2[:, h, :], fw1_ref[h],
                          preferred_element_type=jnp.float32)
    f1 = jnp.maximum(f1, 0.0)                              # (TB, 128) f32

    # ---- fc2 / fc3 (zero-padded to 128 lanes; padding columns stay zero) ---
    f2 = jnp.maximum(
        jnp.dot(f1.astype(jnp.bfloat16), fw2_ref[...],
                preferred_element_type=jnp.float32) + fb2_ref[...], 0.0)
    out = (jnp.dot(f2.astype(jnp.bfloat16), fw3_ref[...],
                   preferred_element_type=jnp.float32) + fb3_ref[...])
    o_ref[...] = out.astype(o_ref.dtype)


# --------------------------------------------------------------------------
# One-time weight preparation (banded conv weights, fc permutation + padding)
# --------------------------------------------------------------------------

def _banded_conv_weights(w_hwio, num_in_groups, num_out, out_stride=1,
                         out_offset=0):
    """Per-kh banded matrices for conv-as-row-matmul.

    Output column `o` (of `num_out`) reads input lane-group
    g = o*out_stride + out_offset + kw, so a stride in the output index folds
    pooling decimation directly into the weights.

    Returns wb of shape (KH, num_in_groups*Cin, num_out*Cout) such that, for
    rows laid out as x[n, h, g*Cin + ci]:
        conv_out[n, ho, o*Cout + co] = sum_kh  x_row(ho+kh) @ wb[kh]
    """
    KH, KW, Cin, Cout = w_hwio.shape
    wb = np.zeros((KH, num_in_groups * Cin, num_out * Cout), np.float32)
    for kh in range(KH):
        for kw in range(KW):
            for o in range(num_out):
                g = o * out_stride + out_offset + kw
                wb[kh, g * Cin:(g + 1) * Cin,
                   o * Cout:(o + 1) * Cout] = w_hwio[kh, kw]
    return wb


def prepare_params(params, input_dim, num_classes):
    """One-time transform of module weights into the fused-kernel layout."""
    Cin, H, W = input_dim
    w1 = np.asarray(params["w1"], np.float32)       # (KH, KW, Cin, C1) HWIO
    w2 = np.asarray(params["w2"], np.float32)       # (KH, KW, C1,  C2) HWIO
    b1 = np.asarray(params["b1"], np.float32)
    b2 = np.asarray(params["b2"], np.float32)
    KH, KW, _, C1 = w1.shape
    C2 = w2.shape[3]
    Ho1, Wo1 = H - KH + 1, W - KW + 1
    Hp, Wp = Ho1 // 2, Wo1 // 2
    Ho2, Wo2 = Hp - KH + 1, Wp - KW + 1
    F = C2 * Ho2 * Wo2
    NCP = ((num_classes + _FC_PAD - 1) // _FC_PAD) * _FC_PAD

    # conv1: even / odd output columns (W-pool decimation folded into the MXU).
    w1b_e = _banded_conv_weights(w1, W, Wp, out_stride=2, out_offset=0)
    w1b_o = _banded_conv_weights(w1, W, Wp, out_stride=2, out_offset=1)
    # conv2: standard banding over the pooled (Wp*C1)-lane layout.
    w2b = _banded_conv_weights(w2, Wp, Wo2)
    b1f = np.tile(b1, Wp)[None, :]                   # (1, Wp*C1)
    b2f = np.tile(b2, Wo2)[None, :]                  # (1, Wo2*C2)

    # fc1: permute rows from torch NCHW-flatten order to in-kernel NHWC order,
    # zero-pad to 128 columns, then fold the flatten into (Ho2, Wo2*C2, 128).
    perm = np.arange(F).reshape(C2, Ho2, Wo2).transpose(1, 2, 0).reshape(-1)
    fw1 = np.asarray(params["fw1"], np.float32)[perm]          # (F, 120)
    fb1 = np.asarray(params["fb1"], np.float32)
    fw2 = np.asarray(params["fw2"], np.float32)                 # (120, 84)
    fb2 = np.asarray(params["fb2"], np.float32)
    fw3 = np.asarray(params["fw3"], np.float32)                 # (84, NC)
    fb3 = np.asarray(params["fb3"], np.float32)

    d1, d2 = fw1.shape[1], fw2.shape[1]
    fw1p = np.zeros((F, _FC_PAD), np.float32); fw1p[:, :d1] = fw1
    fw1p = fw1p.reshape(Ho2, Wo2 * C2, _FC_PAD)
    fb1p = np.zeros((1, _FC_PAD), np.float32); fb1p[0, :d1] = fb1
    fw2p = np.zeros((_FC_PAD, _FC_PAD), np.float32); fw2p[:d1, :d2] = fw2
    fb2p = np.zeros((1, _FC_PAD), np.float32); fb2p[0, :d2] = fb2
    fw3p = np.zeros((_FC_PAD, NCP), np.float32); fw3p[:d2, :num_classes] = fw3
    fb3p = np.zeros((1, NCP), np.float32); fb3p[0, :num_classes] = fb3

    bf16 = jnp.bfloat16
    return dict(
        w1e=jnp.asarray(w1b_e, bf16), w1o=jnp.asarray(w1b_o, bf16),
        b1=jnp.asarray(b1f), w2=jnp.asarray(w2b, bf16), b2=jnp.asarray(b2f),
        fw1=jnp.asarray(fw1p, bf16), fb1=jnp.asarray(fb1p),
        fw2=jnp.asarray(fw2p, bf16), fb2=jnp.asarray(fb2p),
        fw3=jnp.asarray(fw3p, bf16), fb3=jnp.asarray(fb3p),
    )


# --------------------------------------------------------------------------
# Forward wrapper: single fused pallas_call with a batch-parallel grid
# --------------------------------------------------------------------------

def make_net_forward(input_dim, num_classes, block_b=128):
    Cin, H, W = input_dim
    KH = KW = 5
    C1, C2 = 6, 16
    Ho1, Wo1 = H - KH + 1, W - KW + 1
    assert Ho1 % 2 == 0 and Wo1 % 2 == 0, "MaxPool2d(2) needs even conv1 output"
    Hp, Wp = Ho1 // 2, Wo1 // 2
    Ho2, Wo2 = Hp - KH + 1, Wp - KW + 1
    NCP = ((num_classes + _FC_PAD - 1) // _FC_PAD) * _FC_PAD
    dims = (KH, Ho1, Hp, Ho2)
    kernel = functools.partial(_net_fused_kernel, dims=dims)

    def forward(x_nchw, prep):
        N = x_nchw.shape[0]
        tb = min(block_b, N)
        if tb < N:
            tb = max(8, (tb // 8) * 8)       # sublane-divisible tiles when batching
        nb = pl.cdiv(N, tb)
        n_pad = nb * tb
        # NCHW -> NHWC with (W, Cin) folded into lanes; bf16 halves the x DMA.
        x = jnp.transpose(x_nchw, (0, 2, 3, 1)).reshape(N, H, W * Cin)
        x = x.astype(jnp.bfloat16)
        if n_pad != N:
            x = jnp.pad(x, ((0, n_pad - N), (0, 0), (0, 0)))

        out = pl.pallas_call(
            kernel,
            out_shape=jax.ShapeDtypeStruct((n_pad, NCP), jnp.float32),
            grid=(nb,),
            in_specs=[
                pl.BlockSpec((tb, H, W * Cin), lambda i: (i, 0, 0)),         # x
                pl.BlockSpec((KH, W * Cin, Wp * C1), lambda i: (0, 0, 0)),   # w1 even
                pl.BlockSpec((KH, W * Cin, Wp * C1), lambda i: (0, 0, 0)),   # w1 odd
                pl.BlockSpec((1, Wp * C1), lambda i: (0, 0)),                # b1
                pl.BlockSpec((KH, Wp * C1, Wo2 * C2), lambda i: (0, 0, 0)),  # w2
                pl.BlockSpec((1, Wo2 * C2), lambda i: (0, 0)),               # b2
                pl.BlockSpec((Ho2, Wo2 * C2, _FC_PAD), lambda i: (0, 0, 0)), # fc1 w
                pl.BlockSpec((1, _FC_PAD), lambda i: (0, 0)),                # fc1 b
                pl.BlockSpec((_FC_PAD, _FC_PAD), lambda i: (0, 0)),          # fc2 w
                pl.BlockSpec((1, _FC_PAD), lambda i: (0, 0)),                # fc2 b
                pl.BlockSpec((_FC_PAD, NCP), lambda i: (0, 0)),              # fc3 w
                pl.BlockSpec((1, NCP), lambda i: (0, 0)),                    # fc3 b
            ],
            out_specs=pl.BlockSpec((tb, NCP), lambda i: (i, 0)),
            compiler_params=pltpu.CompilerParams(
                dimension_semantics=("parallel",),
                vmem_limit_bytes=48 * 1024 * 1024),
        )(x, prep["w1e"], prep["w1o"], prep["b1"], prep["w2"], prep["b2"],
          prep["fw1"], prep["fb1"], prep["fw2"], prep["fb2"],
          prep["fw3"], prep["fb3"])
        out = out[:, :num_classes]
        return out if n_pad == N else out[:N]

    return jax.jit(forward)


# --------------------------------------------------------------------------
# Parameter init (same layout convention as before) and pure-XLA reference
# --------------------------------------------------------------------------

def init_params(key, input_dim=(3, 32, 32), num_classes=10):
    Cin, H, W = input_dim
    h2 = (H - 4) // 2 - 4
    w2 = (W - 4) // 2 - 4
    num_features = 16 * h2 * w2
    ks = jax.random.split(key, 10)
    return {
        "w1": jax.random.normal(ks[0], (5, 5, Cin, 6), jnp.float32) * 0.05,
        "b1": jax.random.normal(ks[1], (6,), jnp.float32) * 0.01,
        "w2": jax.random.normal(ks[2], (5, 5, 6, 16), jnp.float32) * 0.05,
        "b2": jax.random.normal(ks[3], (16,), jnp.float32) * 0.01,
        "fw1": jax.random.normal(ks[4], (num_features, 120), jnp.float32) * 0.02,
        "fb1": jax.random.normal(ks[5], (120,), jnp.float32) * 0.01,
        "fw2": jax.random.normal(ks[6], (120, 84), jnp.float32) * 0.05,
        "fb2": jax.random.normal(ks[7], (84,), jnp.float32) * 0.01,
        "fw3": jax.random.normal(ks[8], (84, num_classes), jnp.float32) * 0.05,
        "fb3": jax.random.normal(ks[9], (num_classes,), jnp.float32) * 0.01,
    }


def reference_forward(x_nchw, params):
    """Pure-XLA reference with torch `Net` semantics (for the self-check)."""
    prec = jax.lax.Precision.HIGHEST
    N = x_nchw.shape[0]
    x = jnp.transpose(x_nchw, (0, 2, 3, 1))
    h1 = jax.lax.conv_general_dilated(
        x, params["w1"], (1, 1), "VALID",
        dimension_numbers=("NHWC", "HWIO", "NHWC"), precision=prec)
    h1 = jnp.maximum(h1 + params["b1"], 0.0)
    p1 = jax.lax.reduce_window(h1, -jnp.inf, jax.lax.max,
                               (1, 2, 2, 1), (1, 2, 2, 1), "VALID")
    h2 = jax.lax.conv_general_dilated(
        p1, params["w2"], (1, 1), "VALID",
        dimension_numbers=("NHWC", "HWIO", "NHWC"), precision=prec)
    h2 = jnp.maximum(h2 + params["b2"], 0.0)
    flat = jnp.transpose(h2, (0, 3, 1, 2)).reshape(N, -1)      # torch .view order
    f1 = jnp.maximum(jnp.dot(flat, params["fw1"], precision=prec) + params["fb1"], 0.0)
    f2 = jnp.maximum(jnp.dot(f1, params["fw2"], precision=prec) + params["fb2"], 0.0)
    return jnp.dot(f2, params["fw3"], precision=prec) + params["fb3"]


if __name__ == "__main__":
    key = jax.random.PRNGKey(0)
    pkey, xkey = jax.random.split(key)
    input_dim = (3, 32, 32)
    num_classes = 10
    batch = 2

    params = init_params(pkey, input_dim=input_dim, num_classes=num_classes)
    prep = prepare_params(params, input_dim, num_classes)
    net_forward = make_net_forward(input_dim, num_classes, block_b=128)

    x = jax.random.normal(xkey, (batch, *input_dim), jnp.float32)   # NCHW input
    out = net_forward(x, prep)
    jax.block_until_ready(out)

    assert out.shape == (batch, num_classes), out.shape
    assert bool(jnp.all(jnp.isfinite(out)))

    ref = jax.jit(reference_forward)(x, params)
    np.testing.assert_allclose(np.asarray(out), np.asarray(ref),
                               atol=2e-2, rtol=2e-2)
    print("KERNEL_OK")
</pallas_src>

<mosaic_0001>
module attributes {stable_mosaic.version = 11 : i64} {
  func.func @_net_fused_kernel(%arg0: i32, %arg1: memref<2x32x96xbf16, #tpu.memory_space<vmem>>, %arg2: memref<5x96x84xbf16, #tpu.memory_space<vmem>>, %arg3: memref<5x96x84xbf16, #tpu.memory_space<vmem>>, %arg4: memref<1x84xf32, #tpu.memory_space<vmem>>, %arg5: memref<5x84x160xbf16, #tpu.memory_space<vmem>>, %arg6: memref<1x160xf32, #tpu.memory_space<vmem>>, %arg7: memref<10x160x128xbf16, #tpu.memory_space<vmem>>, %arg8: memref<1x128xf32, #tpu.memory_space<vmem>>, %arg9: memref<128x128xbf16, #tpu.memory_space<vmem>>, %arg10: memref<1x128xf32, #tpu.memory_space<vmem>>, %arg11: memref<128x128xbf16, #tpu.memory_space<vmem>>, %arg12: memref<1x128xf32, #tpu.memory_space<vmem>>, %arg13: memref<2x128xf32, #tpu.memory_space<vmem>>) attributes {dimension_semantics = [#tpu.dimension_semantics<parallel>], iteration_bounds = array<i64: 1>, scalar_prefetch = 0 : i64, scratch_operands = 0 : i64, tpu.core_type = #tpu.core_type<tc>, window_params = [{transform_indices = @transform_0, window_bounds = array<i64: 2, 32, 96>}, {pipeline_mode = #tpu.pipeline_mode<synchronous>, transform_indices = @transform_1, window_bounds = array<i64: 5, 96, 84>}, {pipeline_mode = #tpu.pipeline_mode<synchronous>, transform_indices = @transform_2, window_bounds = array<i64: 5, 96, 84>}, {pipeline_mode = #tpu.pipeline_mode<synchronous>, transform_indices = @transform_3, window_bounds = array<i64: 1, 84>}, {pipeline_mode = #tpu.pipeline_mode<synchronous>, transform_indices = @transform_4, window_bounds = array<i64: 5, 84, 160>}, {pipeline_mode = #tpu.pipeline_mode<synchronous>, transform_indices = @transform_5, window_bounds = array<i64: 1, 160>}, {pipeline_mode = #tpu.pipeline_mode<synchronous>, transform_indices = @transform_6, window_bounds = array<i64: 10, 160, 128>}, {pipeline_mode = #tpu.pipeline_mode<synchronous>, transform_indices = @transform_7, window_bounds = array<i64: 1, 128>}, {pipeline_mode = #tpu.pipeline_mode<synchronous>, transform_indices = @transform_8, window_bounds = array<i64: 128, 128>}, {pipeline_mode = #tpu.pipeline_mode<synchronous>, transform_indices = @transform_9, window_bounds = array<i64: 1, 128>}, {pipeline_mode = #tpu.pipeline_mode<synchronous>, transform_indices = @transform_10, window_bounds = array<i64: 128, 128>}, {pipeline_mode = #tpu.pipeline_mode<synchronous>, transform_indices = @transform_11, window_bounds = array<i64: 1, 128>}, {transform_indices = @transform_12, window_bounds = array<i64: 2, 128>}]} {
    %c0 = arith.constant 0 : index
    %c0_0 = arith.constant 0 : index
    %c0_1 = arith.constant 0 : index
    %0 = vector.load %arg1[%c0, %c0_0, %c0_1] : memref<2x32x96xbf16, #tpu.memory_space<vmem>>, vector<2x32x96xbf16>
    %1 = vector.extract_strided_slice %0 {offsets = [0, 0, 0], sizes = [2, 28, 96], strides = [1, 1, 1]} : vector<2x32x96xbf16> to vector<2x28x96xbf16>
    %2 = vector.shape_cast %1 : vector<2x28x96xbf16> to vector<56x96xbf16>
    %c0_2 = arith.constant 0 : index
    %c0_3 = arith.constant 0 : index
    %c0_4 = arith.constant 0 : index
    %3 = vector.load %arg2[%c0_2, %c0_3, %c0_4] : memref<5x96x84xbf16, #tpu.memory_space<vmem>>, vector<1x96x84xbf16>
    %4 = vector.shape_cast %3 : vector<1x96x84xbf16> to vector<96x84xbf16>
    %cst = arith.constant dense<0.000000e+00> : vector<56x84xf32>
    %5 = tpu.matmul %2, %4, %cst {dimension_numbers = #tpu.dot_dimension_numbers<[1], [0], [0], [1], [0, 0, 1, 1], [], []>} : vector<56x96xbf16>, vector<96x84xbf16>, vector<56x84xf32> -> vector<56x84xf32>
    %c0_5 = arith.constant 0 : index
    %c0_6 = arith.constant 0 : index
    %c0_7 = arith.constant 0 : index
    %6 = vector.load %arg3[%c0_5, %c0_6, %c0_7] : memref<5x96x84xbf16, #tpu.memory_space<vmem>>, vector<1x96x84xbf16>
    %7 = vector.shape_cast %6 : vector<1x96x84xbf16> to vector<96x84xbf16>
    %cst_8 = arith.constant dense<0.000000e+00> : vector<56x84xf32>
    %8 = tpu.matmul %2, %7, %cst_8 {dimension_numbers = #tpu.dot_dimension_numbers<[1], [0], [0], [1], [0, 0, 1, 1], [], []>} : vector<56x96xbf16>, vector<96x84xbf16>, vector<56x84xf32> -> vector<56x84xf32>
    %9 = vector.extract_strided_slice %0 {offsets = [0, 1, 0], sizes = [2, 28, 96], strides = [1, 1, 1]} : vector<2x32x96xbf16> to vector<2x28x96xbf16>
    %10 = vector.shape_cast %9 : vector<2x28x96xbf16> to vector<56x96xbf16>
    %c1 = arith.constant 1 : index
    %c0_9 = arith.constant 0 : index
    %c0_10 = arith.constant 0 : index
    %11 = vector.load %arg2[%c1, %c0_9, %c0_10] : memref<5x96x84xbf16, #tpu.memory_space<vmem>>, vector<1x96x84xbf16>
    %12 = vector.shape_cast %11 : vector<1x96x84xbf16> to vector<96x84xbf16>
    %cst_11 = arith.constant dense<0.000000e+00> : vector<56x84xf32>
    %13 = tpu.matmul %10, %12, %cst_11 {dimension_numbers = #tpu.dot_dimension_numbers<[1], [0], [0], [1], [0, 0, 1, 1], [], []>} : vector<56x96xbf16>, vector<96x84xbf16>, vector<56x84xf32> -> vector<56x84xf32>
    %c1_12 = arith.constant 1 : index
    %c0_13 = arith.constant 0 : index
    %c0_14 = arith.constant 0 : index
    %14 = vector.load %arg3[%c1_12, %c0_13, %c0_14] : memref<5x96x84xbf16, #tpu.memory_space<vmem>>, vector<1x96x84xbf16>
    %15 = vector.shape_cast %14 : vector<1x96x84xbf16> to vector<96x84xbf16>
    %cst_15 = arith.constant dense<0.000000e+00> : vector<56x84xf32>
    %16 = tpu.matmul %10, %15, %cst_15 {dimension_numbers = #tpu.dot_dimension_numbers<[1], [0], [0], [1], [0, 0, 1, 1], [], []>} : vector<56x96xbf16>, vector<96x84xbf16>, vector<56x84xf32> -> vector<56x84xf32>
    %17 = arith.addf %5, %13 : vector<56x84xf32>
    %18 = arith.addf %8, %16 : vector<56x84xf32>
    %19 = vector.extract_strided_slice %0 {offsets = [0, 2, 0], sizes = [2, 28, 96], strides = [1, 1, 1]} : vector<2x32x96xbf16> to vector<2x28x96xbf16>
    %20 = vector.shape_cast %19 : vector<2x28x96xbf16> to vector<56x96xbf16>
    %c2 = arith.constant 2 : index
    %c0_16 = arith.constant 0 : index
    %c0_17 = arith.constant 0 : index
    %21 = vector.load %arg2[%c2, %c0_16, %c0_17] : memref<5x96x84xbf16, #tpu.memory_space<vmem>>, vector<1x96x84xbf16>
    %22 = vector.shape_cast %21 : vector<1x96x84xbf16> to vector<96x84xbf16>
    %cst_18 = arith.constant dense<0.000000e+00> : vector<56x84xf32>
    %23 = tpu.matmul %20, %22, %cst_18 {dimension_numbers = #tpu.dot_dimension_numbers<[1], [0], [0], [1], [0, 0, 1, 1], [], []>} : vector<56x96xbf16>, vector<96x84xbf16>, vector<56x84xf32> -> vector<56x84xf32>
    %c2_19 = arith.constant 2 : index
    %c0_20 = arith.constant 0 : index
    %c0_21 = arith.constant 0 : index
    %24 = vector.load %arg3[%c2_19, %c0_20, %c0_21] : memref<5x96x84xbf16, #tpu.memory_space<vmem>>, vector<1x96x84xbf16>
    %25 = vector.shape_cast %24 : vector<1x96x84xbf16> to vector<96x84xbf16>
    %cst_22 = arith.constant dense<0.000000e+00> : vector<56x84xf32>
    %26 = tpu.matmul %20, %25, %cst_22 {dimension_numbers = #tpu.dot_dimension_numbers<[1], [0], [0], [1], [0, 0, 1, 1], [], []>} : vector<56x96xbf16>, vector<96x84xbf16>, vector<56x84xf32> -> vector<56x84xf32>
    %27 = arith.addf %17, %23 : vector<56x84xf32>
    %28 = arith.addf %18, %26 : vector<56x84xf32>
    %29 = vector.extract_strided_slice %0 {offsets = [0, 3, 0], sizes = [2, 28, 96], strides = [1, 1, 1]} : vector<2x32x96xbf16> to vector<2x28x96xbf16>
    %30 = vector.shape_cast %29 : vector<2x28x96xbf16> to vector<56x96xbf16>
    %c3 = arith.constant 3 : index
    %c0_23 = arith.constant 0 : index
    %c0_24 = arith.constant 0 : index
    %31 = vector.load %arg2[%c3, %c0_23, %c0_24] : memref<5x96x84xbf16, #tpu.memory_space<vmem>>, vector<1x96x84xbf16>
    %32 = vector.shape_cast %31 : vector<1x96x84xbf16> to vector<96x84xbf16>
    %cst_25 = arith.constant dense<0.000000e+00> : vector<56x84xf32>
    %33 = tpu.matmul %30, %32, %cst_25 {dimension_numbers = #tpu.dot_dimension_numbers<[1], [0], [0], [1], [0, 0, 1, 1], [], []>} : vector<56x96xbf16>, vector<96x84xbf16>, vector<56x84xf32> -> vector<56x84xf32>
    %c3_26 = arith.constant 3 : index
    %c0_27 = arith.constant 0 : index
    %c0_28 = arith.constant 0 : index
    %34 = vector.load %arg3[%c3_26, %c0_27, %c0_28] : memref<5x96x84xbf16, #tpu.memory_space<vmem>>, vector<1x96x84xbf16>
    %35 = vector.shape_cast %34 : vector<1x96x84xbf16> to vector<96x84xbf16>
    %cst_29 = arith.constant dense<0.000000e+00> : vector<56x84xf32>
    %36 = tpu.matmul %30, %35, %cst_29 {dimension_numbers = #tpu.dot_dimension_numbers<[1], [0], [0], [1], [0, 0, 1, 1], [], []>} : vector<56x96xbf16>, vector<96x84xbf16>, vector<56x84xf32> -> vector<56x84xf32>
    %37 = arith.addf %27, %33 : vector<56x84xf32>
    %38 = arith.addf %28, %36 : vector<56x84xf32>
    %39 = vector.extract_strided_slice %0 {offsets = [0, 4, 0], sizes = [2, 28, 96], strides = [1, 1, 1]} : vector<2x32x96xbf16> to vector<2x28x96xbf16>
    %40 = vector.shape_cast %39 : vector<2x28x96xbf16> to vector<56x96xbf16>
    %c4 = arith.constant 4 : index
    %c0_30 = arith.constant 0 : index
    %c0_31 = arith.constant 0 : index
    %41 = vector.load %arg2[%c4, %c0_30, %c0_31] : memref<5x96x84xbf16, #tpu.memory_space<vmem>>, vector<1x96x84xbf16>
    %42 = vector.shape_cast %41 : vector<1x96x84xbf16> to vector<96x84xbf16>
    %cst_32 = arith.constant dense<0.000000e+00> : vector<56x84xf32>
    %43 = tpu.matmul %40, %42, %cst_32 {dimension_numbers = #tpu.dot_dimension_numbers<[1], [0], [0], [1], [0, 0, 1, 1], [], []>} : vector<56x96xbf16>, vector<96x84xbf16>, vector<56x84xf32> -> vector<56x84xf32>
    %c4_33 = arith.constant 4 : index
    %c0_34 = arith.constant 0 : index
    %c0_35 = arith.constant 0 : index
    %44 = vector.load %arg3[%c4_33, %c0_34, %c0_35] : memref<5x96x84xbf16, #tpu.memory_space<vmem>>, vector<1x96x84xbf16>
    %45 = vector.shape_cast %44 : vector<1x96x84xbf16> to vector<96x84xbf16>
    %cst_36 = arith.constant dense<0.000000e+00> : vector<56x84xf32>
    %46 = tpu.matmul %40, %45, %cst_36 {dimension_numbers = #tpu.dot_dimension_numbers<[1], [0], [0], [1], [0, 0, 1, 1], [], []>} : vector<56x96xbf16>, vector<96x84xbf16>, vector<56x84xf32> -> vector<56x84xf32>
    %47 = arith.addf %37, %43 : vector<56x84xf32>
    %48 = arith.addf %38, %46 : vector<56x84xf32>
    %49 = arith.maximumf %47, %48 : vector<56x84xf32>
    %c0_37 = arith.constant 0 : index
    %c0_38 = arith.constant 0 : index
    %50 = vector.load %arg4[%c0_37, %c0_38] : memref<1x84xf32, #tpu.memory_space<vmem>>, vector<1x84xf32>
    %51 = vector.broadcast %50 : vector<1x84xf32> to vector<56x84xf32>
    %52 = arith.addf %49, %51 : vector<56x84xf32>
    %cst_39 = arith.constant 0.000000e+00 : f32
    %53 = vector.broadcast %cst_39 : f32 to vector<56x84xf32>
    %54 = arith.maximumf %52, %53 : vector<56x84xf32>
    %55 = vector.shape_cast %54 : vector<56x84xf32> to vector<2x14x2x84xf32>
    %56 = vector.extract_strided_slice %55 {offsets = [0, 0, 0, 0], sizes = [2, 14, 1, 84], strides = [1, 1, 1, 1]} : vector<2x14x2x84xf32> to vector<2x14x1x84xf32>
    %57 = vector.shape_cast %56 : vector<2x14x1x84xf32> to vector<2x14x84xf32>
    %58 = vector.extract_strided_slice %55 {offsets = [0, 0, 1, 0], sizes = [2, 14, 1, 84], strides = [1, 1, 1, 1]} : vector<2x14x2x84xf32> to vector<2x14x1x84xf32>
    %59 = vector.shape_cast %58 : vector<2x14x1x84xf32> to vector<2x14x84xf32>
    %60 = arith.maximumf %57, %59 : vector<2x14x84xf32>
    %61 = arith.truncf %60 : vector<2x14x84xf32> to vector<2x14x84xbf16>
    %62 = vector.extract_strided_slice %61 {offsets = [0, 0, 0], sizes = [2, 10, 84], strides = [1, 1, 1]} : vector<2x14x84xbf16> to vector<2x10x84xbf16>
    %63 = vector.shape_cast %62 : vector<2x10x84xbf16> to vector<20x84xbf16>
    %c0_40 = arith.constant 0 : index
    %c0_41 = arith.constant 0 : index
    %c0_42 = arith.constant 0 : index
    %64 = vector.load %arg5[%c0_40, %c0_41, %c0_42] : memref<5x84x160xbf16, #tpu.memory_space<vmem>>, vector<1x84x160xbf16>
    %65 = vector.shape_cast %64 : vector<1x84x160xbf16> to vector<84x160xbf16>
    %cst_43 = arith.constant dense<0.000000e+00> : vector<20x160xf32>
    %66 = tpu.matmul %63, %65, %cst_43 {dimension_numbers = #tpu.dot_dimension_numbers<[1], [0], [0], [1], [0, 0, 1, 1], [], []>} : vector<20x84xbf16>, vector<84x160xbf16>, vector<20x160xf32> -> vector<20x160xf32>
    %67 = vector.extract_strided_slice %61 {offsets = [0, 1, 0], sizes = [2, 10, 84], strides = [1, 1, 1]} : vector<2x14x84xbf16> to vector<2x10x84xbf16>
    %68 = vector.shape_cast %67 : vector<2x10x84xbf16> to vector<20x84xbf16>
    %c1_44 = arith.constant 1 : index
    %c0_45 = arith.constant 0 : index
    %c0_46 = arith.constant 0 : index
    %69 = vector.load %arg5[%c1_44, %c0_45, %c0_46] : memref<5x84x160xbf16, #tpu.memory_space<vmem>>, vector<1x84x160xbf16>
    %70 = vector.shape_cast %69 : vector<1x84x160xbf16> to vector<84x160xbf16>
    %cst_47 = arith.constant dense<0.000000e+00> : vector<20x160xf32>
    %71 = tpu.matmul %68, %70, %cst_47 {dimension_numbers = #tpu.dot_dimension_numbers<[1], [0], [0], [1], [0, 0, 1, 1], [], []>} : vector<20x84xbf16>, vector<84x160xbf16>, vector<20x160xf32> -> vector<20x160xf32>
    %72 = arith.addf %66, %71 : vector<20x160xf32>
    %73 = vector.extract_strided_slice %61 {offsets = [0, 2, 0], sizes = [2, 10, 84], strides = [1, 1, 1]} : vector<2x14x84xbf16> to vector<2x10x84xbf16>
    %74 = vector.shape_cast %73 : vector<2x10x84xbf16> to vector<20x84xbf16>
    %c2_48 = arith.constant 2 : index
    %c0_49 = arith.constant 0 : index
    %c0_50 = arith.constant 0 : index
    %75 = vector.load %arg5[%c2_48, %c0_49, %c0_50] : memref<5x84x160xbf16, #tpu.memory_space<vmem>>, vector<1x84x160xbf16>
    %76 = vector.shape_cast %75 : vector<1x84x160xbf16> to vector<84x160xbf16>
    %cst_51 = arith.constant dense<0.000000e+00> : vector<20x160xf32>
    %77 = tpu.matmul %74, %76, %cst_51 {dimension_numbers = #tpu.dot_dimension_numbers<[1], [0], [0], [1], [0, 0, 1, 1], [], []>} : vector<20x84xbf16>, vector<84x160xbf16>, vector<20x160xf32> -> vector<20x160xf32>
    %78 = arith.addf %72, %77 : vector<20x160xf32>
    %79 = vector.extract_strided_slice %61 {offsets = [0, 3, 0], sizes = [2, 10, 84], strides = [1, 1, 1]} : vector<2x14x84xbf16> to vector<2x10x84xbf16>
    %80 = vector.shape_cast %79 : vector<2x10x84xbf16> to vector<20x84xbf16>
    %c3_52 = arith.constant 3 : index
    %c0_53 = arith.constant 0 : index
    %c0_54 = arith.constant 0 : index
    %81 = vector.load %arg5[%c3_52, %c0_53, %c0_54] : memref<5x84x160xbf16, #tpu.memory_space<vmem>>, vector<1x84x160xbf16>
    %82 = vector.shape_cast %81 : vector<1x84x160xbf16> to vector<84x160xbf16>
    %cst_55 = arith.constant dense<0.000000e+00> : vector<20x160xf32>
    %83 = tpu.matmul %80, %82, %cst_55 {dimension_numbers = #tpu.dot_dimension_numbers<[1], [0], [0], [1], [0, 0, 1, 1], [], []>} : vector<20x84xbf16>, vector<84x160xbf16>, vector<20x160xf32> -> vector<20x160xf32>
    %84 = arith.addf %78, %83 : vector<20x160xf32>
    %85 = vector.extract_strided_slice %61 {offsets = [0, 4, 0], sizes = [2, 10, 84], strides = [1, 1, 1]} : vector<2x14x84xbf16> to vector<2x10x84xbf16>
    %86 = vector.shape_cast %85 : vector<2x10x84xbf16> to vector<20x84xbf16>
    %c4_56 = arith.constant 4 : index
    %c0_57 = arith.constant 0 : index
    %c0_58 = arith.constant 0 : index
    %87 = vector.load %arg5[%c4_56, %c0_57, %c0_58] : memref<5x84x160xbf16, #tpu.memory_space<vmem>>, vector<1x84x160xbf16>
    %88 = vector.shape_cast %87 : vector<1x84x160xbf16> to vector<84x160xbf16>
    %cst_59 = arith.constant dense<0.000000e+00> : vector<20x160xf32>
    %89 = tpu.matmul %86, %88, %cst_59 {dimension_numbers = #tpu.dot_dimension_numbers<[1], [0], [0], [1], [0, 0, 1, 1], [], []>} : vector<20x84xbf16>, vector<84x160xbf16>, vector<20x160xf32> -> vector<20x160xf32>
    %90 = arith.addf %84, %89 : vector<20x160xf32>
    %c0_60 = arith.constant 0 : index
    %c0_61 = arith.constant 0 : index
    %91 = vector.load %arg6[%c0_60, %c0_61] : memref<1x160xf32, #tpu.memory_space<vmem>>, vector<1x160xf32>
    %92 = vector.broadcast %91 : vector<1x160xf32> to vector<20x160xf32>
    %93 = arith.addf %90, %92 : vector<20x160xf32>
    %cst_62 = arith.constant 0.000000e+00 : f32
    %94 = vector.broadcast %cst_62 : f32 to vector<20x160xf32>
    %95 = arith.maximumf %93, %94 : vector<20x160xf32>
    %96 = arith.truncf %95 : vector<20x160xf32> to vector<20x160xbf16>
    %97 = vector.shape_cast %96 : vector<20x160xbf16> to vector<2x10x160xbf16>
    %c0_63 = arith.constant 0 : index
    %c0_64 = arith.constant 0 : index
    %98 = vector.load %arg8[%c0_63, %c0_64] : memref<1x128xf32, #tpu.memory_space<vmem>>, vector<1x128xf32>
    %99 = vector.extract_strided_slice %97 {offsets = [0, 0, 0], sizes = [2, 1, 160], strides = [1, 1, 1]} : vector<2x10x160xbf16> to vector<2x1x160xbf16>
    %100 = vector.shape_cast %99 : vector<2x1x160xbf16> to vector<2x160xbf16>
    %c0_65 = arith.constant 0 : index
    %c0_66 = arith.constant 0 : index
    %c0_67 = arith.constant 0 : index
    %101 = vector.load %arg7[%c0_65, %c0_66, %c0_67] : memref<10x160x128xbf16, #tpu.memory_space<vmem>>, vector<1x160x128xbf16>
    %102 = vector.shape_cast %101 : vector<1x160x128xbf16> to vector<160x128xbf16>
    %cst_68 = arith.constant dense<0.000000e+00> : vector<2x128xf32>
    %103 = tpu.matmul %100, %102, %cst_68 {dimension_numbers = #tpu.dot_dimension_numbers<[1], [0], [0], [1], [0, 0, 1, 1], [], []>} : vector<2x160xbf16>, vector<160x128xbf16>, vector<2x128xf32> -> vector<2x128xf32>
    %104 = vector.broadcast %98 : vector<1x128xf32> to vector<2x128xf32>
    %105 = arith.addf %104, %103 : vector<2x128xf32>
    %106 = vector.extract_strided_slice %97 {offsets = [0, 1, 0], sizes = [2, 1, 160], strides = [1, 1, 1]} : vector<2x10x160xbf16> to vector<2x1x160xbf16>
    %107 = vector.shape_cast %106 : vector<2x1x160xbf16> to vector<2x160xbf16>
    %c1_69 = arith.constant 1 : index
    %c0_70 = arith.constant 0 : index
    %c0_71 = arith.constant 0 : index
    %108 = vector.load %arg7[%c1_69, %c0_70, %c0_71] : memref<10x160x128xbf16, #tpu.memory_space<vmem>>, vector<1x160x128xbf16>
    %109 = vector.shape_cast %108 : vector<1x160x128xbf16> to vector<160x128xbf16>
    %cst_72 = arith.constant dense<0.000000e+00> : vector<2x128xf32>
    %110 = tpu.matmul %107, %109, %cst_72 {dimension_numbers = #tpu.dot_dimension_numbers<[1], [0], [0], [1], [0, 0, 1, 1], [], []>} : vector<2x160xbf16>, vector<160x128xbf16>, vector<2x128xf32> -> vector<2x128xf32>
    %111 = arith.addf %105, %110 : vector<2x128xf32>
    %112 = vector.extract_strided_slice %97 {offsets = [0, 2, 0], sizes = [2, 1, 160], strides = [1, 1, 1]} : vector<2x10x160xbf16> to vector<2x1x160xbf16>
    %113 = vector.shape_cast %112 : vector<2x1x160xbf16> to vector<2x160xbf16>
    %c2_73 = arith.constant 2 : index
    %c0_74 = arith.constant 0 : index
    %c0_75 = arith.constant 0 : index
    %114 = vector.load %arg7[%c2_73, %c0_74, %c0_75] : memref<10x160x128xbf16, #tpu.memory_space<vmem>>, vector<1x160x128xbf16>
    %115 = vector.shape_cast %114 : vector<1x160x128xbf16> to vector<160x128xbf16>
    %cst_76 = arith.constant dense<0.000000e+00> : vector<2x128xf32>
    %116 = tpu.matmul %113, %115, %cst_76 {dimension_numbers = #tpu.dot_dimension_numbers<[1], [0], [0], [1], [0, 0, 1, 1], [], []>} : vector<2x160xbf16>, vector<160x128xbf16>, vector<2x128xf32> -> vector<2x128xf32>
    %117 = arith.addf %111, %116 : vector<2x128xf32>
    %118 = vector.extract_strided_slice %97 {offsets = [0, 3, 0], sizes = [2, 1, 160], strides = [1, 1, 1]} : vector<2x10x160xbf16> to vector<2x1x160xbf16>
    %119 = vector.shape_cast %118 : vector<2x1x160xbf16> to vector<2x160xbf16>
    %c3_77 = arith.constant 3 : index
    %c0_78 = arith.constant 0 : index
    %c0_79 = arith.constant 0 : index
    %120 = vector.load %arg7[%c3_77, %c0_78, %c0_79] : memref<10x160x128xbf16, #tpu.memory_space<vmem>>, vector<1x160x128xbf16>
    %121 = vector.shape_cast %120 : vector<1x160x128xbf16> to vector<160x128xbf16>
    %cst_80 = arith.constant dense<0.000000e+00> : vector<2x128xf32>
    %122 = tpu.matmul %119, %121, %cst_80 {dimension_numbers = #tpu.dot_dimension_numbers<[1], [0], [0], [1], [0, 0, 1, 1], [], []>} : vector<2x160xbf16>, vector<160x128xbf16>, vector<2x128xf32> -> vector<2x128xf32>
    %123 = arith.addf %117, %122 : vector<2x128xf32>
    %124 = vector.extract_strided_slice %97 {offsets = [0, 4, 0], sizes = [2, 1, 160], strides = [1, 1, 1]} : vector<2x10x160xbf16> to vector<2x1x160xbf16>
    %125 = vector.shape_cast %124 : vector<2x1x160xbf16> to vector<2x160xbf16>
    %c4_81 = arith.constant 4 : index
    %c0_82 = arith.constant 0 : index
    %c0_83 = arith.constant 0 : index
    %126 = vector.load %arg7[%c4_81, %c0_82, %c0_83] : memref<10x160x128xbf16, #tpu.memory_space<vmem>>, vector<1x160x128xbf16>
    %127 = vector.shape_cast %126 : vector<1x160x128xbf16> to vector<160x128xbf16>
    %cst_84 = arith.constant dense<0.000000e+00> : vector<2x128xf32>
    %128 = tpu.matmul %125, %127, %cst_84 {dimension_numbers = #tpu.dot_dimension_numbers<[1], [0], [0], [1], [0, 0, 1, 1], [], []>} : vector<2x160xbf16>, vector<160x128xbf16>, vector<2x128xf32> -> vector<2x128xf32>
    %129 = arith.addf %123, %128 : vector<2x128xf32>
    %130 = vector.extract_strided_slice %97 {offsets = [0, 5, 0], sizes = [2, 1, 160], strides = [1, 1, 1]} : vector<2x10x160xbf16> to vector<2x1x160xbf16>
    %131 = vector.shape_cast %130 : vector<2x1x160xbf16> to vector<2x160xbf16>
    %c5 = arith.constant 5 : index
    %c0_85 = arith.constant 0 : index
    %c0_86 = arith.constant 0 : index
    %132 = vector.load %arg7[%c5, %c0_85, %c0_86] : memref<10x160x128xbf16, #tpu.memory_space<vmem>>, vector<1x160x128xbf16>
    %133 = vector.shape_cast %132 : vector<1x160x128xbf16> to vector<160x128xbf16>
    %cst_87 = arith.constant dense<0.000000e+00> : vector<2x128xf32>
    %134 = tpu.matmul %131, %133, %cst_87 {dimension_numbers = #tpu.dot_dimension_numbers<[1], [0], [0], [1], [0, 0, 1, 1], [], []>} : vector<2x160xbf16>, vector<160x128xbf16>, vector<2x128xf32> -> vector<2x128xf32>
    %135 = arith.addf %129, %134 : vector<2x128xf32>
    %136 = vector.extract_strided_slice %97 {offsets = [0, 6, 0], sizes = [2, 1, 160], strides = [1, 1, 1]} : vector<2x10x160xbf16> to vector<2x1x160xbf16>
    %137 = vector.shape_cast %136 : vector<2x1x160xbf16> to vector<2x160xbf16>
    %c6 = arith.constant 6 : index
    %c0_88 = arith.constant 0 : index
    %c0_89 = arith.constant 0 : index
    %138 = vector.load %arg7[%c6, %c0_88, %c0_89] : memref<10x160x128xbf16, #tpu.memory_space<vmem>>, vector<1x160x128xbf16>
    %139 = vector.shape_cast %138 : vector<1x160x128xbf16> to vector<160x128xbf16>
    %cst_90 = arith.constant dense<0.000000e+00> : vector<2x128xf32>
    %140 = tpu.matmul %137, %139, %cst_90 {dimension_numbers = #tpu.dot_dimension_numbers<[1], [0], [0], [1], [0, 0, 1, 1], [], []>} : vector<2x160xbf16>, vector<160x128xbf16>, vector<2x128xf32> -> vector<2x128xf32>
    %141 = arith.addf %135, %140 : vector<2x128xf32>
    %142 = vector.extract_strided_slice %97 {offsets = [0, 7, 0], sizes = [2, 1, 160], strides = [1, 1, 1]} : vector<2x10x160xbf16> to vector<2x1x160xbf16>
    %143 = vector.shape_cast %142 : vector<2x1x160xbf16> to vector<2x160xbf16>
    %c7 = arith.constant 7 : index
    %c0_91 = arith.constant 0 : index
    %c0_92 = arith.constant 0 : index
    %144 = vector.load %arg7[%c7, %c0_91, %c0_92] : memref<10x160x128xbf16, #tpu.memory_space<vmem>>, vector<1x160x128xbf16>
    %145 = vector.shape_cast %144 : vector<1x160x128xbf16> to vector<160x128xbf16>
    %cst_93 = arith.constant dense<0.000000e+00> : vector<2x128xf32>
    %146 = tpu.matmul %143, %145, %cst_93 {dimension_numbers = #tpu.dot_dimension_numbers<[1], [0], [0], [1], [0, 0, 1, 1], [], []>} : vector<2x160xbf16>, vector<160x128xbf16>, vector<2x128xf32> -> vector<2x128xf32>
    %147 = arith.addf %141, %146 : vector<2x128xf32>
    %148 = vector.extract_strided_slice %97 {offsets = [0, 8, 0], sizes = [2, 1, 160], strides = [1, 1, 1]} : vector<2x10x160xbf16> to vector<2x1x160xbf16>
    %149 = vector.shape_cast %148 : vector<2x1x160xbf16> to vector<2x160xbf16>
    %c8 = arith.constant 8 : index
    %c0_94 = arith.constant 0 : index
    %c0_95 = arith.constant 0 : index
    %150 = vector.load %arg7[%c8, %c0_94, %c0_95] : memref<10x160x128xbf16, #tpu.memory_space<vmem>>, vector<1x160x128xbf16>
    %151 = vector.shape_cast %150 : vector<1x160x128xbf16> to vector<160x128xbf16>
    %cst_96 = arith.constant dense<0.000000e+00> : vector<2x128xf32>
    %152 = tpu.matmul %149, %151, %cst_96 {dimension_numbers = #tpu.dot_dimension_numbers<[1], [0], [0], [1], [0, 0, 1, 1], [], []>} : vector<2x160xbf16>, vector<160x128xbf16>, vector<2x128xf32> -> vector<2x128xf32>
    %153 = arith.addf %147, %152 : vector<2x128xf32>
    %154 = vector.extract_strided_slice %97 {offsets = [0, 9, 0], sizes = [2, 1, 160], strides = [1, 1, 1]} : vector<2x10x160xbf16> to vector<2x1x160xbf16>
    %155 = vector.shape_cast %154 : vector<2x1x160xbf16> to vector<2x160xbf16>
    %c9 = arith.constant 9 : index
    %c0_97 = arith.constant 0 : index
    %c0_98 = arith.constant 0 : index
    %156 = vector.load %arg7[%c9, %c0_97, %c0_98] : memref<10x160x128xbf16, #tpu.memory_space<vmem>>, vector<1x160x128xbf16>
    %157 = vector.shape_cast %156 : vector<1x160x128xbf16> to vector<160x128xbf16>
    %cst_99 = arith.constant dense<0.000000e+00> : vector<2x128xf32>
    %158 = tpu.matmul %155, %157, %cst_99 {dimension_numbers = #tpu.dot_dimension_numbers<[1], [0], [0], [1], [0, 0, 1, 1], [], []>} : vector<2x160xbf16>, vector<160x128xbf16>, vector<2x128xf32> -> vector<2x128xf32>
    %159 = arith.addf %153, %158 : vector<2x128xf32>
    %cst_100 = arith.constant 0.000000e+00 : f32
    %160 = vector.broadcast %cst_100 : f32 to vector<2x128xf32>
    %161 = arith.maximumf %159, %160 : vector<2x128xf32>
    %162 = arith.truncf %161 : vector<2x128xf32> to vector<2x128xbf16>
    %c0_101 = arith.constant 0 : index
    %c0_102 = arith.constant 0 : index
    %163 = vector.load %arg9[%c0_101, %c0_102] : memref<128x128xbf16, #tpu.memory_space<vmem>>, vector<128x128xbf16>
    %cst_103 = arith.constant dense<0.000000e+00> : vector<2x128xf32>
    %164 = tpu.matmul %162, %163, %cst_103 {dimension_numbers = #tpu.dot_dimension_numbers<[1], [0], [0], [1], [0, 0, 1, 1], [], []>} : vector<2x128xbf16>, vector<128x128xbf16>, vector<2x128xf32> -> vector<2x128xf32>
    %c0_104 = arith.constant 0 : index
    %c0_105 = arith.constant 0 : index
    %165 = vector.load %arg10[%c0_104, %c0_105] : memref<1x128xf32, #tpu.memory_space<vmem>>, vector<1x128xf32>
    %166 = vector.broadcast %165 : vector<1x128xf32> to vector<2x128xf32>
    %167 = arith.addf %164, %166 : vector<2x128xf32>
    %cst_106 = arith.constant 0.000000e+00 : f32
    %168 = vector.broadcast %cst_106 : f32 to vector<2x128xf32>
    %169 = arith.maximumf %167, %168 : vector<2x128xf32>
    %170 = arith.truncf %169 : vector<2x128xf32> to vector<2x128xbf16>
    %c0_107 = arith.constant 0 : index
    %c0_108 = arith.constant 0 : index
    %171 = vector.load %arg11[%c0_107, %c0_108] : memref<128x128xbf16, #tpu.memory_space<vmem>>, vector<128x128xbf16>
    %cst_109 = arith.constant dense<0.000000e+00> : vector<2x128xf32>
    %172 = tpu.matmul %170, %171, %cst_109 {dimension_numbers = #tpu.dot_dimension_numbers<[1], [0], [0], [1], [0, 0, 1, 1], [], []>} : vector<2x128xbf16>, vector<128x128xbf16>, vector<2x128xf32> -> vector<2x128xf32>
    %c0_110 = arith.constant 0 : index
    %c0_111 = arith.constant 0 : index
    %173 = vector.load %arg12[%c0_110, %c0_111] : memref<1x128xf32, #tpu.memory_space<vmem>>, vector<1x128xf32>
    %174 = vector.broadcast %173 : vector<1x128xf32> to vector<2x128xf32>
    %175 = arith.addf %172, %174 : vector<2x128xf32>
    %c0_112 = arith.constant 0 : index
    %c0_113 = arith.constant 0 : index
    %176 = vector.load %arg13[%c0_112, %c0_113] : memref<2x128xf32, #tpu.memory_space<vmem>>, vector<2x128xf32>
    tpu.vector_store %arg13[%c0_112, %c0_113], %175 {strides = array<i32>} : memref<2x128xf32, #tpu.memory_space<vmem>>, vector<2x128xf32>,
    return
  }
  func.func @transform_0(%arg0: i32) -> (i32, i32, i32) {
    %c0_i32 = arith.constant 0 : i32
    %c0_i32_0 = arith.constant 0 : i32
    %c0_i32_1 = arith.constant 0 : i32
    return %arg0, %c0_i32, %c0_i32_0 : i32, i32, i32
  }
  func.func @transform_1(%arg0: i32) -> (i32, i32, i32) {
    %c0_i32 = arith.constant 0 : i32
    %c0_i32_0 = arith.constant 0 : i32
    %c0_i32_1 = arith.constant 0 : i32
    %c0_i32_2 = arith.constant 0 : i32
    return %c0_i32, %c0_i32_0, %c0_i32_1 : i32, i32, i32
  }
  func.func @transform_2(%arg0: i32) -> (i32, i32, i32) {
    %c0_i32 = arith.constant 0 : i32
    %c0_i32_0 = arith.constant 0 : i32
    %c0_i32_1 = arith.constant 0 : i32
    %c0_i32_2 = arith.constant 0 : i32
    return %c0_i32, %c0_i32_0, %c0_i32_1 : i32, i32, i32
  }
  func.func @transform_3(%arg0: i32) -> (i32, i32) {
    %c0_i32 = arith.constant 0 : i32
    %c0_i32_0 = arith.constant 0 : i32
    %c0_i32_1 = arith.constant 0 : i32
    return %c0_i32, %c0_i32_0 : i32, i32
  }
  func.func @transform_4(%arg0: i32) -> (i32, i32, i32) {
    %c0_i32 = arith.constant 0 : i32
    %c0_i32_0 = arith.constant 0 : i32
    %c0_i32_1 = arith.constant 0 : i32
    %c0_i32_2 = arith.constant 0 : i32
    return %c0_i32, %c0_i32_0, %c0_i32_1 : i32, i32, i32
  }
  func.func @transform_5(%arg0: i32) -> (i32, i32) {
    %c0_i32 = arith.constant 0 : i32
    %c0_i32_0 = arith.constant 0 : i32
    %c0_i32_1 = arith.constant 0 : i32
    return %c0_i32, %c0_i32_0 : i32, i32
  }
  func.func @transform_6(%arg0: i32) -> (i32, i32, i32) {
    %c0_i32 = arith.constant 0 : i32
    %c0_i32_0 = arith.constant 0 : i32
    %c0_i32_1 = arith.constant 0 : i32
    %c0_i32_2 = arith.constant 0 : i32
    return %c0_i32, %c0_i32_0, %c0_i32_1 : i32, i32, i32
  }
  func.func @transform_7(%arg0: i32) -> (i32, i32) {
    %c0_i32 = arith.constant 0 : i32
    %c0_i32_0 = arith.constant 0 : i32
    %c0_i32_1 = arith.constant 0 : i32
    return %c0_i32, %c0_i32_0 : i32, i32
  }
  func.func @transform_8(%arg0: i32) -> (i32, i32) {
    %c0_i32 = arith.constant 0 : i32
    %c0_i32_0 = arith.constant 0 : i32
    %c0_i32_1 = arith.constant 0 : i32
    return %c0_i32, %c0_i32_0 : i32, i32
  }
  func.func @transform_9(%arg0: i32) -> (i32, i32) {
    %c0_i32 = arith.constant 0 : i32
    %c0_i32_0 = arith.constant 0 : i32
    %c0_i32_1 = arith.constant 0 : i32
    return %c0_i32, %c0_i32_0 : i32, i32
  }
  func.func @transform_10(%arg0: i32) -> (i32, i32) {
    %c0_i32 = arith.constant 0 : i32
    %c0_i32_0 = arith.constant 0 : i32
    %c0_i32_1 = arith.constant 0 : i32
    return %c0_i32, %c0_i32_0 : i32, i32
  }
  func.func @transform_11(%arg0: i32) -> (i32, i32) {
    %c0_i32 = arith.constant 0 : i32
    %c0_i32_0 = arith.constant 0 : i32
    %c0_i32_1 = arith.constant 0 : i32
    return %c0_i32, %c0_i32_0 : i32, i32
  }
  func.func @transform_12(%arg0: i32) -> (i32, i32) {
    %c0_i32 = arith.constant 0 : i32
    %c0_i32_0 = arith.constant 0 : i32
    return %arg0, %c0_i32 : i32, i32
  }
}

</mosaic_0001>

<bundles_post_ra>
// kernel: forward.1
= control target key start
LH: loop header
LB: loop body
LE: loop exit
PB: predicated region body
PF: predicated region fallthrough
CT: control target
= control target key end

     0   :  { %v320_v6 = vlaneseq  ;;  %vm147_vm0 = vsmask.f32 1280  ;;  %vm148_vm1 = vsmask.f32 3336  ;;  %vm150_vm3 = vsmask.f32 5392  ;;  %s8453_s0 = inlined_call_operand.vmem [shape: bf16[2,32,96], index: 0, kind: input, shape index: {}]   ;;  %s8454_s1 = inlined_call_operand.vmem [shape: bf16[5,96,84], index: 1, kind: input, shape index: {}]   ;;  %s8455_s2 = inlined_call_operand.vmem [shape: bf16[5,96,84], index: 2, kind: input, shape index: {}]   ;;  %s8456_s3 = inlined_call_operand.vmem [shape: f32[1,84], index: 3, kind: input, shape index: {}]   ;;  %s8457_s4 = inlined_call_operand.vmem [shape: bf16[5,84,160], index: 4, kind: input, shape index: {}]   ;;  %s8458_s5 = inlined_call_operand.vmem [shape: f32[1,160], index: 5, kind: input, shape index: {}]   ;;  %s8459_s6 = inlined_call_operand.vmem [shape: bf16[10,160,128], index: 6, kind: input, shape index: {}]   ;;  %s8460_s7 = inlined_call_operand.vmem [shape: f32[1,128], index: 7, kind: input, shape index: {}]   ;;  %s8461_s8 = inlined_call_operand.vmem [shape: bf16[128,128], index: 8, kind: input, shape index: {}]   ;;  %s8462_s9 = inlined_call_operand.vmem [shape: f32[1,128], index: 9, kind: input, shape index: {}]   ;;  %s8463_s10 = inlined_call_operand.vmem [shape: bf16[128,128], index: 10, kind: input, shape index: {}]   ;;  %s8464_s11 = inlined_call_operand.vmem [shape: f32[1,128], index: 11, kind: input, shape index: {}]   ;;  %s8465_s12 = inlined_call_operand.hbm [shape: f32[2,128], index: 12, kind: output, shape index: {}]  }
   0x1   :  { %v6104_v0 = vld [vmem:[%s8454_s1 + $0x58] sm:$0xff]   ;;  %v6106_v2 = vld [vmem:[%s8454_s1 + $0x50] sm:$0xff]   ;;  %v6108_v4 = vld [vmem:[%s8454_s1 + $0x48] sm:$0xff]   ;;  %vm152_vm4 = vsmask.f32 7448  ;;  %vm410_vm7 = vcmask 785408  }
   0x2   :  { %v6105_v1 = vld [vmem:[%s8455_s2 + $0x58] sm:$0xff]   ;;  %5858 = vmatprep.subr.bf16.mxu0 %v6104_v0  ;;  %v6107_v3 = vld [vmem:[%s8455_s2 + $0x50] sm:$0xff]   ;;  %v6109_v5 = vld [vmem:[%s8455_s2 + $0x48] sm:$0xff]   ;;  %v6490_v11 = vshrl.u32 %v320_v6, 7  ;;  %v6389_v47 = vmov 1983009808  }
   0x3   :  { %5878 = vmatprep.subr.bf16.mxu1 %v6105_v1  ;;  %5859 = vmatpush3.bf16.msra.mxu0 %v6104_v0  ;;  %v6110_v7 = vld [vmem:[%s8454_s1 + $0x40] sm:$0xff]   ;;  %v6112_v9 = vld [vmem:[%s8454_s1 + $0x38] sm:$0xff]   ;;  %v6114_v15 = vld [vmem:[%s8454_s1 + $0x30] sm:$0xff]   ;;  %v318_v48 = vunpack.c.l.s4 %v6389_v47  ;;  %vm871_vm8 = vcmask 1040384   ;;  %vm872_vm9 = vcmask 1042434   ;;  %vm874_vm10 = vcmask 1044484  }
   0x4   :  { %5879 = vmatpush3.bf16.msra.mxu1 %v6105_v1  ;;  %5860 = vmatprep.subr.bf16.mxu0 %v6106_v2  ;;  %v6111_v8 = vld [vmem:[%s8455_s2 + $0x40] sm:$0xff]   ;;  %v6113_v10 = vld [vmem:[%s8455_s2 + $0x38] sm:$0xff]   ;;  %v6512_v16 = vld.sshfl [vmem:[%s8453_s0 + $0x8] sm:$0x33 pattern:$0x76325410] }
   0x5   :  { %5880 = vmatprep.subr.bf16.mxu1 %v6107_v3  ;;  %v6495_v12 = vld.sshfl [vmem:[%s8453_s0] sm:$0x33 pattern:$0x76325410]  ;;  %vm6518_vm2 = vmor %vm147_vm0, %vm148_vm1  ;;  %v6524_v19 = vcombine.high %v6512_v16, %v6512_v16  ;;  %v6115_v26 = vld [vmem:[%s8455_s2 + $0x30] sm:$0xff]   ;;  %v194_v39 = vshll.u32 %v6512_v16, 16  ;;  %v319_v57 = vunpack.c.0.s8 %v318_v48 }
   0x6   :  { %v6500_v13 = vld.sshfl [vmem:[%s8453_s0 + $0x4] sm:$0x33 pattern:$0x76325410]  ;;  %v6504_v14 = vcombine.high %v6495_v12, %v6495_v12  ;;  %v155_v20 = vshrl.u32 %v6495_v12, 16  ;;  %v158_v21 = vshll.u32 %v6495_v12, 16  ;;  %vm6537_vm5 = vmor %vm6518_vm2, %vm150_vm3 }
   0x7   :  { %5861 = vmatpush3.bf16.msra.mxu0 %v6106_v2  ;;  %v6516_v17 = vcombine.high %v6500_v13, %v6500_v13  ;;  %v174_v24 = vshll.u32 %v6500_v13, 16  ;;  %v178_v25 = vshrl.u32 %v6500_v13, 16  ;;  %vm6549_vm6 = vmor %vm6537_vm5, %vm152_vm4  ;;  %v198_v43 = vshrl.u32 %v6512_v16, 16  ;;  %v6559_v49 = vld [vmem:[%s8454_s1 + $0x28] sm:$0xff]  }
   0x8   :  { %5881 = vmatpush3.bf16.msra.mxu1 %v6107_v3  ;;  %5862 = vmatprep.subr.bf16.mxu0 %v6108_v4  ;;  %v164_v22 = vshll.u32 %v6504_v14, 16  ;;  %v168_v23 = vshrl.u32 %v6504_v14, 16  ;;  %v157_v28 = vrot.slane %v155_v20, 6  ;;  %v160_v29 = vrot.slane %v158_v21, 7  ;;  %v6564_v50 = vld [vmem:[%s8455_s2 + $0x28] sm:$0xff]   ;;  %vm6744_vm11 = vmor %vm871_vm8, %vm872_vm9 }
   0x9   :  { %5882 = vmatprep.subr.bf16.mxu1 %v6109_v5  ;;  %v184_v30 = vshll.u32 %v6516_v17, 16  ;;  %v188_v31 = vshrl.u32 %v6516_v17, 16  ;;  %v176_v34 = vrot.slane %v174_v24, 7  ;;  %v180_v35 = vrot.slane %v178_v25, 6  ;;  %vm6766_vm12 = vmor %vm6744_vm11, %vm874_vm10  ;;  %v6144_v40 = vld [vmem:[%s8454_s1 + $0xa8] sm:$0xff]  }
   0xa   :  { %v166_v32 = vrot.slane %v164_v22, 7  ;;  %v170_v33 = vrot.slane %v168_v23, 6  ;;  %v161_v36 = vor.u32 %v160_v29, %v157_v28  ;;  %v196_v46 = vrot.slane %v194_v39, 7 }
   0xb   :  { %5863 = vmatpush3.bf16.msra.mxu0 %v6108_v4  ;;  %v186_v37 = vrot.slane %v184_v30, 7  ;;  %v190_v38 = vrot.slane %v188_v31, 6  ;;  %v181_v42 = vor.u32 %v180_v35, %v176_v34  ;;  %v200_v53 = vrot.slane %v198_v43, 6 }
   0xc   :  { %5883 = vmatpush3.bf16.msra.mxu1 %v6109_v5  ;;  %5864 = vmatprep.subr.bf16.mxu0 %v6110_v7  ;;  %v171_v41 = vor.u32 %v170_v33, %v166_v32  ;;  %v162_v44 = vrot.slane %v161_v36, 2  ;;  %v6568_v54 = vrot.slane %v168_v23, 7  ;;  %v6572_v58 = vrot.slane %v178_v25, 7 }
   0xd   :  { %5884 = vmatprep.subr.bf16.mxu1 %v6111_v8  ;;  %v191_v45 = vor.u32 %v190_v38, %v186_v37  ;;  %v182_v52 = vrot.slane %v181_v42, 2  ;;  %v201_v61 = vor.u32 %v200_v53, %v196_v46  ;;  %v6584_v63 = vld.sshfl [vmem:[%s8453_s0 + $0xc] sm:$0x33 pattern:$0x76325410]  ;;  %v6589_v2 = vsub.s32 %v319_v57, %v6490_v11 }
   0xe   :  { %v172_v51 = vrot.slane %v171_v41, 2  ;;  %v167_v55 = vsel %vm6549_vm6, %v162_v44, %v166_v32  ;;  %v6579_v62 = vor.u32 %v6568_v54, %v164_v22  ;;  %v6592_v3 = vor.u32 %v6572_v58, %v174_v24  ;;  %v6635_v44 = vld.sshfl [vmem:[%s8453_s0 + $0x14] sm:$0x33 pattern:$0x76325410] }
   0xf   :  { %5865 = vmatpush3.bf16.msra.mxu0 %v6110_v7  ;;  %v192_v56 = vrot.slane %v191_v45, 2  ;;  %v187_v60 = vsel %vm6549_vm6, %v182_v52, %v186_v37  ;;  %v6595_v5 = vrot.slane %v188_v31, 7  ;;  %v6602_v7 = vld.sshfl [vmem:[%s8453_s0 + $0x10] sm:$0x33 pattern:$0x76325410] }
  0x10   :  { %5885 = vmatpush3.bf16.msra.mxu1 %v6111_v8  ;;  %5866 = vmatprep.subr.bf16.mxu0 %v6112_v9  ;;  %v177_v59 = vsel %vm6549_vm6, %v172_v51, %v176_v34  ;;  %v6606_v8 = vcombine.high %v6584_v63, %v6584_v63  ;;  %v6615_v21 = vcombine.high %v6602_v7, %v6602_v7  ;;  %v208_v23 = vshrl.u32 %v6524_v19, 16  ;;  %v6645_v51 = vld.sshfl [vmem:[%s8453_s0 + $0x18] sm:$0x33 pattern:$0x76325410] }
  0x11   :  { %5886 = vmatprep.subr.bf16.mxu1 %v6113_v10  ;;  %v197_v0 = vsel %vm6549_vm6, %v192_v56, %v196_v46  ;;  %v315_v1 = vcombine.low %v167_v55, %v177_v59  ;;  %v6611_v18 = vor.u32 %v6595_v5, %v184_v30  ;;  %v214_v24 = vshll.u32 %v6584_v63, 16 }
  0x12   :  { %v316_v4 = vcombine.low %v187_v60, %v197_v0  ;;  %v218_v25 = vshrl.u32 %v6584_v63, 16  ;;  %v224_v27 = vshll.u32 %v6606_v8, 16  ;;  %v229_v28 = vshrl.u32 %v6602_v7, 16 }
  0x13   :  { %5867 = vmatpush3.bf16.msra.mxu0 %v6112_v9  ;;  %v323_v6 = vrot.slane %v315_v1, %v6589_v2  ;;  %v204_v9 = vshll.u32 %v6524_v19, 16  ;;  %v232_v29 = vshll.u32 %v6602_v7, 16  ;;  %v210_v30 = vrot.slane %v208_v23, 6 }
  0x14   :  { %5887 = vmatpush3.bf16.msra.mxu1 %v6113_v10  ;;  %5868 = vmatprep.subr.bf16.mxu0 %v6114_v15  ;;  %v202_v10 = vrot.slane %v201_v61, 2  ;;  %v216_v31 = vrot.slane %v214_v24, 7  ;;  %v220_v32 = vrot.slane %v218_v25, 6  ;;  %v231_v34 = vrot.slane %v229_v28, 6 }
  0x15   :  { %5888 = vmatprep.subr.bf16.mxu1 %v6115_v26  ;;  %v206_v22 = vrot.slane %v204_v9, 7  ;;  %v234_v35 = vrot.slane %v232_v29, 7  ;;  %v238_v36 = vshll.u32 %v6615_v21, 16  ;;  %v226_v41 = vrot.slane %v224_v27, 7 }
  0x16   :  { %v221_v38 = vor.u32 %v220_v32, %v216_v31  ;;  %v6630_v42 = vrot.slane %v208_v23, 7  ;;  %v6639_v47 = vrot.slane %v218_v25, 7  ;;  %v1266_v48 = vshrl.u32 %v6606_v8, 16 }
  0x17   :  { %5869 = vmatpush3.bf16.msra.mxu0 %v6114_v15  ;;  %v330_v15 = vrot.slane %v316_v4, %v6589_v2  ;;  %v207_v33 = vsel %vm6549_vm6, %v202_v10, %v206_v22  ;;  %v211_v37 = vor.u32 %v210_v30, %v206_v22  ;;  %v235_v45 = vor.u32 %v234_v35, %v231_v34  ;;  %v6118_v30 = vld [vmem:[%s8454_s1 + $0x20] sm:$0xff]  }
  0x18   :  { %5889 = vmatpush3.bf16.msra.mxu1 %v6115_v26  ;;  %5898 = vmatprep.subr.bf16.mxu0 %v6559_v49  ;;  %v240_v46 = vrot.slane %v238_v36, 7  ;;  %v222_v53 = vrot.slane %v221_v38, 2  ;;  %v242_v55 = vshrl.u32 %v6615_v21, 16  ;;  %v6649_v56 = vor.u32 %v6630_v42, %v204_v9 }
  0x19   :  { %5918 = vmatprep.subr.bf16.mxu1 %v6564_v50  ;;  %v331_v26 = vcombine.low %v323_v6, %v330_v15  ;;  %v212_v52 = vrot.slane %v211_v37, 2  ;;  %v236_v57 = vrot.slane %v235_v45, 2  ;;  %v6652_v59 = vor.u32 %v6639_v47, %v214_v24  ;;  %v6119_v45 = vld [vmem:[%s8455_s2 + $0x20] sm:$0xff]  }
  0x1a   :  { %v1268_v60 = vrot.slane %v1266_v48, 7  ;;  %v227_v0 = vsel %vm6549_vm6, %v222_v53, %v226_v41  ;;  %v6664_v9 = vcombine.high %v6635_v44, %v6635_v44  ;;  %v6668_v15 = vcombine.high %v6645_v51, %v6645_v51 }
  0x1b   :  { %5870 = vmatprep.mubr.msk.bf16.mxu0 %vm410_vm7, %v331_v26  ;;  %5890 = vmatprep.mubr.msk.bf16.mxu1 %vm410_vm7, %v331_v26  ;;  %v217_v61 = vsel %vm6549_vm6, %v212_v52, %v216_v31  ;;  %v241_v1 = vsel %vm6549_vm6, %v236_v57, %v240_v46  ;;  %v244_v22 = vrot.slane %v242_v55, 6  ;;  %v8473_v24 = vshll.u32 %v6635_v44, 16 }
  0x1c   :  { %v332_v4 = vcombine.low %v207_v33, %v217_v61  ;;  %v6660_v6 = vor.u32 %v1268_v60, %v224_v27  ;;  %v333_v10 = vcombine.low %v227_v0, %v241_v1  ;;  %v252_v25 = vshrl.u32 %v6635_v44, 16  ;;  %v6679_v27 = vld.sshfl [vmem:[%s8453_s0 + $0x1c] sm:$0x33 pattern:$0x76325410] }
  0x1d   :  { %v8472_v26 = vshll.u32 %v6664_v9, 16  ;;  %v245_v31 = vor.u32 %v244_v22, %v240_v46  ;;  %v8475_v32 = vshrl.u32 %v6664_v9, 16  ;;  %v8467_v33 = vshll.u32 %v6645_v51, 16  ;;  %v6120_v0 = vld [vmem:[%s8454_s1 + $0x18] sm:$0xff]  }
  0x1e   :  { %v340_v23 = vrot.slane %v332_v4, %v6589_v2  ;;  %v347_v29 = vrot.slane %v333_v10, %v6589_v2  ;;  %v250_v34 = vrot.slane %v8473_v24, 7  ;;  %v254_v35 = vrot.slane %v252_v25, 6 }
  0x1f   :  { %v260_v37 = vrot.slane %v8472_v26, 7  ;;  %v8474_v38 = vshrl.u32 %v6645_v51, 16  ;;  %v246_v46 = vrot.slane %v245_v31, 2  ;;  %v264_v48 = vrot.slane %v8475_v32, 6 }
  0x20   :  { %v348_v41 = vcombine.low %v340_v23, %v347_v29  ;;  %v270_v52 = vrot.slane %v8467_v33, 7  ;;  %v255_v53 = vor.u32 %v254_v35, %v250_v34  ;;  %v8466_v60 = vshll.u32 %v6668_v15, 16  ;;  %v6121_v23 = vld [vmem:[%s8455_s2 + $0x18] sm:$0xff]  }
  0x21   :  { %v274_v57 = vrot.slane %v8474_v38, 6  ;;  %v6706_v61 = vcombine.high %v6679_v27, %v6679_v27  ;;  %v251_v1 = vsel %vm6549_vm6, %v246_v46, %v250_v34  ;;  %v265_v4 = vor.u32 %v264_v48, %v260_v37 }
  0x22   :  { %5871 = vmatmul.mubr.msk.bf16.vlgmr.msra.gmra.mxu0 %vm410_vm7, %v348_v41  ;;  %5891 = vmatmul.mubr.msk.bf16.vlgmr.msra.gmra.mxu1 %vm410_vm7, %v348_v41  ;;  %v8469_v10 = vshrl.u32 %v6668_v15, 16  ;;  %v8468_v22 = vshll.u32 %v6679_v27, 16  ;;  %v256_v29 = vrot.slane %v255_v53, 2  ;;  %v280_v35 = vrot.slane %v8466_v60, 7 }
  0x23   :  { %5899 = vmatpush3.bf16.msra.mxu0 %v6559_v49  ;;  %5919 = vmatpush3.bf16.msra.mxu1 %v6564_v50  ;;  %v275_v31 = vor.u32 %v274_v57, %v270_v52  ;;  %v8471_v34 = vshrl.u32 %v6679_v27, 16  ;;  %v266_v41 = vrot.slane %v265_v4, 2  ;;  %v8470_v50 = vshll.u32 %v6706_v61, 16 }
  0x24   :  { %5900 = vmatprep.subr.bf16.mxu0 %v6118_v30  ;;  %5920 = vmatprep.subr.bf16.mxu1 %v6119_v45  ;;  %v284_v46 = vrot.slane %v8469_v10, 6  ;;  %v290_v49 = vrot.slane %v8468_v22, 7  ;;  %v261_v48 = vsel %vm6549_vm6, %v256_v29, %v260_v37  ;;  %v600_v60 = vcombine.low %v6495_v12, %v6504_v14 }
  0x25   :  { %v276_v53 = vrot.slane %v275_v31, 2  ;;  %v294_v57 = vrot.slane %v8471_v34, 6  ;;  %v6738_v4 = vrot.slane %v198_v43, 7  ;;  %v271_v33 = vsel %vm6549_vm6, %v266_v41, %v270_v52  ;;  %v6122_v52 = vld [vmem:[%s8454_s1 + $0x10] sm:$0xff]  }
  0x26   :  { %v349_v22 = vcombine.low %v251_v1, %v261_v48  ;;  %v285_v10 = vor.u32 %v284_v46, %v280_v35  ;;  %v300_v43 = vrot.slane %v8470_v50, 7  ;;  %v601_v1 = vcombine.low %v6500_v13, %v6516_v17 }
  0x27   :  { %5901 = vmatpush3.bf16.msra.mxu0 %v6118_v30  ;;  %5921 = vmatpush3.bf16.msra.mxu1 %v6119_v45  ;;  %v281_v29 = vsel %vm6549_vm6, %v276_v53, %v280_v35  ;;  %v295_v31 = vor.u32 %v294_v57, %v290_v49  ;;  %v6123_v35 = vld [vmem:[%s8455_s2 + $0x10] sm:$0xff]   ;;  %v608_v48 = vrot.slane %v600_v60, %v6589_v2  ;;  %vm876_vm13 = vcmask 1046534  }
  0x28   :  { %5902 = vmatprep.subr.bf16.mxu0 %v6120_v0  ;;  %5922 = vmatprep.subr.bf16.mxu1 %v6121_v23  ;;  %v350_v41 = vcombine.low %v271_v33, %v281_v29  ;;  %v357_v30 = vrot.slane %v349_v22, %v6589_v2  ;;  %v286_v45 = vrot.slane %v285_v10, 2  ;;  %v615_v53 = vrot.slane %v601_v1, %v6589_v2  ;;  %v6124_v29 = vld [vmem:[%s8454_s1 + $0x8] sm:$0xff]   ;;  %vm6789_vm14 = vmor %vm6766_vm12, %vm876_vm13 }
  0x29   :  { %v296_v46 = vrot.slane %v295_v31, 2  ;;  %v617_v60 = vcombine.low %v6512_v16, %v6524_v19  ;;  %v618_v31 = vcombine.low %v6584_v63, %v6602_v7  ;;  %v5143_v1 = vrot.slane %v6495_v12, 9  ;;  %v6134_v12 = vld [vmem:[%s8454_s1 + $0x70] sm:$0xff]  }
  0x2a   :  { %v364_v10 = vrot.slane %v350_v41, %v6589_v2  ;;  %v291_v22 = vsel %vm6549_vm6, %v286_v45, %v290_v49  ;;  %v880_v41 = vrot.slane %v6504_v14, 7  ;;  %v886_v26 = vrot.slane %v6516_v17, 7 }
  0x2b   :  { %5903 = vmatpush3.bf16.msra.mxu0 %v6120_v0  ;;  %5923 = vmatpush3.bf16.msra.mxu1 %v6121_v23  ;;  %v301_v37 = vsel %vm6549_vm6, %v296_v46, %v300_v43  ;;  %v883_v0 = vrot.slane %v6500_v13, 7  ;;  %v6125_v43 = vld [vmem:[%s8455_s2 + $0x8] sm:$0xff]   ;;  %v616_v46 = vcombine.low %v608_v48, %v615_v53  ;;  %v625_v13 = vrot.slane %v617_v60, %v6589_v2  ;;  %v6126_v48 = vld [vmem:[%s8454_s1] sm:$0xff]  }
  0x2c   :  { %v365_v45 = vcombine.low %v357_v30, %v364_v10  ;;  %v366_v50 = vcombine.low %v291_v22, %v301_v37  ;;  %5904 = vmatprep.subr.bf16.mxu0 %v6122_v52  ;;  %5924 = vmatprep.subr.bf16.mxu1 %v6123_v35  ;;  %v634_v30 = vcombine.low %v6615_v21, %v6635_v44  ;;  %v882_v22 = vrot.slane %v880_v41, 2 }
  0x2d   :  { %v635_v10 = vcombine.low %v6664_v9, %v6645_v51  ;;  %v885_v37 = vrot.slane %v883_v0, 2  ;;  %v632_v53 = vrot.slane %v618_v31, %v6589_v2  ;;  %v881_v34 = vsel %vm6789_vm14, %v5143_v1, %v880_v41 }
  0x2e   :  { %5874 = vmatprep.mubr.msk.bf16.mxu0 %vm410_vm7, %v365_v45  ;;  %5894 = vmatprep.mubr.msk.bf16.mxu1 %vm410_vm7, %v365_v45  ;;  %v373_v57 = vrot.slane %v366_v50, %v6589_v2  ;;  %v889_v45 = vrot.slane %v6512_v16, 7  ;;  %v6127_v50 = vld [vmem:[%s8455_s2] sm:$0xff]   ;;  %v895_v60 = vrot.slane %v6584_v63, 7  ;;  %v898_v31 = vrot.slane %v6606_v8, 7  ;;  %v6128_v8 = vld [vmem:[%s8454_s1 + $0x88] sm:$0xff]  }
  0x2f   :  { %5905 = vmatpush3.bf16.msra.mxu0 %v6122_v52  ;;  %5925 = vmatpush3.bf16.msra.mxu1 %v6123_v35  ;;  %v884_v52 = vsel %vm6789_vm14, %v882_v22, %v883_v0  ;;  %v892_v35 = vrot.slane %v6524_v19, 7  ;;  %v642_v1 = vrot.slane %v634_v30, %v6589_v2  ;;  %v887_v41 = vsel %vm6789_vm14, %v885_v37, %v886_v26 }
  0x30   :  { %5875 = vmatmul.mubr.msk.bf16.gmra.mxu0 %vm410_vm7, %v373_v57  ;;  %5895 = vmatmul.mubr.msk.bf16.gmra.mxu1 %vm410_vm7, %v373_v57  ;;  %v888_v57 = vrot.slane %v886_v26, 2  ;;  %v891_v24 = vrot.slane %v889_v45, 2  ;;  %v897_v22 = vrot.slane %v895_v60, 2  ;;  %v5144_v23 = vrot.slane %v6602_v7, 9 }
  0x31   :  { %5906 = vmatprep.subr.bf16.mxu0 %v6124_v29  ;;  %5926 = vmatprep.subr.bf16.mxu1 %v6125_v43  ;;  %v894_v0 = vrot.slane %v892_v35, 2  ;;  %v902_v49 = vrot.slane %v6615_v21, 7  ;;  %v935_v30 = vcombine.low %v881_v34, %v884_v52  ;;  %v6841_v33 = vrot.slane %v242_v55, 7  ;;  %v6132_v21 = vld [vmem:[%s8454_s1 + $0x78] sm:$0xff]  }
  0x32   :  { %5910 = vmatprep.mubr.msk.bf16.mxu0 %vm410_vm7, %v616_v46  ;;  %5930 = vmatprep.mubr.msk.bf16.mxu1 %vm410_vm7, %v616_v46  ;;  %v890_v26 = vsel %vm6789_vm14, %v888_v57, %v889_v45  ;;  %v893_v37 = vsel %vm6789_vm14, %v891_v24, %v892_v35  ;;  %v905_v46 = vrot.slane %v6635_v44, 7  ;;  %v899_v34 = vsel %vm6789_vm14, %v897_v22, %v898_v31 }
  0x33   :  { %5907 = vmatpush3.bf16.msra.mxu0 %v6124_v29  ;;  %5927 = vmatpush3.bf16.msra.mxu1 %v6125_v43  ;;  %v6129_v29 = vld [vmem:[%s8455_s2 + $0x88] sm:$0xff]   ;;  %v936_v43 = vcombine.low %v887_v41, %v890_v26  ;;  %v896_v45 = vsel %vm6789_vm14, %v894_v0, %v895_v60  ;;  %v649_v24 = vrot.slane %v635_v10, %v6589_v2  ;;  %v908_v35 = vrot.slane %v6664_v9, 7  ;;  %v6130_v60 = vld [vmem:[%s8454_s1 + $0x80] sm:$0xff]   ;;  %v6133_v26 = vld [vmem:[%s8455_s2 + $0x78] sm:$0xff]  }
  0x34   :  { %5908 = vmatprep.subr.bf16.mxu0 %v6126_v48  ;;  %5928 = vmatprep.subr.bf16.mxu1 %v6127_v50  ;;  %v651_v52 = vcombine.low %v6668_v15, %v6679_v27  ;;  %v903_v55 = vsel %vm6789_vm14, %v5144_v23, %v902_v49  ;;  %v633_v57 = vcombine.low %v625_v13, %v632_v53  ;;  %v904_v32 = vrot.slane %v902_v49, 2 }
  0x35   :  { %v952_v38 = vcombine.low %v893_v37, %v896_v45  ;;  %v907_v41 = vrot.slane %v905_v46, 2  ;;  %v943_v10 = vrot.slane %v935_v30, %v6589_v2  ;;  %v950_v31 = vrot.slane %v936_v43, %v6589_v2 }
  0x36   :  { %v953_v0 = vcombine.low %v899_v34, %v903_v55  ;;  %v911_v22 = vrot.slane %v6645_v51, 7  ;;  %v1255_v23 = vor.u32 %v6738_v4, %v194_v39  ;;  %v6867_v49 = vrot.slane %v229_v28, 9 }
  0x37   :  { %5909 = vmatpush3.bf16.msra.mxu0 %v6126_v48  ;;  %5929 = vmatpush3.bf16.msra.mxu1 %v6127_v50  ;;  %v6872_v13 = vor.u32 %v6841_v33, %v238_v36  ;;  %v6131_v48 = vld [vmem:[%s8455_s2 + $0x80] sm:$0xff]   ;;  %v650_v53 = vcombine.low %v642_v1, %v649_v24  ;;  %v658_v16 = vrot.slane %v651_v52, %v6589_v2  ;;  %v910_v50 = vrot.slane %v908_v35, 2 }
  0x38   :  { %5938 = vmatprep.subr.bf16.mxu0 %v6128_v8  ;;  %5958 = vmatprep.subr.bf16.mxu1 %v6129_v29  ;;  %v914_v39 = vrot.slane %v6668_v15, 7  ;;  %v6885_v28 = vrot.slane %v952_v38, %v6589_v2  ;;  %v6889_v36 = vsel %vm6789_vm14, %v904_v32, %v905_v46  ;;  %v6893_v1 = vsel %vm6789_vm14, %v907_v41, %v908_v35 }
  0x39   :  { %vm1233_vm15 = vsmask.f32 256  ;;  %v951_v30 = vcombine.low %v943_v10, %v950_v31  ;;  %v6899_v37 = vrot.slane %v953_v0, %v6589_v2  ;;  %v6901_v38 = vrot.slane %v911_v22, 2 }
  0x3a   :  { %5911 = vmatmul.mubr.msk.bf16.vlgmr.msra.gmra.mxu0 %vm410_vm7, %v633_v57  ;;  %5931 = vmatmul.mubr.msk.bf16.vlgmr.msra.gmra.mxu1 %vm410_vm7, %v633_v57  ;;  %vm1234_vm0 = vsmask.f32 2312  ;;  %vm1236_vm2 = vsmask.f32 4368  ;;  %vm1238_vm3 = vsmask.f32 6424  ;;  %v6910_v46 = vsel %vm6789_vm14, %v910_v50, %v911_v22 }
  0x3b   :  { %5939 = vmatpush3.bf16.msra.mxu0 %v6128_v8  ;;  %5959 = vmatpush3.bf16.msra.mxu1 %v6129_v29  ;;  %vm1235_vm1 = vmor %vm1233_vm15, %vm1234_vm0  ;;  %v5189_v32 = vrot.slane %v155_v20, 9  ;;  %v1245_v8 = vrot.slane %v6568_v54, 2  ;;  %v969_v29 = vcombine.low %v6889_v36, %v6893_v1  ;;  %v1249_v43 = vrot.slane %v6572_v58, 2  ;;  %v6135_v20 = vld [vmem:[%s8455_s2 + $0x70] sm:$0xff]  }
  0x3c   :  { %5940 = vmatprep.subr.bf16.mxu0 %v6130_v60  ;;  %5960 = vmatprep.subr.bf16.mxu1 %v6131_v48  ;;  %vm1237_vm4 = vmor %vm1235_vm1, %vm1236_vm2  ;;  %v1253_v45 = vrot.slane %v6595_v5, 2  ;;  %v6924_v54 = vrot.slane %v914_v39, 2  ;;  %v917_v34 = vrot.slane %v6679_v27, 7  ;;  %v1277_v58 = vrot.slane %v252_v25, 7 }
  0x3d   :  { %5914 = vmatprep.mubr.msk.bf16.mxu0 %vm410_vm7, %v650_v53  ;;  %5934 = vmatprep.mubr.msk.bf16.mxu1 %vm410_vm7, %v650_v53  ;;  %vm6927_vm5 = vmor %vm1237_vm4, %vm1238_vm3  ;;  %v8490_v5 = vshrl.u32 %v6664_v9, 16  ;;  %v920_v55 = vrot.slane %v6706_v61, 7  ;;  %v8491_v41 = vshrl.u32 %v6645_v51, 16  ;;  %v1276_v31 = vrot.slane %v6841_v33, 2 }
  0x3e   :  { %v1244_v35 = vsel %vm6927_vm5, %v5189_v32, %v6579_v62  ;;  %v1248_v57 = vsel %vm6927_vm5, %v1245_v8, %v6592_v3  ;;  %v1252_v25 = vsel %vm6927_vm5, %v1249_v43, %v6611_v18  ;;  %v1280_v0 = vrot.slane %v1277_v58, 2 }
  0x3f   :  { %v1281_v52 = vrot.slane %v8490_v5, 7  ;;  %5941 = vmatpush3.bf16.msra.mxu0 %v6130_v60  ;;  %5961 = vmatpush3.bf16.msra.mxu1 %v6131_v48  ;;  %v1285_v10 = vrot.slane %v8491_v41, 7  ;;  %v1256_v60 = vsel %vm6927_vm5, %v1253_v45, %v1255_v23  ;;  %v1315_v62 = vcombine.low %v1244_v35, %v1248_v57 }
  0x40   :  { %5942 = vmatprep.subr.bf16.mxu0 %v6132_v21  ;;  %5962 = vmatprep.subr.bf16.mxu1 %v6133_v26  ;;  %v1316_v22 = vcombine.low %v1252_v25, %v1256_v60  ;;  %v8492_v3 = vrot.slane %v6738_v4, 2  ;;  %v8493_v53 = vrot.slane %v6630_v42, 2  ;;  %v8494_v33 = vrot.slane %v6639_v47, 2 }
  0x41   :  { %v1284_v42 = vrot.slane %v1281_v52, 2  ;;  %v1288_v32 = vrot.slane %v1285_v10, 2  ;;  %v8497_v43 = vshrl.u32 %v6668_v15, 16  ;;  %v8498_v57 = vshll.u32 %v6645_v51, 16 }
  0x42   :  { %v1260_v48 = vsel %vm6927_vm5, %v8492_v3, %v6649_v56  ;;  %v1264_v18 = vsel %vm6927_vm5, %v8493_v53, %v6652_v59  ;;  %5915 = vmatmul.mubr.msk.bf16.gmra.mxu0 %vm410_vm7, %v658_v16  ;;  %5935 = vmatmul.mubr.msk.bf16.gmra.mxu1 %vm410_vm7, %v658_v16  ;;  %v1270_v23 = vsel %vm6927_vm5, %v8494_v33, %v6660_v6  ;;  %v6136_v59 = vld [vmem:[%s8454_s1 + $0x68] sm:$0xff]   ;;  %v8499_v25 = vshrl.u32 %v6679_v27, 16  ;;  %v6139_v3 = vld [vmem:[%s8455_s2 + $0x60] sm:$0xff]  }
  0x43   :  { %v1275_v56 = vsel %vm6927_vm5, %v6867_v49, %v6872_v13  ;;  %v1332_v4 = vcombine.low %v1260_v48, %v1264_v18  ;;  %5943 = vmatpush3.bf16.msra.mxu0 %v6132_v21  ;;  %5963 = vmatpush3.bf16.msra.mxu1 %v6133_v26  ;;  %v1323_v16 = vrot.slane %v1315_v62, %v6589_v2  ;;  %v6137_v6 = vld [vmem:[%s8455_s2 + $0x68] sm:$0xff]   ;;  %v8495_v13 = vshll.u32 %v6635_v44, 16 }
  0x44   :  { %v1330_v47 = vrot.slane %v1316_v22, %v6589_v2  ;;  %v1333_v50 = vcombine.low %v1270_v23, %v1275_v56  ;;  %5944 = vmatprep.subr.bf16.mxu0 %v6134_v12  ;;  %5964 = vmatprep.subr.bf16.mxu1 %v6135_v20  ;;  %v8496_v26 = vshll.u32 %v6664_v9, 16  ;;  %v1289_v45 = vrot.slane %v8497_v43, 7 }
  0x45   :  { %v1340_v49 = vrot.slane %v1332_v4, %v6589_v2  ;;  %v1278_v21 = vor.u32 %v1277_v58, %v8495_v13  ;;  %5950 = vmatprep.mubr.msk.bf16.mxu0 %vm410_vm7, %v951_v30  ;;  %5970 = vmatprep.mubr.msk.bf16.mxu1 %vm410_vm7, %v951_v30  ;;  %v1286_v41 = vor.u32 %v1285_v10, %v8498_v57  ;;  %v1293_v58 = vrot.slane %v8499_v25, 7  ;;  %v6146_v57 = vld [vmem:[%s8454_s1 + $0xa0] sm:$0xff]   ;;  %v6148_v25 = vld [vmem:[%s8454_s1 + $0x98] sm:$0xff]  }
  0x46   :  { %v1282_v8 = vor.u32 %v1281_v52, %v8496_v26  ;;  %v6988_v5 = vcombine.low %v1323_v16, %v1330_v47  ;;  %v1347_v35 = vrot.slane %v1333_v50, %v6589_v2  ;;  %v6138_v52 = vld [vmem:[%s8454_s1 + $0x60] sm:$0xff]   ;;  %v915_v30 = vsel %vm6789_vm14, %v6901_v38, %v914_v39  ;;  %v6143_v26 = vld [vmem:[%s8455_s2 + $0xb0] sm:$0xff]  }
  0x47   :  { %v1279_v60 = vsel %vm6927_vm5, %v1276_v31, %v1278_v21  ;;  %v8500_v10 = vshll.u32 %v6668_v15, 16  ;;  %5945 = vmatpush3.bf16.msra.mxu0 %v6134_v12  ;;  %5965 = vmatpush3.bf16.msra.mxu1 %v6135_v20  ;;  %v1287_v39 = vsel %vm6927_vm5, %v1284_v42, %v1286_v41  ;;  %v1292_v53 = vrot.slane %v1289_v45, 2  ;;  %v6142_v21 = vld [vmem:[%s8454_s1 + $0xb0] sm:$0xff]   ;;  %v6147_v41 = vld [vmem:[%s8455_s2 + $0xa0] sm:$0xff]  }
  0x48   :  { %v1283_v62 = vsel %vm6927_vm5, %v1280_v0, %v1282_v8  ;;  %v7012_v48 = vcombine.low %v1340_v49, %v1347_v35  ;;  %5946 = vmatprep.subr.bf16.mxu0 %v6136_v59  ;;  %5966 = vmatprep.subr.bf16.mxu1 %v6137_v6  ;;  %v968_v31 = vcombine.low %v6885_v28, %v6899_v37  ;;  %v8501_v20 = vshll.u32 %v6679_v27, 16  ;;  %v6140_v28 = vld [vmem:[%s8454_s1 + $0xb8] sm:$0xff]  }
  0x49   :  { %v1290_v22 = vor.u32 %v1289_v45, %v8500_v10  ;;  %v1349_v38 = vcombine.low %v1279_v60, %v1283_v62  ;;  %v1297_v18 = vshrl.u32 %v6706_v61, 16  ;;  %v970_v33 = vcombine.low %v6910_v46, %v915_v30  ;;  %v6141_v37 = vld [vmem:[%s8455_s2 + $0xb8] sm:$0xff]   ;;  %v6151_v30 = vld [vmem:[%s8455_s2 + $0x90] sm:$0xff]   ;;  %v6152_v60 = vld [vmem:[%s8454_s1 + $0xe8] sm:$0xff]  }
  0x4a   :  { %v1294_v0 = vor.u32 %v1293_v58, %v8501_v20  ;;  %v1643_v4 = vcombine.low %v6524_v19, %v6584_v63  ;;  %v977_v42 = vrot.slane %v969_v29, %v6589_v2  ;;  %v1296_v46 = vrot.slane %v1293_v58, 2  ;;  %v6149_v58 = vld [vmem:[%s8455_s2 + $0x98] sm:$0xff]   ;;  %v6154_v62 = vld [vmem:[%s8454_s1 + $0xe0] sm:$0xff]   ;;  %v6159_v20 = vld [vmem:[%s8455_s2 + $0xd0] sm:$0xff]  }
  0x4b   :  { %v1291_v12 = vsel %vm6927_vm5, %v1288_v32, %v1290_v22  ;;  %v1357_v56 = vrot.slane %v1349_v38, %v6589_v2  ;;  %v1299_v16 = vrot.slane %v1297_v18, 7  ;;  %v5247_v47 = vcombine.high %v6584_v63, %v6602_v7  ;;  %5947 = vmatpush3.bf16.msra.mxu0 %v6136_v59  ;;  %5967 = vmatpush3.bf16.msra.mxu1 %v6137_v6  ;;  %v6155_v10 = vld [vmem:[%s8455_s2 + $0xe0] sm:$0xff]   ;;  %v6160_v18 = vld [vmem:[%s8454_s1 + $0xc8] sm:$0xff]  }
  0x4c   :  { %v1350_v23 = vcombine.low %v1287_v39, %v1291_v12  ;;  %v919_v19 = vrot.slane %v917_v34, 2  ;;  %v7044_v32 = vsel %vm6927_vm5, %v1292_v53, %v1294_v0  ;;  %v1651_v49 = vrot.slane %v1643_v4, %v6589_v2  ;;  %5948 = vmatprep.subr.bf16.mxu0 %v6138_v52  ;;  %5968 = vmatprep.subr.bf16.mxu1 %v6139_v3  ;;  %v6365_v22 = vld.sshfl [vmem:[%s8453_s0 + $0x4] sm:$0x33 pattern:$0x76325410]  ;;  %v6156_v53 = vld [vmem:[%s8454_s1 + $0xd8] sm:$0xff]  }
  0x4d   :  { %v8502_v36 = vshll.u32 %v6706_v61, 16  ;;  %v1658_v63 = vrot.slane %v5247_v47, %v6589_v2  ;;  %v1660_v7 = vcombine.low %v6635_v44, %v6664_v9  ;;  %v984_v29 = vrot.slane %v970_v33, %v6589_v2  ;;  %v6366_v39 = vld.sshfl [vmem:[%s8453_s0 + $0x8] sm:$0x33 pattern:$0x76325410]  ;;  %v6158_v12 = vld [vmem:[%s8454_s1 + $0xd0] sm:$0xff]  }
  0x4e   :  { %v1364_v50 = vrot.slane %v1350_v23, %v6589_v2  ;;  %v1661_v6 = vcombine.low %v6645_v51, %v6668_v15  ;;  %v1677_v13 = vcombine.low %v6679_v27, %v6706_v61  ;;  %v918_v44 = vsel %vm6789_vm14, %v6924_v54, %v917_v34  ;;  %v6161_v33 = vld [vmem:[%s8455_s2 + $0xc8] sm:$0xff]   ;;  %v6162_v23 = vld [vmem:[%s8454_s1 + $0xc0] sm:$0xff]  }
  0x4f   :  { %v1300_v1 = vor.u32 %v1299_v16, %v8502_v36  ;;  %v7074_v9 = vcombine.low %v1651_v49, %v1658_v63  ;;  %v1668_v15 = vrot.slane %v1660_v7, %v6589_v2  ;;  %5949 = vmatpush3.bf16.msra.mxu0 %v6138_v52  ;;  %5969 = vmatpush3.bf16.msra.mxu1 %v6139_v3  ;;  %v6150_v52 = vld [vmem:[%s8454_s1 + $0x90] sm:$0xff]  }
  0x50   :  { %v7053_v59 = vcombine.low %v1357_v56, %v1364_v50  ;;  %v921_v8 = vsel %vm6789_vm14, %v919_v19, %v920_v55  ;;  %v1675_v54 = vrot.slane %v1661_v6, %v6589_v2  ;;  %5978 = vmatprep.subr.bf16.mxu0 %v6140_v28  ;;  %5998 = vmatprep.subr.bf16.mxu1 %v6141_v37  ;;  %v6145_v55 = vld [vmem:[%s8455_s2 + $0xa8] sm:$0xff]   ;;  %v6163_v56 = vld [vmem:[%s8455_s2 + $0xc0] sm:$0xff]  }
  0x51   :  { %v7072_v51 = vsel %vm6927_vm5, %v1296_v46, %v1300_v1  ;;  %v985_v34 = vcombine.low %v977_v42, %v984_v29  ;;  %v986_v45 = vcombine.low %v918_v44, %v921_v8  ;;  %v1626_v3 = vcombine.low %v6504_v14, %v6365_v22  ;;  %v6157_v14 = vld [vmem:[%s8455_s2 + $0xd8] sm:$0xff]  }
  0x52   :  { %v1366_v43 = vcombine.low %v7044_v32, %v7072_v51  ;;  %v7084_v24 = vcombine.low %v1668_v15, %v1675_v54  ;;  %5951 = vmatmul.mubr.msk.bf16.vlgmr.msra.gmra.mxu0 %vm410_vm7, %v968_v31  ;;  %5971 = vmatmul.mubr.msk.bf16.vlgmr.msra.gmra.mxu1 %vm410_vm7, %v968_v31  ;;  %v1627_v38 = vcombine.low %v6516_v17, %v6366_v39 }
  0x53   :  { %5979 = vmatpush3.bf16.msra.mxu0 %v6140_v28  ;;  %5999 = vmatpush3.bf16.msra.mxu1 %v6141_v37  ;;  %v993_v35 = vrot.slane %v986_v45, %v6589_v2  ;;  %v1634_v17 = vrot.slane %v1626_v3, %v6589_v2  ;;  %v1684_v4 = vrot.slane %v1677_v13, %v6589_v2 }
  0x54   :  { %5980 = vmatprep.subr.bf16.mxu0 %v6142_v21  ;;  %6000 = vmatprep.subr.bf16.mxu1 %v6143_v26  ;;  %v1373_v31 = vrot.slane %v1366_v43, %v6589_v2 }
  0x55   :  { %5954 = vmatprep.mubr.msk.bf16.mxu0 %vm410_vm7, %v985_v34  ;;  %5974 = vmatprep.mubr.msk.bf16.mxu1 %vm410_vm7, %v985_v34 }
  0x57   :  { %5981 = vmatpush3.bf16.msra.mxu0 %v6142_v21  ;;  %6001 = vmatpush3.bf16.msra.mxu1 %v6143_v26 }
  0x58   :  { %5982 = vmatprep.subr.bf16.mxu0 %v6144_v40  ;;  %6002 = vmatprep.subr.bf16.mxu1 %v6145_v55 }
  0x5a   :  { %5955 = vmatmul.mubr.msk.bf16.gmra.mxu0 %vm410_vm7, %v993_v35  ;;  %5975 = vmatmul.mubr.msk.bf16.gmra.mxu1 %vm410_vm7, %v993_v35 }
  0x5b   :  { %5983 = vmatpush3.bf16.msra.mxu0 %v6144_v40  ;;  %6003 = vmatpush3.bf16.msra.mxu1 %v6145_v55 }
  0x5c   :  { %5984 = vmatprep.subr.bf16.mxu0 %v6146_v57  ;;  %6004 = vmatprep.subr.bf16.mxu1 %v6147_v41 }
  0x5d   :  { %5990 = vmatprep.mubr.msk.bf16.mxu0 %vm410_vm7, %v6988_v5  ;;  %6010 = vmatprep.mubr.msk.bf16.mxu1 %vm410_vm7, %v6988_v5  ;;  %v6153_v5 = vld [vmem:[%s8455_s2 + $0xe8] sm:$0xff]  }
  0x5f   :  { %5985 = vmatpush3.bf16.msra.mxu0 %v6146_v57  ;;  %6005 = vmatpush3.bf16.msra.mxu1 %v6147_v41 }
  0x60   :  { %5986 = vmatprep.subr.bf16.mxu0 %v6148_v25  ;;  %6006 = vmatprep.subr.bf16.mxu1 %v6149_v58 }
  0x63   :  { %5987 = vmatpush3.bf16.msra.mxu0 %v6148_v25  ;;  %6007 = vmatpush3.bf16.msra.mxu1 %v6149_v58 }
  0x64   :  { %5988 = vmatprep.subr.bf16.mxu0 %v6150_v52  ;;  %6008 = vmatprep.subr.bf16.mxu1 %v6151_v30 }
  0x67   :  { %5989 = vmatpush3.bf16.msra.mxu0 %v6150_v52  ;;  %6009 = vmatpush3.bf16.msra.mxu1 %v6151_v30 }
  0x68   :  { %6018 = vmatprep.subr.bf16.mxu0 %v6152_v60  ;;  %6038 = vmatprep.subr.bf16.mxu1 %v6153_v5 }
  0x6a   :  { %5991 = vmatmul.mubr.msk.bf16.vlgmr.msra.gmra.mxu0 %vm410_vm7, %v7012_v48  ;;  %6011 = vmatmul.mubr.msk.bf16.vlgmr.msra.gmra.mxu1 %vm410_vm7, %v7012_v48  ;;  %v1641_v48 = vrot.slane %v1627_v38, %v6589_v2 }
  0x6b   :  { %6019 = vmatpush3.bf16.msra.mxu0 %v6152_v60  ;;  %6039 = vmatpush3.bf16.msra.mxu1 %v6153_v5 }
  0x6c   :  { %6020 = vmatprep.subr.bf16.mxu0 %v6154_v62  ;;  %6040 = vmatprep.subr.bf16.mxu1 %v6155_v10  ;;  %v1642_v0 = vcombine.low %v1634_v17, %v1641_v48 }
  0x6d   :  { %5994 = vmatprep.mubr.msk.bf16.mxu0 %vm410_vm7, %v7053_v59  ;;  %6014 = vmatprep.mubr.msk.bf16.mxu1 %vm410_vm7, %v7053_v59 }
  0x6f   :  { %6021 = vmatpush3.bf16.msra.mxu0 %v6154_v62  ;;  %6041 = vmatpush3.bf16.msra.mxu1 %v6155_v10 }
  0x70   :  { %6022 = vmatprep.subr.bf16.mxu0 %v6156_v53  ;;  %6042 = vmatprep.subr.bf16.mxu1 %v6157_v14 }
  0x72   :  { %5995 = vmatmul.mubr.msk.bf16.gmra.mxu0 %vm410_vm7, %v1373_v31  ;;  %6015 = vmatmul.mubr.msk.bf16.gmra.mxu1 %vm410_vm7, %v1373_v31 }
  0x73   :  { %6023 = vmatpush3.bf16.msra.mxu0 %v6156_v53  ;;  %6043 = vmatpush3.bf16.msra.mxu1 %v6157_v14 }
  0x74   :  { %6024 = vmatprep.subr.bf16.mxu0 %v6158_v12  ;;  %6044 = vmatprep.subr.bf16.mxu1 %v6159_v20 }
  0x75   :  { %6030 = vmatprep.mubr.msk.bf16.mxu0 %vm410_vm7, %v1642_v0  ;;  %6050 = vmatprep.mubr.msk.bf16.mxu1 %vm410_vm7, %v1642_v0 }
  0x77   :  { %6025 = vmatpush3.bf16.msra.mxu0 %v6158_v12  ;;  %6045 = vmatpush3.bf16.msra.mxu1 %v6159_v20 }
  0x78   :  { %6026 = vmatprep.subr.bf16.mxu0 %v6160_v18  ;;  %6046 = vmatprep.subr.bf16.mxu1 %v6161_v33 }
  0x7b   :  { %6027 = vmatpush3.bf16.msra.mxu0 %v6160_v18  ;;  %6047 = vmatpush3.bf16.msra.mxu1 %v6161_v33 }
  0x7c   :  { %6028 = vmatprep.subr.bf16.mxu0 %v6162_v23  ;;  %6048 = vmatprep.subr.bf16.mxu1 %v6163_v56 }
  0x7f   :  { %6029 = vmatpush3.bf16.msra.mxu0 %v6162_v23  ;;  %6049 = vmatpush3.bf16.msra.mxu1 %v6163_v56 }
  0x82   :  { %6031 = vmatmul.mubr.msk.bf16.vlgmr.msra.gmra.mxu0 %vm410_vm7, %v7074_v9  ;;  %6051 = vmatmul.mubr.msk.bf16.vlgmr.msra.gmra.mxu1 %vm410_vm7, %v7074_v9 }
  0x83   :  { %6034 = vmatprep.mubr.msk.bf16.mxu0 %vm410_vm7, %v7084_v24  ;;  %6054 = vmatprep.mubr.msk.bf16.mxu1 %vm410_vm7, %v7084_v24 }
  0x8a   :  { %6035 = vmatmul.mubr.msk.bf16.gmra.mxu0 %vm410_vm7, %v1684_v4  ;;  %6055 = vmatmul.mubr.msk.bf16.gmra.mxu1 %vm410_vm7, %v1684_v4 }
  0x8b   :  { %17 = vsyncpa [#allocation3], 0  ;;  %v2256_v27 = vld [vmem:[%s8457_s4 + $0x50] sm:$0x33]  ;;  %vm2414_vm6 = vcmask 1041408   ;;  %vm2310_vm7 = vcmask 1041409  }
  0x8c   :  { %v5346_v61 = vcombine.high %v2256_v27, %v2256_v27  ;;  %v5319_v29 = vld [vmem:[%s8457_s4 + $0xa8] sm:$0x33]  ;;  %v5345_v59 = vcombine.low %v2256_v27, %v2256_v27  ;;  %v6173_v40 = vld [vmem:[%s8457_s4 + $0x9c] ss:$8 sps:$4 sm:$0xff]   ;;  %v6171_v57 = vld [vmem:[%s8457_s4 + $0x98] ss:$8 sps:$4 sm:$0xff]  }
  0x8d   :  { %v5331_v21 = vcombine.high %v5319_v29, %v5319_v29  ;;  %v5330_v26 = vcombine.low %v5319_v29, %v5319_v29  ;;  %v6170_v54 = vld [vmem:[%s8457_s4 + $0x44] ss:$8 sps:$4 sm:$0xff]   ;;  %v6168_v45 = vld [vmem:[%s8457_s4 + $0x40] ss:$8 sps:$4 sm:$0xff]   ;;  %v6176_v30 = vld [vmem:[%s8457_s4 + $0x34] ss:$8 sps:$4 sm:$0xff]  }
  0x8e   :  { %5347 = vmatprep.subr.msk.bf16.mxu1 %vm2414_vm6, %v5346_v61  ;;  %v2574_v44 = vsel %vm2414_vm6, %v5345_v59, 0  ;;  %v6174_v62 = vld [vmem:[%s8457_s4 + $0x30] ss:$8 sps:$4 sm:$0xff]   ;;  %v6179_v10 = vld [vmem:[%s8457_s4 + $0x8c] ss:$8 sps:$4 sm:$0xff]   ;;  %vm2316_vm8 = vcmask 1043459  }
  0x8f   :  { %5332 = vmatprep.subr.msk.bf16.mxu0 %vm2414_vm6, %v5331_v21  ;;  %2584 = vmatpush1.bf16.msra.mxu1 %v2574_v44  ;;  %v2416_v15 = vsel %vm2414_vm6, %v5330_v26, 0  ;;  %v6177_v39 = vld [vmem:[%s8457_s4 + $0x88] ss:$8 sps:$4 sm:$0xff]   ;;  %v6182_v48 = vld [vmem:[%s8457_s4 + $0x24] ss:$8 sps:$4 sm:$0xff]   ;;  %vm2322_vm11 = vcmask 1045509  }
  0x90   :  { %2426 = vmatpush1.bf16.msra.mxu0 %v2416_v15  ;;  %2585 = vmatprep.subr.bf16.mxu1 %v6170_v54  ;;  %v6180_v20 = vld [vmem:[%s8457_s4 + $0x20] ss:$8 sps:$4 sm:$0xff]   ;;  %v6185_v0 = vld [vmem:[%s8457_s4 + $0x7c] ss:$8 sps:$4 sm:$0xff]   ;;  %vm2328_vm12 = vcmask 1047559   ;;  %vm2407_vm14 = vcmask 687104  }
  0x91   :  { %2427 = vmatprep.subr.bf16.mxu0 %v6173_v40  ;;  %v6183_v23 = vld [vmem:[%s8457_s4 + $0x78] ss:$8 sps:$4 sm:$0xff]  }
  0x92   :  { %v7296_v27 = vld [vmem:[%s8457_s4 + $0x158] sm:$0x33] }
  0x93   :  { %2586 = vmatpush1.bf16.msra.mxu1 %v6168_v45  ;;  %v5398_v61 = vcombine.high %v7296_v27, %v7296_v27 }
  0x94   :  { %2428 = vmatpush1.bf16.msra.mxu0 %v6171_v57  ;;  %2587 = vmatprep.subr.bf16.mxu1 %v6176_v30 }
  0x95   :  { %2429 = vmatprep.subr.bf16.mxu0 %v6179_v10 }
  0x97   :  { %2588 = vmatpush1.bf16.msra.mxu1 %v6174_v62 }
  0x98   :  { %2430 = vmatpush1.bf16.msra.mxu0 %v6177_v39  ;;  %2589 = vmatprep.subr.bf16.mxu1 %v6182_v48 }
  0x99   :  { %2431 = vmatprep.subr.bf16.mxu0 %v6185_v0 }
  0x9b   :  { %2590 = vmatpush1.bf16.msra.mxu1 %v6180_v20 }
  0x9c   :  { %2432 = vmatpush1.bf16.msra.mxu0 %v6183_v23 }
  0xe2   :  { %v5872_v28 = vpop.f32.mrf.mxu0  ;;  %v5892_v37 = vpop.f32.mrf.mxu1 }
  0xe4   :  { %v457_v42 = vpop.f32.mrf.mxu0  ;;  %v570_v46 = vpop.f32.mrf.mxu1 }
  0xe6   :  { %v5873_v16 = vpop.f32.mrf.mxu0  ;;  %v5893_v47 = vpop.f32.mrf.mxu1 }
  0xe8   :  { %v460_v19 = vpop.f32.mrf.mxu0  ;;  %v573_v50 = vpop.f32.mrf.mxu1 }
  0xf0   :  { %v5876_v32 = vpop.f32.mrf.mxu0  ;;  %v5896_v49 = vpop.f32.mrf.mxu1 }
  0xf2   :  { %v473_v36 = vpop.f32.mrf.mxu0  ;;  %v586_v1 = vpop.f32.mrf.mxu1 }
  0xf4   :  { %v5877_v63 = vpop.f32.mrf.mxu0  ;;  %v5897_v7 = vpop.f32.mrf.mxu1 }
  0xf5   :  { %v6390_v63 = vmov 0   ;;  %v7304_v7 = vld [vmem:[%s8457_s4 + $0x100] sm:$0x33] }
  0xf6   :  { %v7204_v6 = vpop.f32.mrf.mxu0  ;;  %v7206_v13 = vpop.f32.mrf.mxu1  ;;  %2611 = vmatprep.mubr.bf16.mxu1 %v6390_v63  ;;  %2453 = vmatprep.mubr.bf16.mxu0 %v6390_v63  ;;  %v5372_v29 = vcombine.high %v7304_v7, %v7304_v7 }
  0xfa   :  { %v5912_v51 = vpop.f32.mrf.mxu0  ;;  %v5932_v9 = vpop.f32.mrf.mxu1 }
  0xfb   :  { %v7211_v8 = vadd.f32 %v5912_v51, %v5872_v28  ;;  %v7213_v43 = vadd.f32 %v5932_v9, %v5892_v37  ;;  %v6188_v28 = vld [vmem:[%s8457_s4 + $0x14] ss:$8 sps:$4 sm:$0xff]  }
  0xfc   :  { %v741_v34 = vpop.f32.mrf.mxu0  ;;  %v841_v24 = vpop.f32.mrf.mxu1  ;;  %2591 = vmatprep.subr.bf16.mxu1 %v6188_v28 }
  0xfd   :  { %v7224_v55 = vadd.f32 %v741_v34, %v457_v42  ;;  %v7226_v35 = vadd.f32 %v841_v24, %v570_v46  ;;  %v6186_v46 = vld [vmem:[%s8457_s4 + $0x10] ss:$8 sps:$4 sm:$0xff]  }
  0xfe   :  { %v5913_v41 = vpop.f32.mrf.mxu0  ;;  %v5933_v25 = vpop.f32.mrf.mxu1  ;;  %2592 = vmatpush1.bf16.msra.mxu1 %v6186_v46 }
  0xff   :  { %v7231_v58 = vadd.f32 %v5913_v41, %v5873_v16  ;;  %v7233_v52 = vadd.f32 %v5933_v25, %v5893_v47  ;;  %v6191_v16 = vld [vmem:[%s8457_s4 + $0x6c] ss:$8 sps:$4 sm:$0xff]  }
 0x100   :  { %v744_v60 = vpop.f32.mrf.mxu0  ;;  %v844_v5 = vpop.f32.mrf.mxu1  ;;  %2433 = vmatprep.subr.bf16.mxu0 %v6191_v16 }
 0x101   :  { %v7244_v22 = vadd.f32 %v744_v60, %v460_v19  ;;  %v7246_v3 = vadd.f32 %v844_v5, %v573_v50  ;;  %v6189_v50 = vld [vmem:[%s8457_s4 + $0x68] ss:$8 sps:$4 sm:$0xff]  }
 0x102   :  { %v5916_v38 = vpop.f32.mrf.mxu0  ;;  %v5936_v53 = vpop.f32.mrf.mxu1  ;;  %2434 = vmatpush1.bf16.msra.mxu0 %v6189_v50 }
 0x103   :  { %v7251_v14 = vadd.f32 %v5916_v38, %v5876_v32  ;;  %v7253_v17 = vadd.f32 %v5936_v53, %v5896_v49  ;;  %v6194_v32 = vld [vmem:[%s8457_s4 + $0x4] ss:$8 sps:$4 sm:$0xff]   ;;  %v6192_v49 = vld [vmem:[%s8457_s4] ss:$8 sps:$4 sm:$0xff]  }
 0x104   :  { %v757_v31 = vpop.f32.mrf.mxu0  ;;  %v857_v12 = vpop.f32.mrf.mxu1  ;;  %2593 = vmatprep.subr.bf16.mxu1 %v6194_v32 }
 0x105   :  { %v758_v18 = vadd.f32 %v757_v31, %v473_v36  ;;  %v858_v33 = vadd.f32 %v857_v12, %v586_v1  ;;  %v6197_v36 = vld [vmem:[%s8457_s4 + $0x5c] ss:$8 sps:$4 sm:$0xff]   ;;  %v6195_v1 = vld [vmem:[%s8457_s4 + $0x58] ss:$8 sps:$4 sm:$0xff]   ;;  %2594 = vmatpush1.bf16.msra.mxu1 %v6192_v49 }
 0x106   :  { %v5917_v56 = vpop.f32.mrf.mxu0  ;;  %v5937_v4 = vpop.f32.mrf.mxu1  ;;  %2435 = vmatprep.subr.bf16.mxu0 %v6197_v36  ;;  %5399 = vmatprep.subr.msk.bf16.mxu1 %vm2414_vm6, %v5398_v61 }
 0x107   :  { %2436 = vmatpush1.bf16.msra.mxu0 %v6195_v1 }
 0x108   :  { %v760_v37 = vpop.f32.mrf.mxu0  ;;  %v860_v42 = vpop.f32.mrf.mxu1  ;;  %5373 = vmatprep.subr.msk.bf16.mxu0 %vm2414_vm6, %v5372_v29 }
 0x109   :  { %v761_v47 = vadd.f32 %v760_v37, %v7204_v6  ;;  %v861_v19 = vadd.f32 %v860_v42, %v7206_v13 }
 0x112   :  { %v5952_v59 = vpop.f32.mrf.mxu0  ;;  %v5972_v6 = vpop.f32.mrf.mxu1 }
 0x113   :  { %v1221_v13 = vadd.f32 %v5952_v59, %v7211_v8  ;;  %v1228_v21 = vadd.f32 %v5972_v6, %v7213_v43  ;;  %v7338_v6 = vld [vmem:[%s8456_s3] ss:$0 sm:$0xff] }
 0x114   :  { %v1076_v26 = vpop.f32.mrf.mxu0  ;;  %v1189_v44 = vpop.f32.mrf.mxu1 }
 0x115   :  { %v1219_v51 = vadd.f32 %v1076_v26, %v7224_v55  ;;  %v1226_v9 = vadd.f32 %v1189_v44, %v7226_v35 }
 0x116   :  { %v5953_v15 = vpop.f32.mrf.mxu0  ;;  %v5973_v54 = vpop.f32.mrf.mxu1 }
 0x117   :  { %v1222_v34 = vadd.f32 %v5953_v15, %v7231_v58  ;;  %v1229_v24 = vadd.f32 %v5973_v54, %v7233_v52 }
 0x118   :  { %v1079_v45 = vpop.f32.mrf.mxu0  ;;  %v1192_v40 = vpop.f32.mrf.mxu1 }
 0x119   :  { %v1220_v57 = vadd.f32 %v1079_v45, %v7244_v22  ;;  %v1227_v8 = vadd.f32 %v1192_v40, %v7246_v3 }
 0x11a   :  { %v5956_v41 = vpop.f32.mrf.mxu0  ;;  %v5976_v43 = vpop.f32.mrf.mxu1 }
 0x11b   :  { %v1225_v25 = vadd.f32 %v5956_v41, %v7251_v14  ;;  %v1232_v55 = vadd.f32 %v5976_v43, %v7253_v17 }
 0x11c   :  { %v1092_v30 = vpop.f32.mrf.mxu0  ;;  %v1205_v35 = vpop.f32.mrf.mxu1 }
 0x11d   :  { %v7321_v60 = vadd.f32 %v1092_v30, %v758_v18  ;;  %v7323_v5 = vadd.f32 %v1205_v35, %v858_v33 }
 0x11e   :  { %v5957_v58 = vpop.f32.mrf.mxu0  ;;  %v5977_v52 = vpop.f32.mrf.mxu1 }
 0x11f   :  { %v5371_v52 = vcombine.low %v7304_v7, %v7304_v7 }
 0x120   :  { %v1095_v62 = vpop.f32.mrf.mxu0  ;;  %v1208_v10 = vpop.f32.mrf.mxu1 }
 0x121   :  { %v7325_v39 = vadd.f32 %v1095_v62, %v761_v47  ;;  %v7327_v22 = vadd.f32 %v1208_v10, %v861_v19 }
 0x12a   :  { %v5992_v3 = vpop.f32.mrf.mxu0  ;;  %v6012_v38 = vpop.f32.mrf.mxu1 }
 0x12b   :  { %v1601_v53 = vadd.f32 %v5992_v3, %v1221_v13  ;;  %v1608_v14 = vadd.f32 %v6012_v38, %v1228_v21 }
 0x12c   :  { %v1456_v48 = vpop.f32.mrf.mxu0  ;;  %v1569_v17 = vpop.f32.mrf.mxu1 }
 0x12d   :  { %v1599_v31 = vadd.f32 %v1456_v48, %v1219_v51  ;;  %v1606_v12 = vadd.f32 %v1569_v17, %v1226_v9 }
 0x12e   :  { %v5993_v20 = vpop.f32.mrf.mxu0  ;;  %v6013_v0 = vpop.f32.mrf.mxu1 }
 0x12f   :  { %v1602_v18 = vadd.f32 %v5993_v20, %v1222_v34  ;;  %v1609_v33 = vadd.f32 %v6013_v0, %v1229_v24 }
 0x130   :  { %v1459_v23 = vpop.f32.mrf.mxu0  ;;  %v1572_v56 = vpop.f32.mrf.mxu1 }
 0x131   :  { %v1600_v4 = vadd.f32 %v1459_v23, %v1220_v57  ;;  %v1607_v28 = vadd.f32 %v1572_v56, %v1227_v8  ;;  %v5397_v8 = vcombine.low %v7296_v27, %v7296_v27 }
 0x132   :  { %v5996_v37 = vpop.f32.mrf.mxu0  ;;  %v6016_v42 = vpop.f32.mrf.mxu1 }
 0x133   :  { %v1605_v46 = vadd.f32 %v5996_v37, %v1225_v25  ;;  %v1612_v16 = vadd.f32 %v6016_v42, %v1232_v55  ;;  %v7356_v17 = vsel %vm2414_vm6, %v5397_v8, 0 }
 0x134   :  { %v1472_v47 = vpop.f32.mrf.mxu0  ;;  %v7329_v19 = vpop.f32.mrf.mxu1 }
 0x136   :  { %v5997_v50 = vpop.f32.mrf.mxu0  ;;  %v6017_v32 = vpop.f32.mrf.mxu1 }
 0x138   :  { %v7331_v49 = vpop.f32.mrf.mxu0  ;;  %v7333_v36 = vpop.f32.mrf.mxu1 }
 0x142   :  { %v6032_v1 = vpop.f32.mrf.mxu0  ;;  %v6052_v61 = vpop.f32.mrf.mxu1 }
 0x143   :  { %v1912_v29 = vadd.f32 %v6032_v1, %v1601_v53  ;;  %v1919_v59 = vadd.f32 %v6052_v61, %v1608_v14 }
 0x144   :  { %v1767_v13 = vpop.f32.mrf.mxu0  ;;  %v1880_v21 = vpop.f32.mrf.mxu1 }
 0x145   :  { %v1926_v26 = vmax.f32 %v1912_v29, %v1919_v59  ;;  %v1910_v44 = vadd.f32 %v1767_v13, %v1599_v31  ;;  %v1917_v51 = vadd.f32 %v1880_v21, %v1606_v12 }
 0x146   :  { %v6033_v9 = vpop.f32.mrf.mxu0  ;;  %v6053_v15 = vpop.f32.mrf.mxu1 }
 0x147   :  { %v1940_v54 = vadd.f32 %v7338_v6, %v1926_v26  ;;  %v1924_v34 = vmax.f32 %v1910_v44, %v1917_v51  ;;  %v1913_v24 = vadd.f32 %v6033_v9, %v1602_v18  ;;  %v1920_v45 = vadd.f32 %v6053_v15, %v1609_v33 }
 0x148   :  { %v1770_v40 = vpop.f32.mrf.mxu0  ;;  %v1883_v57 = vpop.f32.mrf.mxu1 }
 0x149   :  { %v1947_v41 = vmax.f32 %v1940_v54, 0.0  ;;  %v1938_v43 = vadd.f32 %v7338_v6, %v1924_v34  ;;  %v1927_v25 = vmax.f32 %v1913_v24, %v1920_v45  ;;  %v1911_v55 = vadd.f32 %v1770_v40, %v1600_v4 }
 0x14a   :  { %v1918_v30 = vadd.f32 %v1883_v57, %v1607_v28  ;;  %v6036_v35 = vpop.f32.mrf.mxu0  ;;  %v6056_v58 = vpop.f32.mrf.mxu1  ;;  %v7364_v4 = vsel %vm2414_vm6, %v5371_v52, 0  ;;  %v7374_v40 = vadd.f32 %v7329_v19, %v7323_v5  ;;  %v7378_v57 = vadd.f32 %v7331_v49, %v7325_v39 }
 0x14b   :  { %v1993_v62 = vcombine.high %v1947_v41, %v1947_v41  ;;  %v2000_v10 = vrot.slane %v1947_v41, %v6589_v2  ;;  %v1945_v3 = vmax.f32 %v1938_v43, 0.0  ;;  %v7347_v53 = vadd.f32 %v6036_v35, %v1605_v46 }
 0x14c   :  { %v1925_v38 = vmax.f32 %v1911_v55, %v1918_v30  ;;  %v7349_v14 = vadd.f32 %v6056_v58, %v1612_v16  ;;  %v7351_v27 = vpop.f32.mrf.mxu0  ;;  %v7353_v48 = vpop.f32.mrf.mxu1  ;;  %v1941_v18 = vadd.f32 %v7338_v6, %v1927_v25  ;;  %v7367_v16 = vadd.f32 %v1472_v47, %v7321_v60 }
 0x14d   :  { %v2007_v31 = vrot.slane %v1993_v62, %v6589_v2  ;;  %v2008_v12 = vcombine.high %v2000_v10, %v2000_v10  ;;  %v5289_v7 = vrot.slane %v2000_v10, 9  ;;  %v1959_v20 = vcombine.high %v1945_v3, %v1945_v3 }
 0x14e   :  { %v1966_v0 = vrot.slane %v1945_v3, %v6589_v2  ;;  %v1930_v33 = vmax.f32 %v7347_v53, %v7349_v14  ;;  %v6037_v23 = vpop.f32.mrf.mxu0  ;;  %v6057_v56 = vpop.f32.mrf.mxu1  ;;  %v1948_v51 = vmax.f32 %v1941_v18, 0.0  ;;  %v7384_v43 = vadd.f32 %v7333_v36, %v7327_v22 }
 0x14f   :  { %v2009_v28 = vcombine.high %v2007_v31, %v2007_v31  ;;  %v5290_v37 = vrot.slane %v2008_v12, 9  ;;  %v5291_v42 = vrot.slane %v2007_v31, 9  ;;  %v2198_v46 = vmax.f32 %v2000_v10, %v5289_v7 }
 0x150   :  { %v1973_v50 = vrot.slane %v1959_v20, %v6589_v2  ;;  %v1974_v32 = vcombine.high %v1966_v0, %v1966_v0  ;;  %v5281_v1 = vrot.slane %v1966_v0, 9  ;;  %v2010_v30 = vcombine.high %v1948_v51, %v1948_v51 }
 0x151   :  { %v5292_v61 = vrot.slane %v2009_v28, 9  ;;  %v2199_v29 = vmax.f32 %v2008_v12, %v5290_v37  ;;  %v2200_v59 = vmax.f32 %v2007_v31, %v5291_v42  ;;  %v2226_v13 = vpack.c.bf16 %v2198_v46, %v2198_v46 }
 0x152   :  { %v1975_v21 = vcombine.high %v1973_v50, %v1973_v50  ;;  %v5282_v26 = vrot.slane %v1974_v32, 9  ;;  %v5283_v44 = vrot.slane %v1973_v50, 9  ;;  %v2190_v34 = vmax.f32 %v1966_v0, %v5281_v1 }
 0x153   :  { %v2201_v9 = vmax.f32 %v2009_v28, %v5292_v61  ;;  %v2227_v15 = vpack.c.bf16 %v2199_v29, %v2199_v29  ;;  %v2228_v54 = vpack.c.bf16 %v2200_v59, %v2200_v59  ;;  %v7370_v24 = vunpack.c.l.b16 %v2226_v13 }
 0x154   :  { %v5284_v60 = vrot.slane %v1975_v21, 9  ;;  %v2191_v47 = vmax.f32 %v1974_v32, %v5282_v26  ;;  %v2192_v45 = vmax.f32 %v1973_v50, %v5283_v44  ;;  %v2218_v5 = vpack.c.bf16 %v2190_v34, %v2190_v34 }
 0x155   :  { %v2229_v8 = vpack.c.bf16 %v2201_v9, %v2201_v9  ;;  %v7380_v41 = vunpack.c.l.b16 %v2228_v54  ;;  %v7386_v35 = vunpack.c.l.b16 %v2227_v15  ;;  %v1939_v19 = vadd.f32 %v7338_v6, %v1925_v38 }
 0x156   :  { %v2193_v25 = vmax.f32 %v1975_v21, %v5284_v60  ;;  %v2219_v55 = vpack.c.bf16 %v2191_v47, %v2191_v47  ;;  %v2656_v39 = vrot.slane %v7370_v24, 2  ;;  %v2220_v49 = vpack.c.bf16 %v2192_v45, %v2192_v45 }
 0x157   :  { %v7388_v58 = vunpack.c.l.b16 %v2229_v8  ;;  %v2330_v10 = vrot.slane %v7380_v41, 7  ;;  %v2830_v36 = vrot.slane %v7370_v24, 3  ;;  %v2017_v3 = vrot.slane %v1948_v51, %v6589_v2 }
 0x158   :  { %v2221_v52 = vpack.c.bf16 %v2193_v25, %v2193_v25  ;;  %v2289_v62 = vunpack.c.l.b16 %v2219_v55  ;;  %v7397_v12 = vunpack.c.l.b16 %v2220_v49  ;;  %v2024_v38 = vrot.slane %v2010_v30, %v6589_v2 }
 0x159   :  { %v2660_v22 = vrot.slane %v7388_v58, 7  ;;  %v2834_v20 = vrot.slane %v7380_v41, 1  ;;  %v2025_v18 = vcombine.high %v2017_v3, %v2017_v3  ;;  %v5293_v23 = vrot.slane %v2017_v3, 9 }
 0x15a   :  { %v7399_v7 = vunpack.c.l.b16 %v2221_v52  ;;  %v2476_v0 = vrot.slane %v2289_v62, 7  ;;  %v2474_v42 = vunpack.c.l.b16 %v2218_v5  ;;  %v2309_v46 = vrot.slane %v7397_v12, 7 }
 0x15b   :  { %v7405_v56 = vsel %vm2310_vm7, %v2660_v22, %v7380_v41  ;;  %v2026_v50 = vcombine.high %v2024_v38, %v2024_v38  ;;  %v5294_v32 = vrot.slane %v2025_v18, 9  ;;  %v2331_v1 = vsel %vm2310_vm7, %v2330_v10, %v7386_v35 }
 0x15c   :  { %v2312_v61 = vrot.slane %v7399_v7, 6  ;;  %v2478_v29 = vrot.slane %v7397_v12, 6  ;;  %v5295_v59 = vrot.slane %v2024_v38, 9  ;;  %v2202_v13 = vmax.f32 %v2017_v3, %v5293_v23 }
 0x15d   :  { %v2477_v21 = vsel %vm2310_vm7, %v2476_v0, %v2474_v42  ;;  %v2480_v26 = vrot.slane %v7399_v7, 5  ;;  %v2646_v44 = vrot.slane %v7399_v7, 7  ;;  %v5296_v51 = vrot.slane %v2026_v50, 9 }
 0x15e   :  { %v2203_v9 = vmax.f32 %v2025_v18, %v5294_v32  ;;  %v2204_v15 = vmax.f32 %v2024_v38, %v5295_v59  ;;  %v2230_v54 = vpack.c.bf16 %v2202_v13, %v2202_v13  ;;  %v2490_v34 = vrot.slane %v7386_v35, 7 }
 0x15f   :  { %v2311_v60 = vsel %vm2310_vm7, %v2309_v46, %v2289_v62  ;;  %v2205_v47 = vmax.f32 %v2026_v50, %v5296_v51  ;;  %v1946_v45 = vmax.f32 %v1939_v19, 0.0  ;;  %v1944_v8 = vadd.f32 %v7338_v6, %v1930_v33 }
 0x160   :  { %v2479_v25 = vsel %vm872_vm9, %v2478_v29, %v2477_v21  ;;  %v2232_v55 = vpack.c.bf16 %v2204_v15, %v2204_v15  ;;  %v7424_v30 = vunpack.c.l.b16 %v2230_v54  ;;  %v7428_v5 = vadd.f32 %v7351_v27, %v7367_v16 }
 0x161   :  { %v2233_v49 = vpack.c.bf16 %v2205_v47, %v2205_v47  ;;  %v1976_v52 = vcombine.high %v1946_v45, %v1946_v45  ;;  %v1983_v62 = vrot.slane %v1946_v45, %v6589_v2  ;;  %v1951_v10 = vmax.f32 %v1944_v8, 0.0  ;;  %v1786_v45 = vpop.f32.mrf.mxu0 }
 0x162   :  { %v2231_v19 = vpack.c.bf16 %v2203_v9, %v2203_v9  ;;  %v2475_v22 = vunpack.c.l.b16 %v2232_v55  ;;  %v2491_v53 = vsel %vm2310_vm7, %v2490_v34, %v7370_v24  ;;  %v2836_v14 = vrot.slane %v7424_v30, 7 }
 0x163   :  { %v2299_v33 = vunpack.c.l.b16 %v2233_v49  ;;  %v1990_v3 = vrot.slane %v1976_v52, %v6589_v2  ;;  %v1991_v38 = vcombine.high %v1983_v62, %v1983_v62  ;;  %v5285_v0 = vrot.slane %v1983_v62, 9 }
 0x164   :  { %v2492_v18 = vrot.slane %v2475_v22, 6  ;;  %v7437_v27 = vsel %vm2310_vm7, %v2836_v14, %v7388_v58  ;;  %v2061_v16 = vcombine.high %v1951_v10, %v1951_v10  ;;  %v1921_v23 = vadd.f32 %v7353_v48, %v7374_v40 }
 0x165   :  { %v2332_v42 = vrot.slane %v2299_v33, 6  ;;  %v2494_v46 = vrot.slane %v2299_v33, 5  ;;  %v1992_v50 = vcombine.high %v1990_v3, %v1990_v3  ;;  %v5286_v32 = vrot.slane %v1991_v38, 9 }
 0x166   :  { %v2493_v29 = vsel %vm872_vm9, %v2492_v18, %v2491_v53  ;;  %v7442_v59 = vunpack.c.l.b16 %v2231_v19  ;;  %v5287_v13 = vrot.slane %v1990_v3, 9  ;;  %v2194_v21 = vmax.f32 %v1983_v62, %v5285_v0 }
 0x167   :  { %v7445_v51 = vsel %vm872_vm9, %v2332_v42, %v2331_v1  ;;  %v7448_v9 = vsel %vm2316_vm8, %v2494_v46, %v2493_v29  ;;  %v5288_v15 = vrot.slane %v1992_v50, 9  ;;  %v2195_v54 = vmax.f32 %v1991_v38, %v5286_v32 }
 0x168   :  { %v2314_v48 = vsel %vm872_vm9, %v2312_v61, %v2311_v60  ;;  %v2196_v40 = vmax.f32 %v1990_v3, %v5287_v13  ;;  %v2222_v34 = vpack.c.bf16 %v2194_v21, %v2194_v21  ;;  %v2068_v47 = vrot.slane %v1951_v10, %v6589_v2 }
 0x169   :  { %v2197_v8 = vmax.f32 %v1992_v50, %v5288_v15  ;;  %v2223_v55 = vpack.c.bf16 %v2195_v54, %v2195_v54  ;;  %v7453_v49 = vrot.slane %v2061_v16, %v6589_v2  ;;  %v1928_v1 = vmax.f32 %v7428_v5, %v1921_v23  ;;  %v1899_v50 = vpop.f32.mrf.mxu1 }
 0x16a   :  { %v2481_v52 = vsel %vm2316_vm8, %v2480_v26, %v2479_v25  ;;  %v2647_v62 = vsel %vm2310_vm7, %v2646_v44, %v7397_v12  ;;  %v2224_v19 = vpack.c.bf16 %v2196_v40, %v2196_v40  ;;  %v2292_v61 = vunpack.c.l.b16 %v2222_v34 }
 0x16b   :  { %v3012_v60 = vrot.slane %v7442_v59, 7  ;;  %v2225_v22 = vpack.c.bf16 %v2197_v8, %v2197_v8  ;;  %v7460_v10 = vunpack.c.l.b16 %v2223_v55  ;;  %v1915_v53 = vadd.f32 %v1786_v45, %v7378_v57 }
 0x16c   :  { %v7463_v14 = vunpack.c.l.b16 %v2224_v19  ;;  %v2648_v33 = vrot.slane %v2292_v61, 6  ;;  %v2076_v3 = vcombine.high %v2068_v47, %v2068_v47  ;;  %v5305_v5 = vrot.slane %v2068_v47, 9 }
 0x16d   :  { %v7465_v38 = vunpack.c.l.b16 %v2225_v22  ;;  %v2315_v26 = vrot.slane %v2292_v61, 5  ;;  %v2482_v25 = vrot.slane %v2292_v61, 4  ;;  %v5307_v12 = vrot.slane %v7453_v49, 9 }
 0x16e   :  { %v2318_v44 = vrot.slane %v7460_v10, 4  ;;  %v2484_v0 = vrot.slane %v7460_v10, 3  ;;  %v7471_v18 = vsel %vm872_vm9, %v2648_v33, %v2647_v62  ;;  %v2822_v57 = vrot.slane %v2292_v61, 7 }
 0x16f   :  { %v2321_v16 = vrot.slane %v7463_v14, 3  ;;  %v2650_v23 = vrot.slane %v7460_v10, 5  ;;  %v2652_v42 = vrot.slane %v7463_v14, 4  ;;  %v2998_v46 = vrot.slane %v7460_v10, 7 }
 0x170   :  { %v2823_v32 = vsel %vm2310_vm7, %v2822_v57, %v7399_v7  ;;  %v2824_v29 = vrot.slane %v7460_v10, 6  ;;  %v3000_v13 = vrot.slane %v7463_v14, 6  ;;  %v5306_v21 = vrot.slane %v2076_v3, 9 }
 0x171   :  { %v2826_v15 = vrot.slane %v7463_v14, 5  ;;  %v2828_v54 = vrot.slane %v7465_v38, 4  ;;  %v2999_v40 = vsel %vm2310_vm7, %v2998_v46, %v2292_v61  ;;  %v2214_v34 = vmax.f32 %v2068_v47, %v5305_v5 }
 0x172   :  { %v2215_v45 = vmax.f32 %v2076_v3, %v5306_v21  ;;  %v7485_v8 = vmax.f32 %v7453_v49, %v5307_v12  ;;  %v1942_v55 = vadd.f32 %v7338_v6, %v1928_v1  ;;  %v1922_v7 = vadd.f32 %v1899_v50, %v7384_v43 }
 0x173   :  { %v3002_v62 = vrot.slane %v7465_v38, 5  ;;  %v2242_v19 = vpack.c.bf16 %v2214_v34, %v2214_v34  ;;  %v2483_v22 = vsel %vm874_vm10, %v2482_v25, %v2481_v52  ;;  %v2486_v33 = vrot.slane %v7463_v14, 2 }
 0x174   :  { %v7493_v57 = vsel %vm872_vm9, %v3000_v13, %v2999_v40  ;;  %v1949_v61 = vmax.f32 %v1942_v55, 0.0  ;;  %v1929_v47 = vmax.f32 %v1915_v53, %v1922_v7  ;;  %v2485_v3 = vsel %vm2322_vm11, %v2484_v0, %v2483_v22 }
 0x175   :  { %v2243_v5 = vpack.c.bf16 %v2215_v45, %v2215_v45  ;;  %v2487_v12 = vsel %vm876_vm13, %v2486_v33, %v2485_v3  ;;  %v2488_v1 = vrot.slane %v7465_v38, 1  ;;  %v2317_v43 = vsel %vm2316_vm8, %v2315_v26, %v2314_v48 }
 0x176   :  { %v2244_v46 = vpack.c.bf16 %v7485_v8, %v7485_v8  ;;  %v2027_v52 = vcombine.high %v1949_v61, %v1949_v61  ;;  %v2034_v25 = vrot.slane %v1949_v61, %v6589_v2  ;;  %v1943_v50 = vadd.f32 %v7338_v6, %v1929_v47 }
 0x177   :  { %v7503_v13 = vunpack.c.l.b16 %v2242_v19  ;;  %v7506_v53 = vsel %vm2328_vm12, %v2488_v1, %v2487_v12  ;;  %v2320_v0 = vsel %vm874_vm10, %v2318_v44, %v2317_v43  ;;  %v2324_v21 = vrot.slane %v7465_v38, 2 }
 0x178   :  { %v2041_v40 = vrot.slane %v2027_v52, %v6589_v2  ;;  %v2042_v48 = vcombine.high %v2034_v25, %v2034_v25  ;;  %v5297_v26 = vrot.slane %v2034_v25, 9  ;;  %v1950_v34 = vmax.f32 %v1943_v50, 0.0 }
 0x179   :  { %v7511_v45 = vunpack.c.l.b16 %v2243_v5  ;;  %v2323_v55 = vsel %vm2322_vm11, %v2321_v16, %v2320_v0  ;;  %v2327_v6 = vrot.slane %v7370_v24, 1  ;;  %v2825_v7 = vsel %vm872_vm9, %v2824_v29, %v2823_v32 }
 0x17a   :  { %v2043_v19 = vcombine.high %v2041_v40, %v2041_v40  ;;  %v5298_v22 = vrot.slane %v2042_v48, 9  ;;  %v5299_v33 = vrot.slane %v2041_v40, 9  ;;  %v2206_v61 = vmax.f32 %v2034_v25, %v5297_v26 }
 0x17b   :  { %v2044_v44 = vcombine.high %v1950_v34, %v1950_v34  ;;  %v2051_v47 = vrot.slane %v1950_v34, %v6589_v2  ;;  %v2326_v3 = vsel %vm876_vm13, %v2324_v21, %v2323_v55  ;;  %v2827_v12 = vsel %vm2316_vm8, %v2826_v15, %v2825_v7 }
 0x17c   :  { %v5300_v1 = vrot.slane %v2043_v19, 9  ;;  %v2207_v5 = vmax.f32 %v2042_v48, %v5298_v22  ;;  %v2208_v43 = vmax.f32 %v2041_v40, %v5299_v33  ;;  %v2234_v52 = vpack.c.bf16 %v2206_v61, %v2206_v61 }
 0x17d   :  { %v2058_v16 = vrot.slane %v2044_v44, %v6589_v2  ;;  %v2059_v50 = vcombine.high %v2051_v47, %v2051_v47  ;;  %v5301_v0 = vrot.slane %v2051_v47, 9  ;;  %v7521_v32 = vsel %vm2328_vm12, %v2327_v6, %v2326_v3 }
 0x17e   :  { %v2209_v29 = vmax.f32 %v2043_v19, %v5300_v1  ;;  %v2235_v25 = vpack.c.bf16 %v2207_v5, %v2207_v5  ;;  %v2236_v26 = vpack.c.bf16 %v2208_v43, %v2208_v43  ;;  %v2300_v37 = vunpack.c.l.b16 %v2234_v52 }
 0x17f   :  { %v2060_v34 = vcombine.high %v2058_v16, %v2058_v16  ;;  %v5302_v28 = vrot.slane %v2059_v50, 9  ;;  %v5303_v21 = vrot.slane %v2058_v16, 9  ;;  %v2348_v15 = vrot.slane %v7503_v13, 5 }
 0x180   :  { %v2237_v55 = vpack.c.bf16 %v2209_v29, %v2209_v29  ;;  %v2301_v48 = vunpack.c.l.b16 %v2235_v25  ;;  %v7524_v40 = vunpack.c.l.b16 %v2236_v26  ;;  %v2334_v7 = vrot.slane %v2300_v37, 5 }
 0x181   :  { %v2496_v2 = vrot.slane %v2300_v37, 4  ;;  %v2662_v22 = vrot.slane %v2300_v37, 6  ;;  %v5304_v33 = vrot.slane %v2060_v34, 9  ;;  %v2210_v61 = vmax.f32 %v2051_v47, %v5301_v0 }
 0x182   :  { %v7526_v6 = vunpack.c.l.b16 %v2237_v55  ;;  %v2335_v19 = vsel %vm2316_vm8, %v2334_v7, %v7445_v51  ;;  %v2336_v44 = vrot.slane %v2301_v48, 4  ;;  %v2211_v3 = vmax.f32 %v2059_v50, %v5302_v28 }
 0x183   :  { %v2497_v1 = vsel %vm874_vm10, %v2496_v2, %v7448_v9  ;;  %v2498_v5 = vrot.slane %v2301_v48, 3  ;;  %v2663_v43 = vsel %vm872_vm9, %v2662_v22, %v7405_v56  ;;  %v2664_v52 = vrot.slane %v2301_v48, 5 }
 0x184   :  { %v2337_v37 = vsel %vm874_vm10, %v2336_v44, %v2335_v19  ;;  %v2338_v47 = vrot.slane %v7524_v40, 3  ;;  %v2838_v0 = vrot.slane %v2301_v48, 6  ;;  %v2832_v29 = vrot.slane %v7386_v35, 2 }
 0x185   :  { %v7538_v51 = vsel %vm2316_vm8, %v2664_v52, %v2663_v43  ;;  %v2666_v28 = vrot.slane %v7524_v40, 4  ;;  %v2840_v9 = vrot.slane %v7524_v40, 5  ;;  %v2842_v50 = vrot.slane %v7526_v6, 4 }
 0x186   :  { %v2839_v56 = vsel %vm872_vm9, %v2838_v0, %v7437_v27  ;;  %v2212_v25 = vmax.f32 %v2058_v16, %v5303_v21  ;;  %v2213_v26 = vmax.f32 %v2060_v34, %v5304_v33  ;;  %v2238_v55 = vpack.c.bf16 %v2210_v61, %v2210_v61 }
 0x187   :  { %v2239_v7 = vpack.c.bf16 %v2211_v3, %v2211_v3  ;;  %v2499_v48 = vsel %vm2322_vm11, %v2498_v5, %v2497_v1  ;;  %v2500_v2 = vrot.slane %v7524_v40, 2  ;;  %v2502_v22 = vrot.slane %v7526_v6, 1 }
 0x188   :  { %v2240_v19 = vpack.c.bf16 %v2212_v25, %v2212_v25  ;;  %v2241_v44 = vpack.c.bf16 %v2213_v26, %v2213_v26  ;;  %v7548_v43 = vunpack.c.l.b16 %v2238_v55  ;;  %v2339_v52 = vsel %vm2322_vm11, %v2338_v47, %v2337_v37 }
 0x189   :  { %v7551_v31 = vunpack.c.l.b16 %v2239_v7  ;;  %v2501_v27 = vsel %vm876_vm13, %v2500_v2, %v2499_v48  ;;  %v2340_v16 = vrot.slane %v7526_v6, 2  ;;  %v2829_v34 = vsel %vm874_vm10, %v2828_v54, %v2827_v12  ;;  %v6204_v12 = vld [vmem:[%s8457_s4 + $0x14c] ss:$8 sps:$4 sm:$0xff]  }
 0x18a   :  { %v3014_v21 = vrot.slane %v7524_v40, 6  ;;  %v3016_v33 = vrot.slane %v7526_v6, 5  ;;  %v7560_v61 = vunpack.c.l.b16 %v2240_v19  ;;  %v7562_v3 = vunpack.c.l.b16 %v2241_v44 }
 0x18b   :  { %v2670_v1 = vrot.slane %v7548_v43, 2  ;;  %v2844_v5 = vrot.slane %v7548_v43, 3  ;;  %v2503_v37 = vsel %vm2328_vm12, %v2502_v22, %v2501_v27  ;;  %v2341_v47 = vsel %vm876_vm13, %v2340_v16, %v2339_v52  ;;  %v6202_v27 = vld [vmem:[%s8457_s4 + $0x148] ss:$8 sps:$4 sm:$0xff]  }
 0x18c   :  { %v2510_v0 = vpack.c.b16 %v2503_v37, %v7506_v53  ;;  %v2342_v54 = vrot.slane %v7548_v43, 1  ;;  %v2504_v25 = vrot.slane %v7551_v31, 7  ;;  %v2506_v26 = vrot.slane %v7560_v61, 6 }
 0x18d   :  { %v2508_v55 = vrot.slane %v7562_v3, 5  ;;  %v2344_v7 = vrot.slane %v7560_v61, 7  ;;  %v2346_v48 = vrot.slane %v7562_v3, 6  ;;  %v2831_v53 = vsel %vm2322_vm11, %v2830_v36, %v2829_v34  ;;  %v6207_v36 = vld [vmem:[%s8457_s4 + $0xf4] ss:$8 sps:$4 sm:$0xff]  }
 0x18e   :  { %5348 = vmatmul.mubr.msk.bf16.vlgmr.msra.gmra.mxu1 %vm2407_vm14, %v2510_v0  ;;  %v2343_v2 = vsel %vm2328_vm12, %v2342_v54, %v2341_v47  ;;  %v2505_v22 = vsel %vm2310_vm7, %v2504_v25, %v7548_v43  ;;  %v2833_v19 = vsel %vm876_vm13, %v2832_v29, %v2831_v53  ;;  %v2841_v44 = vsel %vm2316_vm8, %v2840_v9, %v2839_v56 }
 0x18f   :  { %2930 = vmatpush1.bf16.msra.mxu1 %v7356_v17  ;;  %v2350_v52 = vpack.c.b16 %v2343_v2, %v7521_v32  ;;  %2621 = vmatprep.mubr.bf16.mxu1 %v6390_v63  ;;  %v2507_v16 = vsel %vm872_vm9, %v2506_v26, %v2505_v22  ;;  %v2345_v29 = vsel %vm2310_vm7, %v2344_v7, %v7551_v31  ;;  %v2846_v9 = vrot.slane %v7551_v31, 2  ;;  %v6210_v17 = vld [vmem:[%s8457_s4 + $0x13c] ss:$8 sps:$4 sm:$0xff]   ;;  %v6216_v7 = vld [vmem:[%s8457_s4 + $0x12c] ss:$8 sps:$4 sm:$0xff]  }
 0x190   :  { %2931 = vmatprep.subr.bf16.mxu1 %v6204_v12  ;;  %v2509_v32 = vsel %vm2316_vm8, %v2508_v55, %v2507_v16  ;;  %v2347_v56 = vsel %vm872_vm9, %v2346_v48, %v2345_v29  ;;  %v7608_v34 = vsel %vm2328_vm12, %v2834_v20, %v2833_v19  ;;  %v2843_v37 = vsel %vm874_vm10, %v2842_v50, %v2841_v44  ;;  %v6205_v20 = vld [vmem:[%s8457_s4 + $0xf0] ss:$8 sps:$4 sm:$0xff]   ;;  %v6213_v26 = vld [vmem:[%s8457_s4 + $0xe4] ss:$8 sps:$4 sm:$0xff]   ;;  %v6211_v19 = vld [vmem:[%s8457_s4 + $0xe0] ss:$8 sps:$4 sm:$0xff]  }
 0x191   :  { %v3018_v47 = vrot.slane %v7548_v43, 4  ;;  %5333 = vmatmul.mubr.msk.bf16.vlgmr.msra.gmra.mxu0 %vm2407_vm14, %v2350_v52  ;;  %v2349_v0 = vsel %vm2316_vm8, %v2348_v15, %v2347_v56  ;;  %v2845_v54 = vsel %vm2322_vm11, %v2844_v5, %v2843_v37  ;;  %v2848_v12 = vrot.slane %v7560_v61, 1 }
 0x192   :  { %2754 = vmatpush1.bf16.msra.mxu0 %v7364_v4  ;;  %2463 = vmatprep.mubr.bf16.mxu0 %v6390_v63  ;;  %v2511_v50 = vpack.c.b16 %v2509_v32, %v2509_v32  ;;  %v2847_v25 = vsel %vm876_vm13, %v2846_v9, %v2845_v54  ;;  %v2651_v15 = vsel %vm2316_vm8, %v2650_v23, %v7471_v18  ;;  %v2654_v5 = vrot.slane %v7465_v38, 3  ;;  %v6208_v4 = vld [vmem:[%s8457_s4 + $0x138] ss:$8 sps:$4 sm:$0xff]  }
 0x193   :  { %2755 = vmatprep.subr.bf16.mxu0 %v6207_v36  ;;  %2932 = vmatpush1.bf16.msra.mxu1 %v6202_v27  ;;  %v7636_v55 = vsel %vm2328_vm12, %v2848_v12, %v2847_v25  ;;  %v2653_v10 = vsel %vm874_vm10, %v2652_v42, %v2651_v15  ;;  %v2658_v18 = vrot.slane %v7386_v35, 1  ;;  %v2667_v23 = vsel %vm874_vm10, %v2666_v28, %v7538_v51  ;;  %v6219_v27 = vld [vmem:[%s8457_s4 + $0xd4] ss:$8 sps:$4 sm:$0xff]   ;;  %v6217_v15 = vld [vmem:[%s8457_s4 + $0xd0] ss:$8 sps:$4 sm:$0xff]  }
 0x194   :  { %2933 = vmatprep.subr.bf16.mxu1 %v6210_v17  ;;  %v2856_v48 = vpack.c.b16 %v7636_v55, %v7608_v34  ;;  %v2655_v53 = vsel %vm2322_vm11, %v2654_v5, %v2653_v10  ;;  %v2668_v14 = vrot.slane %v7526_v6, 3  ;;  %v2672_v42 = vrot.slane %v7551_v31, 1  ;;  %v6222_v17 = vld [vmem:[%s8457_s4 + $0x11c] ss:$8 sps:$4 sm:$0xff]   ;;  %v6226_v6 = vld [vmem:[%s8457_s4 + $0x108] ss:$8 sps:$4 sm:$0xff]  }
 0x195   :  { %v2351_v2 = vpack.c.b16 %v2349_v0, %v2349_v0  ;;  %v2657_v22 = vsel %vm876_vm13, %v2656_v39, %v2655_v53  ;;  %v7660_v51 = vunpack.c.l.b16 %v2244_v46  ;;  %v2850_v28 = vrot.slane %v7503_v13, 7  ;;  %v6214_v46 = vld [vmem:[%s8457_s4 + $0x128] ss:$8 sps:$4 sm:$0xff]   ;;  %v6239_v34 = vld [vmem:[%s8457_s4 + $0x194] ss:$8 sps:$4 sm:$0xff]  }
 0x196   :  { %2756 = vmatpush1.bf16.msra.mxu0 %v6205_v20  ;;  %5349 = vmatmul.mubr.msk.bf16.gmra.mxu1 %vm2407_vm14, %v2511_v50  ;;  %v7668_v44 = vsel %vm2328_vm12, %v2658_v18, %v2657_v22  ;;  %v2669_v52 = vsel %vm2322_vm11, %v2668_v14, %v2667_v23  ;;  %v2852_v39 = vrot.slane %v7511_v45, 6  ;;  %v2674_v8 = vrot.slane %v7562_v3, 7  ;;  %v6234_v22 = vld [vmem:[%s8457_s4 + $0x1a0] ss:$8 sps:$4 sm:$0xff]  }
 0x197   :  { %2757 = vmatprep.subr.bf16.mxu0 %v6213_v26  ;;  %2934 = vmatpush1.bf16.msra.mxu1 %v6208_v4  ;;  %v2671_v36 = vsel %vm876_vm13, %v2670_v1, %v2669_v52  ;;  %v2851_v16 = vsel %vm2310_vm7, %v2850_v28, %v7562_v3  ;;  %v2854_v29 = vrot.slane %v7660_v51, 5  ;;  %v2676_v9 = vrot.slane %v7503_v13, 6  ;;  %v6228_v4 = vld [vmem:[%s8457_s4 + $0x10c] ss:$8 sps:$4 sm:$0xff]   ;;  %v6237_v28 = vld [vmem:[%s8457_s4 + $0x190] ss:$8 sps:$4 sm:$0xff]  }
 0x198   :  { %2935 = vmatprep.subr.bf16.mxu1 %v6216_v7  ;;  %2957 = vmatprep.mubr.bf16.mxu1 %v6390_v63  ;;  %v2673_v32 = vsel %vm2328_vm12, %v2672_v42, %v2671_v36  ;;  %v2853_v56 = vsel %vm872_vm9, %v2852_v39, %v2851_v16  ;;  %v2675_v1 = vsel %vm2310_vm7, %v2674_v8, %v7560_v61  ;;  %v2678_v37 = vrot.slane %v7511_v45, 5  ;;  %v6229_v7 = vld [vmem:[%s8457_s4 + $0xb0] ss:$8 sps:$4 sm:$0xff]   ;;  %v6245_v39 = vld [vmem:[%s8457_s4 + $0x174] ss:$8 sps:$4 sm:$0xff]  }
 0x199   :  { %5334 = vmatmul.mubr.msk.bf16.gmra.mxu0 %vm2407_vm14, %v2351_v2  ;;  %v2680_v0 = vpack.c.b16 %v2673_v32, %v7668_v44  ;;  %v2855_v54 = vsel %vm2316_vm8, %v2854_v29, %v2853_v56  ;;  %v2677_v12 = vsel %vm872_vm9, %v2676_v9, %v2675_v1  ;;  %v3003_v20 = vsel %vm2316_vm8, %v3002_v62, %v7493_v57  ;;  %v6236_v2 = vld [vmem:[%s8457_s4 + $0x1a4] ss:$8 sps:$4 sm:$0xff]   ;;  %v6246_v16 = vld [vmem:[%s8457_s4 + $0x160] ss:$8 sps:$4 sm:$0xff]  }
 0x19a   :  { %v3013_v50 = vsel %vm2310_vm7, %v3012_v60, %v7424_v30  ;;  %v3020_v25 = vrot.slane %v7551_v31, 3  ;;  %2758 = vmatpush1.bf16.msra.mxu0 %v6211_v19  ;;  %2781 = vmatprep.mubr.bf16.mxu0 %v6390_v63  ;;  %v2679_v5 = vsel %vm2316_vm8, %v2678_v37, %v2677_v12  ;;  %v8503_v38 = vrot.slane %v7370_v24, 4  ;;  %v6220_v31 = vld [vmem:[%s8457_s4 + $0x118] ss:$8 sps:$4 sm:$0xff]   ;;  %v6225_v30 = vld [vmem:[%s8457_s4 + $0xc4] ss:$8 sps:$4 sm:$0xff]  }
 0x19b   :  { %v3010_v57 = vrot.slane %v7388_v58, 1  ;;  %2759 = vmatprep.subr.bf16.mxu0 %v6219_v27  ;;  %2936 = vmatpush1.bf16.msra.mxu1 %v6214_v46  ;;  %v8504_v59 = vrot.slane %v7386_v35, 3  ;;  %v3015_v24 = vsel %vm872_vm9, %v3014_v21, %v3013_v50  ;;  %v3022_v58 = vrot.slane %v7560_v61, 2  ;;  %v6242_v44 = vld [vmem:[%s8457_s4 + $0x184] ss:$8 sps:$4 sm:$0xff]   ;;  %v6253_v12 = vld [vmem:[%s8459_s6 + $0x78] sm:$0xff]  }
 0x19c   :  { %v3005_v62 = vsel %vm874_vm10, %v8503_v38, %v3003_v20  ;;  %2937 = vmatprep.subr.bf16.mxu1 %v6222_v17  ;;  %v8505_v26 = vrot.slane %v7380_v41, 2  ;;  %v3017_v35 = vsel %vm2316_vm8, %v3016_v33, %v3015_v24  ;;  %v3024_v18 = vrot.slane %v7562_v3, 1  ;;  %v6223_v41 = vld [vmem:[%s8457_s4 + $0xc0] ss:$8 sps:$4 sm:$0xff]   ;;  %v6231_v33 = vld [vmem:[%s8457_s4 + $0xb4] ss:$8 sps:$4 sm:$0xff]  }
 0x19d   :  { %v3007_v60 = vsel %vm2322_vm11, %v8504_v59, %v3005_v62  ;;  %v3019_v21 = vsel %vm874_vm10, %v3018_v47, %v3017_v35  ;;  %v5412_v3 = vld [vmem:[%s8457_s4 + $0x1b0] sm:$0x33]  ;;  %v2077_v55 = vcombine.high %v7453_v49, %v7453_v49  ;;  %v2681_v19 = vpack.c.b16 %v2679_v5, %v2679_v5  ;;  %v6240_v49 = vld [vmem:[%s8457_s4 + $0x180] ss:$8 sps:$4 sm:$0xff]   ;;  %v6248_v27 = vld [vmem:[%s8457_s4 + $0x164] ss:$8 sps:$4 sm:$0xff]  }
 0x19e   :  { %v3009_v10 = vsel %vm876_vm13, %v8505_v26, %v3007_v60  ;;  %2760 = vmatpush1.bf16.msra.mxu0 %v6217_v15  ;;  %v3021_v61 = vsel %vm2322_vm11, %v3020_v25, %v3019_v21  ;;  %v5424_v53 = vcombine.high %v5412_v3, %v5412_v3  ;;  %v5423_v14 = vcombine.low %v5412_v3, %v5412_v3  ;;  %v6243_v46 = vld [vmem:[%s8457_s4 + $0x170] ss:$8 sps:$4 sm:$0xff]   ;;  %v6254_v20 = vld [vmem:[%s8459_s6 + $0x28] sm:$0xff]   ;;  %v6256_v25 = vld [vmem:[%s8459_s6 + $0x20] sm:$0xff]  }
 0x19f   :  { %v7741_v40 = vsel %vm2328_vm12, %v3010_v57, %v3009_v10  ;;  %2761 = vmatprep.subr.bf16.mxu0 %v6225_v30  ;;  %2938 = vmatpush1.bf16.msra.mxu1 %v6220_v31  ;;  %v3023_v43 = vsel %vm876_vm13, %v3022_v58, %v3021_v61  ;;  %v5308_v52 = vrot.slane %v2077_v55, 9  ;;  %v3026_v29 = vrot.slane %v7511_v45, 7  ;;  %v6255_v50 = vld [vmem:[%s8459_s6 + $0x70] sm:$0xff]   ;;  %v6257_v15 = vld [vmem:[%s8459_s6 + $0x68] sm:$0xff]   ;;  %v6258_v5 = vld [vmem:[%s8459_s6 + $0x18] sm:$0xff]  }
 0x1a0   :  { %2939 = vmatprep.subr.bf16.mxu1 %v6228_v4  ;;  %v3025_v47 = vsel %vm2328_vm12, %v3024_v18, %v3023_v43  ;;  %v3096_v42 = vsel %vm2414_vm6, %v5423_v14, 0  ;;  %v3028_v17 = vrot.slane %v7660_v51, 6  ;;  %v6249_v51 = vld [vmem:[%s8459_s6 + $0x88] sm:$0xff]   ;;  %v6259_v38 = vld [vmem:[%s8459_s6 + $0x60] sm:$0xff]   ;;  %v6260_v62 = vld [vmem:[%s8459_s6 + $0x10] sm:$0xff]   ;;  %vm6393_vm10 = vmmov 0  }
 0x1a1   :  { %v3032_v23 = vpack.c.b16 %v3025_v47, %v7741_v40  ;;  %v2217_v8 = vmax.f32 %v2077_v55, %v5308_v52  ;;  %v3027_v32 = vsel %vm2310_vm7, %v3026_v29, %v7503_v13  ;;  %v6250_v13 = vld [vmem:[%s8459_s6 + $0x38] sm:$0xff]   ;;  %v6262_v31 = vld [vmem:[%s8459_s6 + $0x8] sm:$0xff]   ;;  %v6263_v30 = vld [vmem:[%s8459_s6 + $0x50] sm:$0xff]  }
 0x1a2   :  { %2762 = vmatpush1.bf16.msra.mxu0 %v6223_v41  ;;  %v3029_v1 = vsel %vm872_vm9, %v3028_v17, %v3027_v32  ;;  %v6261_v57 = vld [vmem:[%s8459_s6 + $0x58] sm:$0xff]   ;;  %v6264_v59 = vld [vmem:[%s8459_s6] sm:$0xff]   ;;  %v6266_v24 = vld [vmem:[%s8459_s6 + $0x48] sm:$0xff]   ;;  %vm3399_vm9 = vcmask 261120  }
 0x1a3   :  { %2763 = vmatprep.subr.bf16.mxu0 %v6231_v33  ;;  %2940 = vmatpush1.bf16.msra.mxu1 %v6226_v6  ;;  %v2245_v36 = vpack.c.bf16 %v2217_v8, %v2217_v8  ;;  %v6265_v60 = vld [vmem:[%s8459_s6 + $0x98] sm:$0xff]   ;;  %v6267_v58 = vld [vmem:[%s8459_s6 + $0x90] sm:$0xff]   ;;  %v6268_v4 = vld [vmem:[%s8459_s6 + $0x40] sm:$0xff]  }
 0x1a4   :  { %3403 = vmatprep.subr.bf16.mxu1 %v6390_v63 }
 0x1a5   :  { %v2997_v9 = vunpack.c.l.b16 %v2245_v36 }
 0x1a6   :  { %2764 = vmatpush1.bf16.msra.mxu0 %v6229_v7  ;;  %5400 = vmatmul.mubr.msk.bf16.vlgmr.msra.gmra.mxu1 %vm2407_vm14, %v2856_v48  ;;  %v2857_v48 = vpack.c.b16 %v2855_v54, %v2855_v54  ;;  %v6252_v54 = vld [vmem:[%s8459_s6 + $0x30] sm:$0xff]  }
 0x1a7   :  { %5425 = vmatprep.subr.msk.bf16.mxu0 %vm2414_vm6, %v5424_v53  ;;  %2967 = vmatprep.mubr.bf16.mxu1 %v6390_v63  ;;  %v3030_v56 = vrot.slane %v2997_v9, 5 }
 0x1a8   :  { %3404 = vmatpush1.bf16.msra.mxu1 %v6250_v13 }
 0x1a9   :  { %5374 = vmatmul.mubr.msk.bf16.vlgmr.msra.gmra.mxu0 %vm2407_vm14, %v2680_v0  ;;  %v3031_v37 = vsel %vm2316_vm8, %v3030_v56, %v3029_v1  ;;  %v6251_v0 = vld [vmem:[%s8459_s6 + $0x80] sm:$0xff]   ;;  %3405 = vmatprep.subr.bf16.mxu1 %v6390_v63 }
 0x1aa   :  { %3106 = vmatpush1.bf16.msra.mxu0 %v3096_v42  ;;  %2791 = vmatprep.mubr.bf16.mxu0 %v6390_v63  ;;  %v3033_v45 = vpack.c.b16 %v3031_v37, %v3031_v37 }
 0x1ab   :  { %3107 = vmatprep.subr.bf16.mxu0 %v6236_v2 }
 0x1ac   :  { %3406 = vmatpush1.bf16.msra.mxu1 %v6252_v54  ;;  %v3166_v54 = vsub.s32 1, %v6490_v11 }
 0x1ad   :  { %3407 = vmatprep.subr.bf16.mxu1 %v6390_v63 }
 0x1ae   :  { %3108 = vmatpush1.bf16.msra.mxu0 %v6234_v22  ;;  %5401 = vmatmul.mubr.msk.bf16.gmra.mxu1 %vm2407_vm14, %v2857_v48 }
 0x1af   :  { %3109 = vmatprep.subr.bf16.mxu0 %v6239_v34 }
 0x1b0   :  { %3408 = vmatpush1.bf16.msra.mxu1 %v6254_v20 }
 0x1b1   :  { %5375 = vmatmul.mubr.msk.bf16.gmra.mxu0 %vm2407_vm14, %v2681_v19  ;;  %3409 = vmatprep.subr.bf16.mxu1 %v6390_v63 }
 0x1b2   :  { %3110 = vmatpush1.bf16.msra.mxu0 %v6237_v28  ;;  %3133 = vmatprep.mubr.bf16.mxu0 %v6390_v63 }
 0x1b3   :  { %3111 = vmatprep.subr.bf16.mxu0 %v6242_v44 }
 0x1b4   :  { %3410 = vmatpush1.bf16.msra.mxu1 %v6256_v25 }
 0x1b5   :  { %3411 = vmatprep.subr.bf16.mxu1 %v6390_v63 }
 0x1b6   :  { %3112 = vmatpush1.bf16.msra.mxu0 %v6240_v49 }
 0x1b7   :  { %3113 = vmatprep.subr.bf16.mxu0 %v6245_v39 }
 0x1b8   :  { %3412 = vmatpush1.bf16.msra.mxu1 %v6258_v5 }
 0x1b9   :  { %3413 = vmatprep.subr.bf16.mxu1 %v6390_v63 }
 0x1ba   :  { %3114 = vmatpush1.bf16.msra.mxu0 %v6243_v46 }
 0x1bb   :  { %3115 = vmatprep.subr.bf16.mxu0 %v6248_v27 }
 0x1bc   :  { %3414 = vmatpush1.bf16.msra.mxu1 %v6260_v62 }
 0x1bd   :  { %3415 = vmatprep.subr.bf16.mxu1 %v6390_v63 }
 0x1be   :  { %3116 = vmatpush1.bf16.msra.mxu0 %v6246_v16 }
 0x1bf   :  { %3541 = vmatprep.subr.bf16.mxu0 %v6390_v63 }
 0x1c0   :  { %3416 = vmatpush1.bf16.msra.mxu1 %v6262_v31 }
 0x1c1   :  { %5426 = vmatmul.mubr.msk.bf16.vlgmr.msra.gmra.mxu0 %vm2407_vm14, %v3032_v23  ;;  %3417 = vmatprep.subr.bf16.mxu1 %v6390_v63 }
 0x1c2   :  { %3143 = vmatprep.mubr.bf16.mxu0 %v6390_v63  ;;  %3542 = vmatpush1.bf16.msra.mxu0 %v6249_v51  ;;  %v3158_v51 = vld [vmem:[%s8458_s5] sm:$0x3] }
 0x1c3   :  { %3543 = vmatprep.subr.bf16.mxu0 %v6390_v63 }
 0x1c4   :  { %3418 = vmatpush1.bf16.msra.mxu1 %v6264_v59 }
 0x1c5   :  { %3431 = vmatprep.subr.bf16.mxu1 %v6390_v63 }
 0x1c6   :  { %3544 = vmatpush1.bf16.msra.mxu0 %v6251_v0 }
 0x1c7   :  { %3545 = vmatprep.subr.bf16.mxu0 %v6390_v63 }
 0x1c8   :  { %3432 = vmatpush2.bf16.msra.mxu1 %v6266_v24 }
 0x1c9   :  { %5427 = vmatmul.mubr.msk.bf16.gmra.mxu0 %vm2407_vm14, %v3033_v45  ;;  %3433 = vmatprep.subr.bf16.mxu1 %v6390_v63  ;;  %v3162_v45 = vsub.s32 0, %v6490_v11 }
 0x1ca   :  { %3546 = vmatpush1.bf16.msra.mxu0 %v6253_v12  ;;  %v6391_v12 = vmov 1966171168  }
 0x1cb   :  { %3547 = vmatprep.subr.bf16.mxu0 %v6390_v63  ;;  %v3193_v20 = vunpack.c.l.s4 %v6391_v12  ;;  %v3163_v5 = vrot.slane %v3158_v51, %v3162_v45 }
 0x1cc   :  { %3434 = vmatpush2.bf16.msra.mxu1 %v6268_v4 }
 0x1cd   :  { %3721 = vmatprep.subr.bf16.mxu1 %v6390_v63 }
 0x1ce   :  { %3548 = vmatpush1.bf16.msra.mxu0 %v6255_v50 }
 0x1cf   :  { %3549 = vmatprep.subr.bf16.mxu0 %v6390_v63 }
 0x1d2   :  { %3550 = vmatpush1.bf16.msra.mxu0 %v6257_v15 }
 0x1d3   :  { %3551 = vmatprep.subr.bf16.mxu0 %v6390_v63 }
 0x1d6   :  { %3552 = vmatpush1.bf16.msra.mxu0 %v6259_v38 }
 0x1d7   :  { %3553 = vmatprep.subr.bf16.mxu0 %v6390_v63 }
 0x1da   :  { %3554 = vmatpush1.bf16.msra.mxu0 %v6261_v57 }
 0x1db   :  { %3555 = vmatprep.subr.bf16.mxu0 %v6390_v63 }
 0x1de   :  { %3556 = vmatpush1.bf16.msra.mxu0 %v6263_v30  ;;  %v3167_v30 = vrot.slane %v3158_v51, %v3166_v54 }
 0x1df   :  { %3569 = vmatprep.subr.bf16.mxu0 %v6390_v63 }
 0x1e2   :  { %3570 = vmatpush2.bf16.msra.mxu0 %v6265_v60  ;;  %v3194_v60 = vunpack.c.0.s8 %v3193_v20 }
 0x1e3   :  { %3571 = vmatprep.subr.bf16.mxu0 %v6390_v63 }
 0x1e6   :  { %3572 = vmatpush2.bf16.msra.mxu0 %v6267_v58 }
 0x1e7   :  { %3853 = vmatprep.subr.bf16.mxu0 %v6390_v63 }
 0x24e   :  { %v2613_v26 = vpop.f32.mrf.mxu1 }
 0x250   :  { %v2615_v10 = vpop.f32.mrf.mxu1 }
 0x251   :  { %v2455_v35 = vpop.f32.mrf.mxu0 }
 0x252   :  { %v2617_v18 = vpop.f32.mrf.mxu1  ;;  %v2614_v56 = vadd.f32 %v2613_v26, %v2455_v35 }
 0x253   :  { %v2457_v40 = vpop.f32.mrf.mxu0 }
 0x254   :  { %v2619_v21 = vpop.f32.mrf.mxu1  ;;  %v2616_v1 = vadd.f32 %v2615_v10, %v2457_v40  ;;  %v7906_v40 = vsub.s32 %v3194_v60, %v6490_v11 }
 0x255   :  { %v2459_v41 = vpop.f32.mrf.mxu0 }
 0x256   :  { %v2623_v61 = vpop.f32.mrf.mxu1  ;;  %v2618_v13 = vadd.f32 %v2617_v18, %v2459_v41 }
 0x257   :  { %v2461_v6 = vpop.f32.mrf.mxu0 }
 0x258   :  { %v2625_v33 = vpop.f32.mrf.mxu1  ;;  %v2620_v50 = vadd.f32 %v2619_v21, %v2461_v6 }
 0x259   :  { %v2465_v43 = vpop.f32.mrf.mxu0 }
 0x25a   :  { %v2624_v3 = vadd.f32 %v2623_v61, %v2465_v43  ;;  %v2627_v47 = vpop.f32.mrf.mxu1 }
 0x25b   :  { %v2467_v23 = vpop.f32.mrf.mxu0 }
 0x25c   :  { %v2626_v7 = vadd.f32 %v2625_v33, %v2467_v23  ;;  %v2628_v53 = vpop.f32.mrf.mxu1 }
 0x25d   :  { %v2469_v14 = vpop.f32.mrf.mxu0 }
 0x25f   :  { %v2470_v42 = vpop.f32.mrf.mxu0 }
 0x266   :  { %v2959_v2 = vpop.f32.mrf.mxu1 }
 0x268   :  { %v2961_v22 = vpop.f32.mrf.mxu1 }
 0x269   :  { %v2783_v34 = vpop.f32.mrf.mxu0 }
 0x26a   :  { %v2963_v55 = vpop.f32.mrf.mxu1  ;;  %v2800_v37 = vadd.f32 %v2783_v34, %v2614_v56 }
 0x26b   :  { %v2785_v48 = vpop.f32.mrf.mxu0 }
 0x26c   :  { %v2965_v28 = vpop.f32.mrf.mxu1  ;;  %v2801_v0 = vadd.f32 %v2785_v48, %v2616_v1  ;;  %v2976_v15 = vadd.f32 %v2959_v2, %v2800_v37 }
 0x26d   :  { %v2787_v19 = vpop.f32.mrf.mxu0 }
 0x26e   :  { %v2969_v44 = vpop.f32.mrf.mxu1  ;;  %v2802_v25 = vadd.f32 %v2787_v19, %v2618_v13  ;;  %v2977_v31 = vadd.f32 %v2961_v22, %v2801_v0 }
 0x26f   :  { %v2789_v52 = vpop.f32.mrf.mxu0 }
 0x270   :  { %v2971_v49 = vpop.f32.mrf.mxu1  ;;  %v2803_v62 = vadd.f32 %v2789_v52, %v2620_v50  ;;  %v2978_v4 = vadd.f32 %v2963_v55, %v2802_v25 }
 0x271   :  { %v2793_v39 = vpop.f32.mrf.mxu0 }
 0x272   :  { %v2804_v8 = vadd.f32 %v2793_v39, %v2624_v3  ;;  %v2973_v46 = vpop.f32.mrf.mxu1  ;;  %v2979_v18 = vadd.f32 %v2965_v28, %v2803_v62 }
 0x273   :  { %v2795_v27 = vpop.f32.mrf.mxu0 }
 0x274   :  { %v2805_v36 = vadd.f32 %v2795_v27, %v2626_v7  ;;  %v2974_v16 = vpop.f32.mrf.mxu1  ;;  %v2980_v29 = vadd.f32 %v2969_v44, %v2804_v8 }
 0x275   :  { %v2797_v9 = vpop.f32.mrf.mxu0 }
 0x276   :  { %v2981_v17 = vadd.f32 %v2971_v49, %v2805_v36 }
 0x277   :  { %v2798_v32 = vpop.f32.mrf.mxu0 }
 0x281   :  { %v3135_v38 = vpop.f32.mrf.mxu0 }
 0x282   :  { %v3152_v57 = vadd.f32 %v3135_v38, %v2976_v15 }
 0x283   :  { %v3137_v59 = vpop.f32.mrf.mxu0 }
 0x284   :  { %v3170_v24 = vadd.f32 %v3163_v5, %v3152_v57  ;;  %v3153_v58 = vadd.f32 %v3137_v59, %v2977_v31 }
 0x285   :  { %v3139_v26 = vpop.f32.mrf.mxu0 }
 0x286   :  { %v3171_v10 = vadd.f32 %v3167_v30, %v3153_v58  ;;  %v3154_v35 = vadd.f32 %v3139_v26, %v2978_v4  ;;  %v3176_v41 = vmax.f32 %v3170_v24, 0.0 }
 0x287   :  { %v3141_v21 = vpop.f32.mrf.mxu0 }
 0x288   :  { %v3177_v61 = vmax.f32 %v3171_v10, 0.0  ;;  %v3172_v6 = vadd.f32 %v3163_v5, %v3154_v35  ;;  %v3155_v33 = vadd.f32 %v3141_v21, %v2979_v18 }
 0x289   :  { %v3145_v43 = vpop.f32.mrf.mxu0 }
 0x28a   :  { %v5428_v3 = vpack.c.bf16 %v3177_v61, %v3176_v41  ;;  %v3173_v47 = vadd.f32 %v3167_v30, %v3155_v33  ;;  %v3156_v23 = vadd.f32 %v3145_v43, %v2980_v29  ;;  %v3178_v7 = vmax.f32 %v3172_v6, 0.0 }
 0x28b   :  { %v3147_v53 = vpop.f32.mrf.mxu0 }
 0x28c   :  { %v3198_v14 = vrot.slane %v5428_v3, %v7906_v40  ;;  %v3179_v42 = vmax.f32 %v3173_v47, 0.0  ;;  %v3174_v2 = vadd.f32 %v3163_v5, %v3156_v23  ;;  %v3157_v22 = vadd.f32 %v3147_v53, %v2981_v17  ;;  %v6269_v3 = vld [vmem:[%s8459_s6 + $0x128] sm:$0xff]  }
 0x28d   :  { %v3149_v34 = vpop.f32.mrf.mxu0 }
 0x28e   :  { %v3206_v55 = vcombine.high %v3198_v14, %v3198_v14  ;;  %v7910_v11 = vrot.slane %v3198_v14, %v7906_v40  ;;  %v5429_v48 = vpack.c.bf16 %v3179_v42, %v3178_v7  ;;  %v3175_v28 = vadd.f32 %v3167_v30, %v3157_v22  ;;  %v6270_v22 = vld [vmem:[%s8459_s6 + $0xd8] sm:$0xff]  }
 0x28f   :  { %v3150_v19 = vpop.f32.mrf.mxu0  ;;  %v3180_v39 = vmax.f32 %v3174_v2, 0.0 }
 0x290   :  { %v3228_v44 = vrot.slane %v3206_v55, %v7906_v40  ;;  %v3290_v52 = vrot.slane %v7910_v11, %v7906_v40  ;;  %v3205_v49 = vrot.slane %v5429_v48, %v7906_v40  ;;  %v3181_v8 = vmax.f32 %v3175_v28, 0.0  ;;  %v6271_v19 = vld [vmem:[%s8459_s6 + $0x120] sm:$0xff]  }
 0x292   :  { %v3238_v46 = vcombine.high %v3228_v44, %v3228_v44  ;;  %v3291_v27 = vcombine.high %v3290_v52, %v3290_v52  ;;  %v7917_v36 = vrot.slane %v3228_v44, %v7906_v40  ;;  %v3207_v16 = vcombine.high %v3205_v49, %v3205_v49 }
 0x293   :  { %v3221_v29 = vrot.slane %v3205_v49, %v7906_v40  ;;  %v5430_v9 = vpack.c.bf16 %v3181_v8, %v3180_v39  ;;  %v3298_v17 = vrot.slane %v3290_v52, %v7906_v40  ;;  %v6272_v49 = vld [vmem:[%s8459_s6 + $0xd0] sm:$0xff]  }
 0x294   :  { %v3610_v32 = vcombine.high %v7917_v36, %v7917_v36  ;;  %v7924_v56 = vrot.slane %v3238_v46, %v7906_v40  ;;  %v7927_v1 = vrot.slane %v3207_v16, %v7906_v40  ;;  %v3305_v51 = vrot.slane %v3291_v27, %v7906_v40 }
 0x295   :  { %v3237_v37 = vcombine.high %v3221_v29, %v3221_v29  ;;  %v7930_v45 = vrot.slane %v3221_v29, %v7906_v40  ;;  %v3247_v13 = vrot.slane %v5430_v9, %v7906_v40  ;;  %v3328_v20 = vunpack.c.l.b16 %v3298_v17  ;;  %v6273_v29 = vld [vmem:[%s8459_s6 + $0x118] sm:$0xff]  }
 0x296   :  { %v3624_v0 = vrot.slane %v3610_v32, %v7906_v40  ;;  %v3312_v54 = vrot.slane %v7927_v1, %v7906_v40  ;;  %v3329_v62 = vunpack.c.l.b16 %v3305_v51  ;;  %v4234_v44 = vcombine.high %v7924_v56, %v7924_v56 }
 0x297   :  { %v7938_v12 = vrot.slane %v3237_v37, %v7906_v40  ;;  %v4553_v50 = vrot.slane %v7930_v45, %v7906_v40  ;;  %v3248_v25 = vcombine.high %v3247_v13, %v3247_v13  ;;  %v3255_v15 = vrot.slane %v3247_v13, %v7906_v40 }
 0x298   :  { %v3320_v5 = vrot.slane %v3312_v54, %v7906_v40  ;;  %v3313_v38 = vcombine.high %v3312_v54, %v3312_v54  ;;  %v3648_v59 = vunpack.c.l.b16 %v3624_v0  ;;  %v3471_v4 = vrot.slane %v3328_v20, 1 }
 0x299   :  { %v3632_v57 = vcombine.high %v7938_v12, %v7938_v12  ;;  %v3262_v31 = vrot.slane %v3248_v25, %v7906_v40  ;;  %v4255_v30 = vrot.slane %v3255_v15, %v7906_v40  ;;  %v3473_v35 = vrot.slane %v3329_v62, 1  ;;  %v6275_v25 = vld [vmem:[%s8459_s6 + $0x110] sm:$0xff]  }
 0x29a   :  { %v3330_v60 = vunpack.c.l.b16 %v3320_v5  ;;  %v3327_v24 = vrot.slane %v3313_v38, %v7906_v40  ;;  %v3785_v61 = vrot.slane %v3648_v59, 1  ;;  %v4241_v39 = vrot.slane %v7924_v56, %v7906_v40  ;;  %v6274_v56 = vld [vmem:[%s8459_s6 + $0xc8] sm:$0xff]  }
 0x29b   :  { %v3646_v58 = vrot.slane %v3632_v57, %v7906_v40  ;;  %v7951_v26 = vrot.slane %v3262_v31, %v7906_v40  ;;  %v4256_v53 = vcombine.high %v4255_v30, %v4255_v30  ;;  %v4263_v8 = vrot.slane %v4255_v30, %v7906_v40  ;;  %v6276_v57 = vld [vmem:[%s8459_s6 + $0xc0] sm:$0xff]  }
 0x29c   :  { %v3331_v10 = vunpack.c.l.b16 %v3327_v24  ;;  %v3332_v21 = vrot.slane %v3330_v60, 7  ;;  %v3472_v41 = vsel %vm2310_vm7, %v3330_v60, %v3471_v4  ;;  %v4546_v46 = vcombine.high %v7930_v45, %v7930_v45  ;;  %v6277_v24 = vld [vmem:[%s8459_s6 + $0x108] sm:$0xff]  }
 0x29d   :  { %v3650_v18 = vunpack.c.l.b16 %v3646_v58  ;;  %v3475_v14 = vpack.c.b16 %v3472_v41, %v3472_v41  ;;  %v4270_v52 = vrot.slane %v4256_v53, %v7906_v40  ;;  %v4248_v27 = vrot.slane %v4234_v44, %v7906_v40  ;;  %v6282_v53 = vld [vmem:[%s8459_s6 + $0xa8] sm:$0xff]  }
 0x29e   :  { %v3474_v6 = vsel %vm2310_vm7, %v3331_v10, %v3473_v35  ;;  %v3334_v33 = vrot.slane %v3331_v10, 7  ;;  %v3333_v23 = vsel %vm2310_vm7, %v3332_v21, %v3328_v20  ;;  %v4271_v9 = vunpack.c.l.b16 %v4241_v39  ;;  %v6278_v21 = vld [vmem:[%s8459_s6 + $0xb8] sm:$0xff]   ;;  %v6286_v44 = vld [vmem:[%s8459_s6 + $0xe8] sm:$0xff]  }
 0x29f   :  { %v3476_v43 = vpack.c.b16 %v3474_v6, %v3474_v6  ;;  %v3786_v47 = vsel %vm2310_vm7, %v3650_v18, %v3785_v61  ;;  %v3653_v7 = vrot.slane %v3650_v18, 7  ;;  %v3336_v48 = vpack.c.b16 %v3333_v23, %v3333_v23 }
 0x2a0   :  { %v3335_v42 = vsel %vm2310_vm7, %v3334_v33, %v3329_v62  ;;  %v3788_v55 = vpack.c.b16 %v3786_v47, %v3786_v47  ;;  %v4274_v16 = vunpack.c.l.b16 %v4270_v52  ;;  %v4272_v17 = vunpack.c.l.b16 %v4248_v27  ;;  %v6281_v47 = vld [vmem:[%s8459_s6 + $0xf8] sm:$0xff]   ;;  %v6287_v52 = vld [vmem:[%s8459_s6 + $0x130] sm:$0xff]   ;;  %v6288_v27 = vld [vmem:[%s8459_s6 + $0xe0] sm:$0xff]  }
 0x2a1   :  { %5473 = vmatprep.mubr.msk.bf16.mxu0 %vm3399_vm9, %v3476_v43  ;;  %v3337_v2 = vpack.c.b16 %v3335_v42, %v3335_v42  ;;  %v3654_v34 = vsel %vm2310_vm7, %v3653_v7, %v3648_v59  ;;  %v4273_v37 = vunpack.c.l.b16 %v4263_v8  ;;  %v4407_v51 = vrot.slane %v4271_v9, 1 }
 0x2a2   :  { %3574 = vmatmul.mubr.bf16.vlgmr.msra.gmra.mxu0 %v3475_v14  ;;  %v3656_v28 = vpack.c.b16 %v3654_v34, %v3654_v34  ;;  %v4277_v32 = vrot.slane %v4274_v16, 7  ;;  %v4583_v13 = vunpack.c.l.b16 %v4553_v50  ;;  %v4409_v0 = vrot.slane %v4272_v17, 1  ;;  %v6283_v14 = vld [vmem:[%s8459_s6 + $0xf0] sm:$0xff]  }
 0x2a3   :  { %3854 = vmatpush1.bf16.msra.mxu0 %v6269_v3  ;;  %5441 = vmatprep.mubr.msk.bf16.mxu1 %vm3399_vm9, %v3337_v2  ;;  %v4560_v20 = vrot.slane %v4546_v46, %v7906_v40  ;;  %v8005_v15 = vsel %vm2310_vm7, %v4273_v37, %v4407_v51  ;;  %v4568_v45 = vcombine.high %v7951_v26, %v7951_v26  ;;  %v4275_v50 = vrot.slane %v4273_v37, 7  ;;  %v6280_v3 = vld [vmem:[%s8459_s6 + $0xb0] sm:$0xff]   ;;  %v6290_v51 = vld [vmem:[%s8459_s6 + $0x178] sm:$0xff]  }
 0x2a4   :  { %5535 = vmatprep.mubr.msk.bf16.mxu0 %vm3399_vm9, %v3788_v55  ;;  %3436 = vmatmul.mubr.bf16.vlgmr.msra.gmra.mxu1 %v3336_v48  ;;  %v7998_v54 = vsel %vm2310_vm7, %v4277_v32, %v4272_v17  ;;  %v8011_v5 = vsel %vm2310_vm7, %v4274_v16, %v4409_v0  ;;  %v4575_v62 = vrot.slane %v7951_v26, %v7906_v40  ;;  %v4719_v60 = vrot.slane %v4583_v13, 1  ;;  %v6284_v55 = vld [vmem:[%s8459_s6 + $0xa0] sm:$0xff]  }
 0x2a5   :  { %3722 = vmatpush1.bf16.msra.mxu1 %v6270_v22  ;;  %5504 = vmatprep.mubr.msk.bf16.mxu1 %vm3399_vm9, %v3656_v28  ;;  %v4584_v38 = vunpack.c.l.b16 %v4560_v20  ;;  %v4582_v31 = vrot.slane %v4568_v45, %v7906_v40  ;;  %v8020_v30 = vsel %vm2310_vm7, %v4275_v50, %v4271_v9  ;;  %v3236_v26 = vcombine.high %v7910_v11, %v7910_v11  ;;  %v6289_v9 = vld [vmem:[%s8459_s6 + $0x1c8] sm:$0xff]   ;;  %v6291_v20 = vld [vmem:[%s8459_s6 + $0x1c0] sm:$0xff]   ;;  %v6293_v45 = vld [vmem:[%s8459_s6 + $0x1b8] sm:$0xff]  }
 0x2a6   :  { %3855 = vmatprep.subr.bf16.mxu0 %v6390_v63  ;;  %3723 = vmatprep.subr.bf16.mxu1 %v6390_v63  ;;  %v4585_v59 = vunpack.c.l.b16 %v4575_v62  ;;  %v3239_v10 = vcombine.high %v7927_v1, %v7927_v1  ;;  %v6279_v1 = vld [vmem:[%s8459_s6 + $0x100] sm:$0xff]   ;;  %v3617_v42 = vrot.slane %v7917_v36, %v7906_v40  ;;  %v3639_v2 = vrot.slane %v7938_v12, %v7906_v40  ;;  %v6285_v36 = vld [vmem:[%s8459_s6 + $0x138] sm:$0xff]   ;;  %v6294_v50 = vld [vmem:[%s8459_s6 + $0x168] sm:$0xff]  }
 0x2a7   :  { %3856 = vmatpush1.bf16.msra.mxu0 %v6271_v19  ;;  %v4586_v58 = vunpack.c.l.b16 %v4582_v31  ;;  %v4721_v4 = vrot.slane %v4584_v38, 1  ;;  %v8051_v33 = vrot.slane %v3236_v26, %v7906_v40  ;;  %v6296_v62 = vld [vmem:[%s8459_s6 + $0x160] sm:$0xff]   ;;  %v6298_v31 = vld [vmem:[%s8459_s6 + $0x158] sm:$0xff]  }
 0x2a8   :  { %3857 = vmatprep.subr.bf16.mxu0 %v6390_v63  ;;  %v8032_v35 = vsel %vm2310_vm7, %v4585_v59, %v4719_v60  ;;  %v4587_v18 = vrot.slane %v4585_v59, 7  ;;  %v8054_v43 = vrot.slane %v3239_v10, %v7906_v40  ;;  %v3647_v48 = vunpack.c.l.b16 %v3617_v42  ;;  %v6299_v59 = vld [vmem:[%s8459_s6 + $0x1a0] sm:$0xff]   ;;  %v6300_v60 = vld [vmem:[%s8459_s6 + $0x150] sm:$0xff]  }
 0x2a9   :  { %3724 = vmatpush1.bf16.msra.mxu1 %v6272_v49  ;;  %v8038_v41 = vsel %vm2310_vm7, %v4586_v58, %v4721_v4  ;;  %v4589_v61 = vrot.slane %v4586_v58, 7  ;;  %v3922_v23 = vcombine.high %v8051_v33, %v8051_v33  ;;  %v3649_v12 = vunpack.c.l.b16 %v3639_v2  ;;  %v6302_v58 = vld [vmem:[%s8459_s6 + $0x148] sm:$0xff]   ;;  %v6303_v4 = vld [vmem:[%s8459_s6 + $0x190] sm:$0xff]   ;;  %v6310_v2 = vld [vmem:[%s8459_s6 + $0x218] sm:$0xff]  }
 0x2aa   :  { %3725 = vmatprep.subr.bf16.mxu1 %v6390_v63  ;;  %v8042_v11 = vsel %vm2310_vm7, %v4587_v18, %v4583_v13  ;;  %v3944_v7 = vcombine.high %v8054_v43, %v8054_v43  ;;  %v3783_v49 = vrot.slane %v3647_v48, 1  ;;  %v3929_v26 = vrot.slane %v8051_v33, %v7906_v40  ;;  %v6304_v18 = vld [vmem:[%s8459_s6 + $0x140] sm:$0xff]   ;;  %v6307_v33 = vld [vmem:[%s8459_s6 + $0x1d0] sm:$0xff]  }
 0x2ab   :  { %3858 = vmatpush1.bf16.msra.mxu0 %v6273_v29  ;;  %v8048_v6 = vsel %vm2310_vm7, %v4589_v61, %v4584_v38  ;;  %v3936_v22 = vrot.slane %v3922_v23, %v7906_v40  ;;  %v3651_v39 = vrot.slane %v3649_v12, 7  ;;  %v6295_v38 = vld [vmem:[%s8459_s6 + $0x1b0] sm:$0xff]   ;;  %v3951_v10 = vrot.slane %v8054_v43, %v7906_v40 }
 0x2ac   :  { %3859 = vmatprep.subr.bf16.mxu0 %v6390_v63  ;;  %v3958_v34 = vrot.slane %v3944_v7, %v7906_v40  ;;  %v3784_v16 = vsel %vm2310_vm7, %v3649_v12, %v3783_v49  ;;  %v3959_v61 = vunpack.c.l.b16 %v3929_v26  ;;  %v6306_v40 = vld [vmem:[%s8459_s6 + $0x188] sm:$0xff]   ;;  %v4412_v42 = vpack.c.b16 %v8011_v5, %v8011_v5  ;;  %v6312_v5 = vld [vmem:[%s8459_s6 + $0x210] sm:$0xff]   ;;  %v6316_v12 = vld [vmem:[%s8459_s6 + $0x200] sm:$0xff]  }
 0x2ad   :  { %3726 = vmatpush1.bf16.msra.mxu1 %v6274_v56  ;;  %v3960_v28 = vunpack.c.l.b16 %v3936_v22  ;;  %v3652_v17 = vsel %vm2310_vm7, %v3651_v39, %v3647_v48  ;;  %v3787_v32 = vpack.c.b16 %v3784_v16, %v3784_v16  ;;  %v6309_v7 = vld [vmem:[%s8459_s6 + $0x268] sm:$0xff]   ;;  %v6315_v48 = vld [vmem:[%s8459_s6 + $0x250] sm:$0xff]   ;;  %v6321_v49 = vld [vmem:[%s8459_s6 + $0x238] sm:$0xff]   ;;  %v4723_v26 = vpack.c.b16 %v8032_v35, %v8032_v35 }
 0x2ae   :  { %3727 = vmatprep.subr.bf16.mxu1 %v6390_v63  ;;  %v3962_v19 = vunpack.c.l.b16 %v3958_v34  ;;  %v3655_v13 = vpack.c.b16 %v3652_v17, %v3652_v17  ;;  %v4095_v43 = vrot.slane %v3959_v61, 1  ;;  %v4280_v34 = vpack.c.b16 %v7998_v54, %v7998_v54  ;;  %v6313_v54 = vld [vmem:[%s8459_s6 + $0x258] sm:$0xff]   ;;  %v6322_v39 = vld [vmem:[%s8459_s6 + $0x1e8] sm:$0xff]  }
 0x2af   :  { %3860 = vmatpush1.bf16.msra.mxu0 %v6275_v25  ;;  %v4097_v8 = vrot.slane %v3960_v28, 1  ;;  %v6292_v25 = vld [vmem:[%s8459_s6 + $0x170] sm:$0xff]   ;;  %v6326_v16 = vld [vmem:[%s8459_s6 + $0x228] sm:$0xff]  }
 0x2b0   :  { %3861 = vmatprep.subr.bf16.mxu0 %v6390_v63  ;;  %v3965_v46 = vrot.slane %v3962_v19, 7  ;;  %v6329_v17 = vld [vmem:[%s8459_s6 + $0x308] sm:$0xff]  }
 0x2b1   :  { %3728 = vmatpush1.bf16.msra.mxu1 %v6276_v57  ;;  %v4098_v29 = vsel %vm2310_vm7, %v3962_v19, %v4097_v8  ;;  %v6297_v57 = vld [vmem:[%s8459_s6 + $0x1a8] sm:$0xff]   ;;  %v6318_v19 = vld [vmem:[%s8459_s6 + $0x1f8] sm:$0xff]   ;;  %v6323_v8 = vld [vmem:[%s8459_s6 + $0x230] sm:$0xff]  }
 0x2b2   :  { %3729 = vmatprep.subr.bf16.mxu1 %v6390_v63  ;;  %v3966_v56 = vsel %vm2310_vm7, %v3965_v46, %v3960_v28  ;;  %v4100_v37 = vpack.c.b16 %v4098_v29, %v4098_v29  ;;  %v6317_v28 = vld [vmem:[%s8459_s6 + $0x248] sm:$0xff]   ;;  %v6324_v46 = vld [vmem:[%s8459_s6 + $0x1e0] sm:$0xff]   ;;  %v6327_v29 = vld [vmem:[%s8459_s6 + $0x270] sm:$0xff]  }
 0x2b3   :  { %3862 = vmatpush1.bf16.msra.mxu0 %v6277_v24  ;;  %v3968_v0 = vpack.c.b16 %v3966_v56, %v3966_v56  ;;  %v6301_v24 = vld [vmem:[%s8459_s6 + $0x198] sm:$0xff]   ;;  %v4724_v56 = vpack.c.b16 %v8038_v41, %v8038_v41  ;;  %v6331_v41 = vld [vmem:[%s8459_s6 + $0x300] sm:$0xff]  }
 0x2b4   :  { %3863 = vmatprep.subr.bf16.mxu0 %v6390_v63 }
 0x2b5   :  { %3730 = vmatpush1.bf16.msra.mxu1 %v6278_v21  ;;  %v6305_v21 = vld [vmem:[%s8459_s6 + $0x1d8] sm:$0xff]  }
 0x2b6   :  { %3731 = vmatprep.subr.bf16.mxu1 %v6390_v63 }
 0x2b7   :  { %3864 = vmatpush1.bf16.msra.mxu0 %v6279_v1  ;;  %v3961_v1 = vunpack.c.l.b16 %v3951_v10  ;;  %v4591_v10 = vpack.c.b16 %v8042_v11, %v8042_v11  ;;  %v6350_v11 = vld [vmem:[%s8461_s8 + $0x30] sm:$0xff]  }
 0x2b8   :  { %3865 = vmatprep.subr.bf16.mxu0 %v6390_v63 }
 0x2b9   :  { %3732 = vmatpush1.bf16.msra.mxu1 %v6280_v3  ;;  %v3963_v3 = vrot.slane %v3961_v1, 7  ;;  %v4096_v23 = vsel %vm2310_vm7, %v3961_v1, %v4095_v43 }
 0x2ba   :  { %3733 = vmatprep.subr.bf16.mxu1 %v6390_v63 }
 0x2bb   :  { %3866 = vmatpush1.bf16.msra.mxu0 %v6281_v47  ;;  %v6308_v47 = vld [vmem:[%s8459_s6 + $0x180] sm:$0xff]  }
 0x2bc   :  { %3867 = vmatprep.subr.bf16.mxu0 %v6390_v63 }
 0x2bd   :  { %3734 = vmatpush1.bf16.msra.mxu1 %v6282_v53  ;;  %v3964_v53 = vsel %vm2310_vm7, %v3963_v3, %v3959_v61  ;;  %v6349_v61 = vld [vmem:[%s8461_s8 + $0x38] sm:$0xff]  }
 0x2be   :  { %3735 = vmatprep.subr.bf16.mxu1 %v6390_v63  ;;  %v3967_v22 = vpack.c.b16 %v3964_v53, %v3964_v53 }
 0x2bf   :  { %3868 = vmatpush1.bf16.msra.mxu0 %v6283_v14  ;;  %v4099_v14 = vpack.c.b16 %v4096_v23, %v4096_v23 }
 0x2c0   :  { %3881 = vmatprep.subr.bf16.mxu0 %v6390_v63 }
 0x2c1   :  { %3736 = vmatpush1.bf16.msra.mxu1 %v6284_v55  ;;  %v6311_v55 = vld [vmem:[%s8459_s6 + $0x260] sm:$0xff]  }
 0x2c2   :  { %3749 = vmatprep.subr.bf16.mxu1 %v6390_v63 }
 0x2c3   :  { %3882 = vmatpush2.bf16.msra.mxu0 %v6285_v36  ;;  %v6314_v36 = vld [vmem:[%s8459_s6 + $0x208] sm:$0xff]  }
 0x2c4   :  { %3883 = vmatprep.subr.bf16.mxu0 %v6390_v63 }
 0x2c5   :  { %3750 = vmatpush2.bf16.msra.mxu1 %v6286_v44  ;;  %v6319_v44 = vld [vmem:[%s8459_s6 + $0x240] sm:$0xff]  }
 0x2c6   :  { %3751 = vmatprep.subr.bf16.mxu1 %v6390_v63 }
 0x2c7   :  { %3884 = vmatpush2.bf16.msra.mxu0 %v6287_v52  ;;  %v6320_v52 = vld [vmem:[%s8459_s6 + $0x1f0] sm:$0xff]  }
 0x2c8   :  { %4165 = vmatprep.subr.bf16.mxu0 %v6390_v63 }
 0x2c9   :  { %3752 = vmatpush2.bf16.msra.mxu1 %v6288_v27  ;;  %v6325_v27 = vld [vmem:[%s8459_s6 + $0x278] sm:$0xff]  }
 0x2ca   :  { %3886 = vmatmul.mubr.bf16.vlgmr.msra.gmra.mxu0 %v3787_v32  ;;  %4033 = vmatprep.subr.bf16.mxu1 %v6390_v63  ;;  %v4411_v32 = vpack.c.b16 %v8005_v15, %v8005_v15  ;;  %v4592_v15 = vpack.c.b16 %v8048_v6, %v8048_v6  ;;  %v6333_v6 = vld [vmem:[%s8459_s6 + $0x2f8] sm:$0xff]  }
 0x2cb   :  { %4166 = vmatpush1.bf16.msra.mxu0 %v6289_v9  ;;  %5597 = vmatprep.mubr.msk.bf16.mxu0 %vm3399_vm9, %v4100_v37  ;;  %v6328_v9 = vld [vmem:[%s8459_s6 + $0x220] sm:$0xff]   ;;  %v6330_v37 = vld [vmem:[%s8459_s6 + $0x2b8] sm:$0xff]  }
 0x2cc   :  { %3754 = vmatmul.mubr.bf16.vlgmr.msra.gmra.mxu1 %v3655_v13  ;;  %4167 = vmatprep.subr.bf16.mxu0 %v6390_v63  ;;  %v6334_v13 = vld [vmem:[%s8459_s6 + $0x2a8] sm:$0xff]  }
 0x2cd   :  { %4034 = vmatpush1.bf16.msra.mxu1 %v6290_v51  ;;  %5566 = vmatprep.mubr.msk.bf16.mxu1 %vm3399_vm9, %v3968_v0  ;;  %v4279_v51 = vpack.c.b16 %v8020_v30, %v8020_v30  ;;  %v6332_v30 = vld [vmem:[%s8459_s6 + $0x2b0] sm:$0xff]  }
 0x2ce   :  { %4035 = vmatprep.subr.bf16.mxu1 %v6390_v63  ;;  %v6335_v0 = vld [vmem:[%s8459_s6 + $0x2f0] sm:$0xff]  }
 0x2cf   :  { %4168 = vmatpush1.bf16.msra.mxu0 %v6291_v20  ;;  %v6336_v20 = vld [vmem:[%s8459_s6 + $0x2a0] sm:$0xff]  }
 0x2d0   :  { %4169 = vmatprep.subr.bf16.mxu0 %v6390_v63 }
 0x2d1   :  { %4036 = vmatpush1.bf16.msra.mxu1 %v6292_v25  ;;  %v6337_v25 = vld [vmem:[%s8459_s6 + $0x2e8] sm:$0xff]  }
 0x2d2   :  { %4037 = vmatprep.subr.bf16.mxu1 %v6390_v63 }
 0x2d3   :  { %4170 = vmatpush1.bf16.msra.mxu0 %v6293_v45  ;;  %v6338_v45 = vld [vmem:[%s8459_s6 + $0x298] sm:$0xff]  }
 0x2d4   :  { %4171 = vmatprep.subr.bf16.mxu0 %v6390_v63 }
 0x2d5   :  { %4038 = vmatpush1.bf16.msra.mxu1 %v6294_v50  ;;  %v6339_v50 = vld [vmem:[%s8459_s6 + $0x2e0] sm:$0xff]  }
 0x2d6   :  { %4039 = vmatprep.subr.bf16.mxu1 %v6390_v63 }
 0x2d7   :  { %4172 = vmatpush1.bf16.msra.mxu0 %v6295_v38  ;;  %v6340_v38 = vld [vmem:[%s8459_s6 + $0x290] sm:$0xff]  }
 0x2d8   :  { %4173 = vmatprep.subr.bf16.mxu0 %v6390_v63 }
 0x2d9   :  { %4040 = vmatpush1.bf16.msra.mxu1 %v6296_v62  ;;  %v6341_v62 = vld [vmem:[%s8459_s6 + $0x2d8] sm:$0xff]  }
 0x2da   :  { %4041 = vmatprep.subr.bf16.mxu1 %v6390_v63 }
 0x2db   :  { %4174 = vmatpush1.bf16.msra.mxu0 %v6297_v57  ;;  %v6342_v57 = vld [vmem:[%s8459_s6 + $0x288] sm:$0xff]  }
 0x2dc   :  { %4175 = vmatprep.subr.bf16.mxu0 %v6390_v63 }
 0x2dd   :  { %4042 = vmatpush1.bf16.msra.mxu1 %v6298_v31  ;;  %v6343_v31 = vld [vmem:[%s8459_s6 + $0x2d0] sm:$0xff]  }
 0x2de   :  { %4043 = vmatprep.subr.bf16.mxu1 %v6390_v63 }
 0x2df   :  { %4176 = vmatpush1.bf16.msra.mxu0 %v6299_v59  ;;  %v6344_v59 = vld [vmem:[%s8459_s6 + $0x280] sm:$0xff]  }
 0x2e0   :  { %4177 = vmatprep.subr.bf16.mxu0 %v6390_v63 }
 0x2e1   :  { %4044 = vmatpush1.bf16.msra.mxu1 %v6300_v60  ;;  %v6345_v60 = vld [vmem:[%s8459_s6 + $0x318] sm:$0xff]  }
 0x2e2   :  { %4045 = vmatprep.subr.bf16.mxu1 %v6390_v63 }
 0x2e3   :  { %4178 = vmatpush1.bf16.msra.mxu0 %v6301_v24  ;;  %v6346_v24 = vld [vmem:[%s8459_s6 + $0x2c8] sm:$0xff]  }
 0x2e4   :  { %4179 = vmatprep.subr.bf16.mxu0 %v6390_v63 }
 0x2e5   :  { %4046 = vmatpush1.bf16.msra.mxu1 %v6302_v58  ;;  %v6347_v58 = vld [vmem:[%s8459_s6 + $0x310] sm:$0xff]  }
 0x2e6   :  { %4047 = vmatprep.subr.bf16.mxu1 %v6390_v63 }
 0x2e7   :  { %4180 = vmatpush1.bf16.msra.mxu0 %v6303_v4  ;;  %v6348_v4 = vld [vmem:[%s8459_s6 + $0x2c0] sm:$0xff]  }
 0x2e8   :  { %4193 = vmatprep.subr.bf16.mxu0 %v6390_v63 }
 0x2e9   :  { %4048 = vmatpush1.bf16.msra.mxu1 %v6304_v18 }
 0x2ea   :  { %4061 = vmatprep.subr.bf16.mxu1 %v6390_v63 }
 0x2eb   :  { %4194 = vmatpush2.bf16.msra.mxu0 %v6305_v21  ;;  %v5442_v21 = vld [vmem:[%s8460_s7] ss:$0 sm:$0xff] }
 0x2ec   :  { %4195 = vmatprep.subr.bf16.mxu0 %v6390_v63 }
 0x2ed   :  { %4062 = vmatpush2.bf16.msra.mxu1 %v6306_v40 }
 0x2ee   :  { %4063 = vmatprep.subr.bf16.mxu1 %v6390_v63 }
 0x2ef   :  { %4196 = vmatpush2.bf16.msra.mxu0 %v6307_v33 }
 0x2f0   :  { %4477 = vmatprep.subr.bf16.mxu0 %v6390_v63 }
 0x2f1   :  { %4064 = vmatpush2.bf16.msra.mxu1 %v6308_v47 }
 0x2f2   :  { %4198 = vmatmul.mubr.bf16.vlgmr.msra.gmra.mxu0 %v4099_v14  ;;  %4345 = vmatprep.subr.bf16.mxu1 %v6390_v63  ;;  %v6352_v14 = vld [vmem:[%s8461_s8 + $0x20] sm:$0xff]  }
 0x2f3   :  { %4478 = vmatpush1.bf16.msra.mxu0 %v6309_v7  ;;  %5659 = vmatprep.mubr.msk.bf16.mxu0 %vm3399_vm9, %v4412_v42  ;;  %v6351_v7 = vld [vmem:[%s8461_s8 + $0x28] sm:$0xff]   ;;  %v6353_v42 = vld [vmem:[%s8461_s8 + $0x18] sm:$0xff]  }
 0x2f4   :  { %4066 = vmatmul.mubr.bf16.vlgmr.msra.gmra.mxu1 %v3967_v22  ;;  %4479 = vmatprep.subr.bf16.mxu0 %v6390_v63 }
 0x2f5   :  { %4346 = vmatpush1.bf16.msra.mxu1 %v6310_v2  ;;  %5628 = vmatprep.mubr.msk.bf16.mxu1 %vm3399_vm9, %v4280_v34  ;;  %v6354_v2 = vld [vmem:[%s8461_s8 + $0x10] sm:$0xff]   ;;  %v6355_v34 = vld [vmem:[%s8461_s8 + $0x8] sm:$0xff]  }
 0x2f6   :  { %4347 = vmatprep.subr.bf16.mxu1 %v6390_v63 }
 0x2f7   :  { %4480 = vmatpush1.bf16.msra.mxu0 %v6311_v55 }
 0x2f8   :  { %4481 = vmatprep.subr.bf16.mxu0 %v6390_v63 }
 0x2f9   :  { %4348 = vmatpush1.bf16.msra.mxu1 %v6312_v5 }
 0x2fa   :  { %4349 = vmatprep.subr.bf16.mxu1 %v6390_v63 }
 0x2fb   :  { %4482 = vmatpush1.bf16.msra.mxu0 %v6313_v54 }
 0x2fc   :  { %4483 = vmatprep.subr.bf16.mxu0 %v6390_v63 }
 0x2fd   :  { %4350 = vmatpush1.bf16.msra.mxu1 %v6314_v36  ;;  %v6356_v36 = vld [vmem:[%s8461_s8] sm:$0xff]  }
 0x2fe   :  { %4351 = vmatprep.subr.bf16.mxu1 %v6390_v63 }
 0x2ff   :  { %4484 = vmatpush1.bf16.msra.mxu0 %v6315_v48  ;;  %v6357_v48 = vld [vmem:[%s8463_s10 + $0x38] sm:$0xff]  }
 0x300   :  { %4485 = vmatprep.subr.bf16.mxu0 %v6390_v63 }
 0x301   :  { %4352 = vmatpush1.bf16.msra.mxu1 %v6316_v12 }
 0x302   :  { %4353 = vmatprep.subr.bf16.mxu1 %v6390_v63 }
 0x303   :  { %4486 = vmatpush1.bf16.msra.mxu0 %v6317_v28 }
 0x304   :  { %4487 = vmatprep.subr.bf16.mxu0 %v6390_v63 }
 0x305   :  { %4354 = vmatpush1.bf16.msra.mxu1 %v6318_v19 }
 0x306   :  { %4355 = vmatprep.subr.bf16.mxu1 %v6390_v63 }
 0x307   :  { %4488 = vmatpush1.bf16.msra.mxu0 %v6319_v44  ;;  %v6358_v44 = vld [vmem:[%s8463_s10 + $0x30] sm:$0xff]  }
 0x308   :  { %4489 = vmatprep.subr.bf16.mxu0 %v6390_v63 }
 0x309   :  { %4356 = vmatpush1.bf16.msra.mxu1 %v6320_v52 }
 0x30a   :  { %4357 = vmatprep.subr.bf16.mxu1 %v6390_v63 }
 0x30b   :  { %4490 = vmatpush1.bf16.msra.mxu0 %v6321_v49 }
 0x30c   :  { %4491 = vmatprep.subr.bf16.mxu0 %v6390_v63 }
 0x30d   :  { %4358 = vmatpush1.bf16.msra.mxu1 %v6322_v39 }
 0x30e   :  { %4359 = vmatprep.subr.bf16.mxu1 %v6390_v63 }
 0x30f   :  { %4492 = vmatpush1.bf16.msra.mxu0 %v6323_v8  ;;  %v6359_v8 = vld [vmem:[%s8463_s10 + $0x28] sm:$0xff]  }
 0x310   :  { %4505 = vmatprep.subr.bf16.mxu0 %v6390_v63 }
 0x311   :  { %4360 = vmatpush1.bf16.msra.mxu1 %v6324_v46  ;;  %v6360_v46 = vld [vmem:[%s8463_s10 + $0x20] sm:$0xff]  }
 0x312   :  { %4373 = vmatprep.subr.bf16.mxu1 %v6390_v63 }
 0x313   :  { %4506 = vmatpush2.bf16.msra.mxu0 %v6325_v27  ;;  %v6361_v27 = vld [vmem:[%s8463_s10 + $0x18] sm:$0xff]  }
 0x314   :  { %4507 = vmatprep.subr.bf16.mxu0 %v6390_v63 }
 0x315   :  { %4374 = vmatpush2.bf16.msra.mxu1 %v6326_v16  ;;  %v6362_v16 = vld [vmem:[%s8463_s10 + $0x10] sm:$0xff]  }
 0x316   :  { %4375 = vmatprep.subr.bf16.mxu1 %v6390_v63 }
 0x317   :  { %4508 = vmatpush2.bf16.msra.mxu0 %v6327_v29 }
 0x318   :  { %4789 = vmatprep.subr.bf16.mxu0 %v6390_v63 }
 0x319   :  { %4376 = vmatpush2.bf16.msra.mxu1 %v6328_v9 }
 0x31a   :  { %4510 = vmatmul.mubr.bf16.vlgmr.msra.gmra.mxu0 %v4411_v32  ;;  %4657 = vmatprep.subr.bf16.mxu1 %v6390_v63 }
 0x31b   :  { %4790 = vmatpush1.bf16.msra.mxu0 %v6329_v17  ;;  %5721 = vmatprep.mubr.msk.bf16.mxu0 %vm3399_vm9, %v4724_v56 }
 0x31c   :  { %4378 = vmatmul.mubr.bf16.vlgmr.msra.gmra.mxu1 %v4279_v51  ;;  %4791 = vmatprep.subr.bf16.mxu0 %v6390_v63 }
 0x31d   :  { %4658 = vmatpush1.bf16.msra.mxu1 %v6330_v37  ;;  %5690 = vmatprep.mubr.msk.bf16.mxu1 %vm3399_vm9, %v4592_v15 }
 0x31e   :  { %4659 = vmatprep.subr.bf16.mxu1 %v6390_v63 }
 0x31f   :  { %4792 = vmatpush1.bf16.msra.mxu0 %v6331_v41 }
 0x320   :  { %4793 = vmatprep.subr.bf16.mxu0 %v6390_v63 }
 0x321   :  { %4660 = vmatpush1.bf16.msra.mxu1 %v6332_v30 }
 0x322   :  { %4661 = vmatprep.subr.bf16.mxu1 %v6390_v63 }
 0x323   :  { %4794 = vmatpush1.bf16.msra.mxu0 %v6333_v6 }
 0x324   :  { %4795 = vmatprep.subr.bf16.mxu0 %v6390_v63 }
 0x325   :  { %4662 = vmatpush1.bf16.msra.mxu1 %v6334_v13 }
 0x326   :  { %4663 = vmatprep.subr.bf16.mxu1 %v6390_v63 }
 0x327   :  { %4796 = vmatpush1.bf16.msra.mxu0 %v6335_v0 }
 0x328   :  { %4797 = vmatprep.subr.bf16.mxu0 %v6390_v63 }
 0x329   :  { %4664 = vmatpush1.bf16.msra.mxu1 %v6336_v20 }
 0x32a   :  { %4665 = vmatprep.subr.bf16.mxu1 %v6390_v63 }
 0x32b   :  { %4798 = vmatpush1.bf16.msra.mxu0 %v6337_v25 }
 0x32c   :  { %4799 = vmatprep.subr.bf16.mxu0 %v6390_v63 }
 0x32d   :  { %4666 = vmatpush1.bf16.msra.mxu1 %v6338_v45 }
 0x32e   :  { %4667 = vmatprep.subr.bf16.mxu1 %v6390_v63 }
 0x32f   :  { %4800 = vmatpush1.bf16.msra.mxu0 %v6339_v50 }
 0x330   :  { %4801 = vmatprep.subr.bf16.mxu0 %v6390_v63 }
 0x331   :  { %4668 = vmatpush1.bf16.msra.mxu1 %v6340_v38 }
 0x332   :  { %4669 = vmatprep.subr.bf16.mxu1 %v6390_v63 }
 0x333   :  { %4802 = vmatpush1.bf16.msra.mxu0 %v6341_v62 }
 0x334   :  { %4803 = vmatprep.subr.bf16.mxu0 %v6390_v63 }
 0x335   :  { %4670 = vmatpush1.bf16.msra.mxu1 %v6342_v57 }
 0x336   :  { %4671 = vmatprep.subr.bf16.mxu1 %v6390_v63 }
 0x337   :  { %4804 = vmatpush1.bf16.msra.mxu0 %v6343_v31 }
 0x338   :  { %4817 = vmatprep.subr.bf16.mxu0 %v6390_v63 }
 0x339   :  { %4672 = vmatpush1.bf16.msra.mxu1 %v6344_v59 }
 0x33a   :  { %4685 = vmatprep.subr.bf16.mxu1 %v6390_v63 }
 0x33b   :  { %4818 = vmatpush2.bf16.msra.mxu0 %v6345_v60 }
 0x33c   :  { %4819 = vmatprep.subr.bf16.mxu0 %v6390_v63 }
 0x33d   :  { %4686 = vmatpush2.bf16.msra.mxu1 %v6346_v24 }
 0x33e   :  { %4687 = vmatprep.subr.bf16.mxu1 %v6390_v63  ;;  %v6392_v63 = vmov 0.0  }
 0x33f   :  { %4820 = vmatpush2.bf16.msra.mxu0 %v6347_v58 }
 0x340   :  { %6078 = vmatprep.subr.bf16.mxu0 %v6392_v63 }
 0x341   :  { %4688 = vmatpush2.bf16.msra.mxu1 %v6348_v4 }
 0x342   :  { %4822 = vmatmul.mubr.bf16.vlgmr.msra.gmra.mxu0 %v4723_v26  ;;  %6058 = vmatprep.subr.bf16.mxu1 %v6392_v63 }
 0x343   :  { %6094 = vmatprep.mubr.msk.bf16.mxu0 %vm6393_vm10, %v6392_v63  ;;  %6079 = vmatpush3.bf16.msra.mxu0 %v6357_v48 }
 0x344   :  { %4690 = vmatmul.mubr.bf16.vlgmr.msra.gmra.mxu1 %v4591_v10  ;;  %6080 = vmatprep.subr.bf16.mxu0 %v6392_v63 }
 0x345   :  { %6059 = vmatpush3.bf16.msra.mxu1 %v6349_v61  ;;  %6074 = vmatprep.mubr.msk.bf16.mxu1 %vm6393_vm10, %v6392_v63 }
 0x346   :  { %6060 = vmatprep.subr.bf16.mxu1 %v6392_v63 }
 0x347   :  { %6081 = vmatpush3.bf16.msra.mxu0 %v6358_v44 }
 0x348   :  { %6082 = vmatprep.subr.bf16.mxu0 %v6392_v63 }
 0x349   :  { %6061 = vmatpush3.bf16.msra.mxu1 %v6350_v11  ;;  %v6364_v11 = vld [vmem:[%s8463_s10] sm:$0xff]  }
 0x34a   :  { %6062 = vmatprep.subr.bf16.mxu1 %v6392_v63 }
 0x34b   :  { %6083 = vmatpush3.bf16.msra.mxu0 %v6359_v8 }
 0x34c   :  { %6084 = vmatprep.subr.bf16.mxu0 %v6392_v63 }
 0x34d   :  { %6063 = vmatpush3.bf16.msra.mxu1 %v6351_v7 }
 0x34e   :  { %6064 = vmatprep.subr.bf16.mxu1 %v6392_v63 }
 0x34f   :  { %6085 = vmatpush3.bf16.msra.mxu0 %v6360_v46 }
 0x350   :  { %6086 = vmatprep.subr.bf16.mxu0 %v6392_v63 }
 0x351   :  { %6065 = vmatpush3.bf16.msra.mxu1 %v6352_v14  ;;  %v5731_v14 = vld [vmem:[%s8464_s11] ss:$0 sm:$0xff] }
 0x352   :  { %6066 = vmatprep.subr.bf16.mxu1 %v6392_v63 }
 0x353   :  { %6087 = vmatpush3.bf16.msra.mxu0 %v6361_v27 }
 0x354   :  { %6088 = vmatprep.subr.bf16.mxu0 %v6392_v63 }
 0x355   :  { %6067 = vmatpush3.bf16.msra.mxu1 %v6353_v42 }
 0x356   :  { %6068 = vmatprep.subr.bf16.mxu1 %v6392_v63 }
 0x357   :  { %6089 = vmatpush3.bf16.msra.mxu0 %v6362_v16 }
 0x358   :  { %6090 = vmatprep.subr.bf16.mxu0 %v6392_v63 }
 0x359   :  { %6069 = vmatpush3.bf16.msra.mxu1 %v6354_v2 }
 0x35a   :  { %6070 = vmatprep.subr.bf16.mxu1 %v6392_v63 }
 0x35d   :  { %6071 = vmatpush3.bf16.msra.mxu1 %v6355_v34 }
 0x35e   :  { %6072 = vmatprep.subr.bf16.mxu1 %v6392_v63 }
 0x361   :  { %6073 = vmatpush3.bf16.msra.mxu1 %v6356_v36 }
 0x362   :  { %v3575_v18 = vpop.f32.mrf.mxu0 }
 0x364   :  { %v3437_v35 = vpop.f32.mrf.mxu1  ;;  %v3577_v1 = vpop.f32.mrf.mxu0 }
 0x365   :  { %v3449_v40 = vadd.f32 %v5442_v21, %v3437_v35  ;;  %v6363_v1 = vld [vmem:[%s8463_s10 + $0x8] sm:$0xff]   ;;  %s6394_s10 = smov [#allocation2]  }
 0x366   :  { %v3439_v33 = vpop.f32.mrf.mxu1  ;;  %v3578_v43 = vpop.f32.mrf.mxu0  ;;  %6091 = vmatpush3.bf16.msra.mxu0 %v6363_v1  ;;  %s5063_s1 = sshll.u32 %s6394_s10, 4  ;;  %s5064_s1 = int_to_ptr.vmem [resolvable:$true] %s5063_s1 }
 0x367   :  { %v3581_v3 = vadd.f32 %v3575_v18, %v3449_v40  ;;  %6092 = vmatprep.subr.bf16.mxu0 %v6392_v63  ;;  %v5722_v40 = vld [vmem:[%s8462_s9] ss:$0 sm:$0xff]  ;;  %s6367_s9 = scalar_lea.vmem %s5064_s1, 32  ;;  %p6372_p1 = scmp.lt.s32.totalorder %s5064_s1, %s5064_s1 }
 0x368   :  { %v3440_v47 = vpop.f32.mrf.mxu1  ;;  %v3579_v23 = vpop.f32.mrf.mxu0  ;;  %p6368_p0 = scmp.ne.s32.totalorder %s5064_s1, %s6367_s9  ;;  %p6373_p2 = scmp.lt.s32.totalorder %s6367_s9, %s6367_s9 }
 0x36a   :  { %v3441_v53 = vpop.f32.mrf.mxu1  ;;  %6093 = vmatpush3.bf16.msra.mxu0 %v6364_v11  ;;  %p6374_p3 = por %p6373_p2, %p6372_p1 }
 0x36c   :  { %p6375_p4 = pnand %p6374_p3, %p6368_p0 }
 0x38a   :  { %v3887_v22 = vpop.f32.mrf.mxu0 }
 0x38c   :  { %v3755_v55 = vpop.f32.mrf.mxu1  ;;  %v3889_v5 = vpop.f32.mrf.mxu0 }
 0x38d   :  { %v3761_v54 = vadd.f32 %v3755_v55, %v3581_v3 }
 0x38e   :  { %v3757_v12 = vpop.f32.mrf.mxu1  ;;  %v3890_v28 = vpop.f32.mrf.mxu0 }
 0x38f   :  { %v3893_v19 = vadd.f32 %v3887_v22, %v3761_v54 }
 0x390   :  { %v3758_v52 = vpop.f32.mrf.mxu1  ;;  %v3891_v49 = vpop.f32.mrf.mxu0 }
 0x392   :  { %v3759_v39 = vpop.f32.mrf.mxu1 }
 0x3b2   :  { %v4199_v29 = vpop.f32.mrf.mxu0 }
 0x3b4   :  { %v4067_v9 = vpop.f32.mrf.mxu1  ;;  %v4201_v17 = vpop.f32.mrf.mxu0 }
 0x3b5   :  { %v4073_v32 = vadd.f32 %v4067_v9, %v3893_v19 }
 0x3b6   :  { %v4069_v56 = vpop.f32.mrf.mxu1  ;;  %v4202_v37 = vpop.f32.mrf.mxu0 }
 0x3b7   :  { %v4205_v51 = vadd.f32 %v4199_v29, %v4073_v32 }
 0x3b8   :  { %v4070_v15 = vpop.f32.mrf.mxu1  ;;  %v4203_v41 = vpop.f32.mrf.mxu0 }
 0x3ba   :  { %v4071_v30 = vpop.f32.mrf.mxu1 }
 0x3da   :  { %v4511_v6 = vpop.f32.mrf.mxu0 }
 0x3dc   :  { %v4379_v13 = vpop.f32.mrf.mxu1  ;;  %v4513_v0 = vpop.f32.mrf.mxu0 }
 0x3dd   :  { %v4385_v62 = vadd.f32 %v4379_v13, %v4205_v51 }
 0x3de   :  { %v4381_v20 = vpop.f32.mrf.mxu1  ;;  %v4514_v25 = vpop.f32.mrf.mxu0 }
 0x3df   :  { %v4517_v31 = vadd.f32 %v4511_v6, %v4385_v62 }
 0x3e0   :  { %v4382_v45 = vpop.f32.mrf.mxu1  ;;  %v4515_v50 = vpop.f32.mrf.mxu0 }
 0x3e2   :  { %v4383_v38 = vpop.f32.mrf.mxu1 }
 0x402   :  { %v4823_v57 = vpop.f32.mrf.mxu0 }
 0x404   :  { %v4691_v59 = vpop.f32.mrf.mxu1  ;;  %v4825_v60 = vpop.f32.mrf.mxu0 }
 0x405   :  { %v4697_v24 = vadd.f32 %v4691_v59, %v4517_v31 }
 0x406   :  { %v4693_v58 = vpop.f32.mrf.mxu1  ;;  %v4826_v4 = vpop.f32.mrf.mxu0 }
 0x407   :  { %v4829_v26 = vadd.f32 %v4823_v57, %v4697_v24 }
 0x408   :  { %v4694_v10 = vpop.f32.mrf.mxu1  ;;  %v4827_v18 = vpop.f32.mrf.mxu0 }
 0x409   :  { %v4830_v21 = vmax.f32 %v4829_v26, 0.0 }
 0x40a   :  { %v4695_v61 = vpop.f32.mrf.mxu1 }
 0x40b   :  { %v4831_v35 = vpack.c.bf16 %v4830_v21, %v4830_v21 }
 0x40d   :  { %6075 = vmatmul.mubr.bf16.vlgmr.msra.gmra.mxu1 %v4831_v35 }
 0x4cd   :  { %v4937_v33 = vpop.f32.mrf.mxu1 }
 0x4ce   :  { %v4938_v43 = vadd.f32 %v5722_v40, %v4937_v33 }
 0x4cf   :  { %v6076_v3 = vpop.f32.mrf.mxu1 }
 0x4d0   :  { %v4943_v47 = vmax.f32 %v4938_v43, 0.0 }
 0x4d1   :  { %v4940_v23 = vpop.f32.mrf.mxu1 }
 0x4d2   :  { %v4944_v7 = vpack.c.bf16 %v4943_v47, %v4943_v47 }
 0x4d3   :  { %v6077_v53 = vpop.f32.mrf.mxu1 }
 0x4d4   :  { %6095 = vmatmul.mubr.bf16.vlgmr.msra.gmra.mxu0 %v4944_v7 }
 0x594   :  { %v5050_v63 = vpop.f32.mrf.mxu0 }
 0x595   :  { %v5051_v42 = vadd.f32 %v5731_v14, %v5050_v63 }
 0x596   :  { %v6096_v2 = vpop.f32.mrf.mxu0 }
 0x597   :  { %5056 = vst [vmem:[#allocation2] sm:$0x3] %v5051_v42 }
 0x598   :  { %v5053_v22 = vpop.f32.mrf.mxu0 }
 0x599   :  { %6378 = shalt.err (!%p6375_p4)
}
 0x59a   :  { %5066 = dma.vmem_to_hbm [thread:$0]  %s5064_s1, 32, %s8465_s12, [#allocation3]   ;;  %v6097_v34 = vpop.f32.mrf.mxu0 }
 0x59b   :  { %6387 = dma.done.wait [#allocation3], 32  }
 0x59c   :  { %6388 = vsyncadd [#allocation3], 4294967264 }
 0x59d   :  { %5070 = vsyncpa [#allocation3], 1 }

</bundles_post_ra>
